<compile_context>
chip_gen: v6e
topology: v6e:2x2x1
jax: 0.10.0
libtpu: 0.0.40
codegen_flags: <defaults>
</compile_context>

<pallas_src>
import functools
import math

import jax
import jax.numpy as jnp
from jax.experimental import pallas as pl
from jax.experimental.pallas import tpu as pltpu


def _conv_bn_act_kernel(x_ref, w_ref, b_ref, o_ref, *,
                        kh_size, kw_size, h_out, w_out, stride,
                        activation, alpha):
    """One (image n, C_out tile j) grid step.

    x_ref : (1, H_pad, W_pad, C_in)   padded NHWC image (compute dtype)
    w_ref : (KH*KW, C_in, TN)         BN-folded weight tile (compute dtype)
    b_ref : (1, TN)                   folded bias (f32)
    o_ref : (1, H_out*W_out, TN)      output tile (f32), lane-dense (TN = 128k)
    """
    m2 = h_out * w_out
    tn = o_ref.shape[-1]
    acc = jnp.zeros((m2, tn), jnp.float32)
    # Static unrolled (kh, kw) reduction: each term is a shifted spatial window
    # matmul'd against one (C_in, TN) slice of the weight, accumulated in f32.
    for kh in range(kh_size):
        for kw in range(kw_size):
            if stride == 1:
                win = x_ref[0, kh:kh + h_out, kw:kw + w_out, :]
            else:
                # NOTE: stride>1 path uses strided pl.ds loads; demo below only
                # exercises stride=1 (the common ConvolutionalBlock configuration).
                win = x_ref[0,
                            pl.ds(kh, h_out, stride=stride),
                            pl.ds(kw, w_out, stride=stride),
                            :]
            lhs = win.reshape(m2, win.shape[-1])
            acc = acc + jnp.dot(lhs, w_ref[kh * kw_size + kw],
                                preferred_element_type=jnp.float32)
    y = acc + b_ref[...]                      # folded conv bias + BN shift
    if activation == "prelu":
        y = jnp.where(y >= 0, y, alpha * y)
    elif activation == "leakyrelu":
        y = jnp.where(y >= 0, y, 0.2 * y)
    elif activation == "tanh":
        y = jnp.tanh(y)
    o_ref[0] = y.astype(o_ref.dtype)


def conv_block_forward(x_nchw, weight, conv_bias, *, stride=1,
                       batch_norm=False, bn_gamma=None, bn_beta=None,
                       bn_mean=None, bn_var=None, bn_eps=1e-5,
                       activation=None, prelu_alpha=0.25,
                       compute_dtype=jnp.bfloat16, tn=128):
    """Forward pass of ConvolutionalBlock (inference semantics).

    x_nchw:  (N, C_in, H, W) float32
    weight:  (C_out, C_in, KH, KW) float32  (PyTorch OIHW layout)
    conv_bias: (C_out,) float32
    Returns: (N, C_out, H_out, W_out) float32
    """
    if activation is not None:
        activation = activation.lower()
        assert activation in {"prelu", "leakyrelu", "tanh"}

    N, C_in, H, W = x_nchw.shape
    C_out, _, KH, KW = weight.shape
    pad = KH // 2                      # nn.Conv2d(padding=kernel_size//2)
    H_out = (H + 2 * pad - KH) // stride + 1
    W_out = (W + 2 * pad - KW) // stride + 1
    H_pad, W_pad = H + 2 * pad, W + 2 * pad
    M2 = H_out * W_out

    # ---- fold conv bias + BatchNorm (inference) into weight columns / bias ----
    w_f32 = weight.astype(jnp.float32)
    b_f32 = conv_bias.astype(jnp.float32)
    if batch_norm:
        inv_std = 1.0 / jnp.sqrt(bn_var.astype(jnp.float32) + bn_eps)
        scale = bn_gamma.astype(jnp.float32) * inv_std                  # (C_out,)
        bias = bn_beta.astype(jnp.float32) + (b_f32 - bn_mean.astype(jnp.float32)) * scale
        w_eff = w_f32 * scale[:, None, None, None]
    else:
        bias = b_f32
        w_eff = w_f32

    # ---- lane-dense output: pad C_out up to a multiple of `tn` (=128) ----
    C_out_pad = ((C_out + tn - 1) // tn) * tn
    # (C_out, C_in, KH, KW) -> (KH*KW, C_in, C_out_pad), flattened k = kh*KW + kw
    w_k = jnp.transpose(w_eff, (2, 3, 1, 0)).reshape(KH * KW, C_in, C_out)
    if C_out_pad != C_out:
        w_k = jnp.pad(w_k, ((0, 0), (0, 0), (0, C_out_pad - C_out)))
        bias = jnp.pad(bias, (0, C_out_pad - C_out))
    w_k = w_k.astype(compute_dtype)
    bias2 = bias.reshape(1, C_out_pad).astype(jnp.float32)

    # ---- glue: NCHW -> padded NHWC, single pass, streamed in compute dtype ----
    x = jnp.transpose(x_nchw, (0, 2, 3, 1)).astype(compute_dtype)
    xp = jnp.pad(x, ((0, 0), (pad, pad), (pad, pad), (0, 0)))

    kernel = functools.partial(
        _conv_bn_act_kernel,
        kh_size=KH, kw_size=KW, h_out=H_out, w_out=W_out, stride=stride,
        activation=activation, alpha=float(prelu_alpha))

    # TODO(synk): for very large spatial extents (whole image + f32 accumulator
    # exceeding the VMEM budget, esp. on v7x's 64 MiB), add an output-row grid
    # axis with a manually DMA'd halo instead of whole-image blocks.
    out = pl.pallas_call(
        kernel,
        out_shape=jax.ShapeDtypeStruct((N, M2, C_out_pad), jnp.float32),
        grid_spec=pltpu.PrefetchScalarGridSpec(
            num_scalar_prefetch=0,
            grid=(N, C_out_pad // tn),
            in_specs=[
                pl.BlockSpec((1, H_pad, W_pad, C_in), lambda n, j: (n, 0, 0, 0)),
                pl.BlockSpec((KH * KW, C_in, tn), lambda n, j: (0, 0, j)),
                pl.BlockSpec((1, tn), lambda n, j: (0, j)),
            ],
            out_specs=pl.BlockSpec((1, M2, tn), lambda n, j: (n, 0, j)),
        ),
        compiler_params=pltpu.CompilerParams(
            dimension_semantics=("parallel", "parallel")),
    )(xp, w_k, bias2)

    out = out[:, :, :C_out].reshape(N, H_out, W_out, C_out)
    return jnp.transpose(out, (0, 3, 1, 2))                 # back to NCHW


def _reference(x, weight, conv_bias, *, stride=1, batch_norm=False,
               bn_gamma=None, bn_beta=None, bn_mean=None, bn_var=None,
               bn_eps=1e-5, activation=None, prelu_alpha=0.25):
    pad = weight.shape[2] // 2
    y = jax.lax.conv_general_dilated(
        x, weight, (stride, stride), [(pad, pad), (pad, pad)],
        dimension_numbers=("NCHW", "OIHW", "NCHW"))
    y = y + conv_bias[None, :, None, None]
    if batch_norm:
        y = bn_gamma[None, :, None, None] * (y - bn_mean[None, :, None, None]) \
            / jnp.sqrt(bn_var[None, :, None, None] + bn_eps) \
            + bn_beta[None, :, None, None]
    if activation == "prelu":
        y = jnp.where(y >= 0, y, prelu_alpha * y)
    elif activation == "leakyrelu":
        y = jnp.where(y >= 0, y, 0.2 * y)
    elif activation == "tanh":
        y = jnp.tanh(y)
    return y


if __name__ == "__main__":
    # Small shapes consistent with the module's forward: (N, in_channels, H, W)
    N, C_in, C_out, H, W = 2, 4, 8, 16, 16
    kernel_size = 3

    key = jax.random.PRNGKey(0)
    k_x, k_w, k_b, k_g, k_be, k_m, k_v = jax.random.split(key, 7)

    x = jax.random.normal(k_x, (N, C_in, H, W), jnp.float32)

    # Deterministic parameter init (Conv2d-style fan-in uniform)
    fan_in = C_in * kernel_size * kernel_size
    bound = 1.0 / math.sqrt(fan_in)
    weight = jax.random.uniform(k_w, (C_out, C_in, kernel_size, kernel_size),
                                jnp.float32, -bound, bound)
    conv_bias = jax.random.uniform(k_b, (C_out,), jnp.float32, -bound, bound)

    # BatchNorm2d inference-mode statistics/affine (deterministic)
    bn_gamma = 1.0 + 0.1 * jax.random.normal(k_g, (C_out,), jnp.float32)
    bn_beta = 0.1 * jax.random.normal(k_be, (C_out,), jnp.float32)
    bn_mean = 0.1 * jax.random.normal(k_m, (C_out,), jnp.float32)
    bn_var = jnp.abs(1.0 + 0.1 * jax.random.normal(k_v, (C_out,), jnp.float32))
    prelu_alpha = 0.25   # nn.PReLU() default init (single shared parameter)
    # NOTE: per-channel PReLU (num_parameters=C_out) is not supported here.

    # --- Config A: Conv + BN + PReLU, bf16 streamed operands (perf default) ---
    out_a = conv_block_forward(
        x, weight, conv_bias, stride=1, batch_norm=True,
        bn_gamma=bn_gamma, bn_beta=bn_beta, bn_mean=bn_mean, bn_var=bn_var,
        bn_eps=1e-5, activation="prelu", prelu_alpha=prelu_alpha,
        compute_dtype=jnp.bfloat16)
    out_a = jax.block_until_ready(out_a)
    ref_a = _reference(
        x, weight, conv_bias, stride=1, batch_norm=True,
        bn_gamma=bn_gamma, bn_beta=bn_beta, bn_mean=bn_mean, bn_var=bn_var,
        bn_eps=1e-5, activation="prelu", prelu_alpha=prelu_alpha)
    assert out_a.shape == (N, C_out, H, W), out_a.shape
    err_a = float(jnp.max(jnp.abs(out_a - ref_a)))
    assert err_a < 5e-2, f"bf16 path max abs err {err_a}"

    # --- Config B: Conv + Tanh (no BN), full f32 streamed operands ---
    out_b = conv_block_forward(
        x, weight, conv_bias, stride=1, batch_norm=False,
        activation="tanh", compute_dtype=jnp.float32)
    out_b = jax.block_until_ready(out_b)
    ref_b = _reference(x, weight, conv_bias, stride=1, batch_norm=False,
                       activation="tanh")
    assert out_b.shape == (N, C_out, H, W), out_b.shape
    err_b = float(jnp.max(jnp.abs(out_b - ref_b)))
    assert err_b < 2e-3, f"f32 path max abs err {err_b}"

    print("KERNEL_OK")
</pallas_src>

<mosaic_0001>
module attributes {stable_mosaic.version = 11 : i64} {
  func.func @_conv_bn_act_kernel(%arg0: i32, %arg1: i32, %arg2: memref<1x18x18x4xbf16, #tpu.memory_space<vmem>>, %arg3: memref<9x4x128xbf16, #tpu.memory_space<vmem>>, %arg4: memref<1x128xf32, #tpu.memory_space<vmem>>, %arg5: memref<1x256x128xf32, #tpu.memory_space<vmem>>) attributes {dimension_semantics = [#tpu.dimension_semantics<parallel>, #tpu.dimension_semantics<parallel>], iteration_bounds = array<i64: 2, 1>, scalar_prefetch = 0 : i64, scratch_operands = 0 : i64, tpu.core_type = #tpu.core_type<tc>, window_params = [{transform_indices = @transform_0, window_bounds = array<i64: 1, 18, 18, 4>}, {transform_indices = @transform_1, window_bounds = array<i64: 9, 4, 128>}, {transform_indices = @transform_2, window_bounds = array<i64: 1, 128>}, {transform_indices = @transform_3, window_bounds = array<i64: 1, 256, 128>}]} {
    %cst = arith.constant 0.000000e+00 : f32
    %0 = vector.broadcast %cst : f32 to vector<256x128xf32>
    %c0 = arith.constant 0 : index
    %c0_0 = arith.constant 0 : index
    %c0_1 = arith.constant 0 : index
    %c0_2 = arith.constant 0 : index
    %1 = vector.load %arg2[%c0, %c0_0, %c0_1, %c0_2] : memref<1x18x18x4xbf16, #tpu.memory_space<vmem>>, vector<1x16x16x4xbf16>
    %2 = vector.shape_cast %1 : vector<1x16x16x4xbf16> to vector<16x16x4xbf16>
    %3 = vector.shape_cast %2 : vector<16x16x4xbf16> to vector<256x4xbf16>
    %c0_3 = arith.constant 0 : index
    %c0_4 = arith.constant 0 : index
    %c0_5 = arith.constant 0 : index
    %4 = vector.load %arg3[%c0_3, %c0_4, %c0_5] : memref<9x4x128xbf16, #tpu.memory_space<vmem>>, vector<1x4x128xbf16>
    %5 = vector.shape_cast %4 : vector<1x4x128xbf16> to vector<4x128xbf16>
    %cst_6 = arith.constant dense<0.000000e+00> : vector<256x128xf32>
    %6 = tpu.matmul %3, %5, %cst_6 {dimension_numbers = #tpu.dot_dimension_numbers<[1], [0], [0], [1], [0, 0, 1, 1], [], []>} : vector<256x4xbf16>, vector<4x128xbf16>, vector<256x128xf32> -> vector<256x128xf32>
    %7 = arith.addf %0, %6 : vector<256x128xf32>
    %c0_7 = arith.constant 0 : index
    %c0_8 = arith.constant 0 : index
    %c1 = arith.constant 1 : index
    %c0_9 = arith.constant 0 : index
    %8 = vector.load %arg2[%c0_7, %c0_8, %c1, %c0_9] : memref<1x18x18x4xbf16, #tpu.memory_space<vmem>>, vector<1x16x16x4xbf16>
    %9 = vector.shape_cast %8 : vector<1x16x16x4xbf16> to vector<16x16x4xbf16>
    %10 = vector.shape_cast %9 : vector<16x16x4xbf16> to vector<256x4xbf16>
    %c1_10 = arith.constant 1 : index
    %c0_11 = arith.constant 0 : index
    %c0_12 = arith.constant 0 : index
    %11 = vector.load %arg3[%c1_10, %c0_11, %c0_12] : memref<9x4x128xbf16, #tpu.memory_space<vmem>>, vector<1x4x128xbf16>
    %12 = vector.shape_cast %11 : vector<1x4x128xbf16> to vector<4x128xbf16>
    %cst_13 = arith.constant dense<0.000000e+00> : vector<256x128xf32>
    %13 = tpu.matmul %10, %12, %cst_13 {dimension_numbers = #tpu.dot_dimension_numbers<[1], [0], [0], [1], [0, 0, 1, 1], [], []>} : vector<256x4xbf16>, vector<4x128xbf16>, vector<256x128xf32> -> vector<256x128xf32>
    %14 = arith.addf %7, %13 : vector<256x128xf32>
    %c0_14 = arith.constant 0 : index
    %c0_15 = arith.constant 0 : index
    %c2 = arith.constant 2 : index
    %c0_16 = arith.constant 0 : index
    %15 = vector.load %arg2[%c0_14, %c0_15, %c2, %c0_16] : memref<1x18x18x4xbf16, #tpu.memory_space<vmem>>, vector<1x16x16x4xbf16>
    %16 = vector.shape_cast %15 : vector<1x16x16x4xbf16> to vector<16x16x4xbf16>
    %17 = vector.shape_cast %16 : vector<16x16x4xbf16> to vector<256x4xbf16>
    %c2_17 = arith.constant 2 : index
    %c0_18 = arith.constant 0 : index
    %c0_19 = arith.constant 0 : index
    %18 = vector.load %arg3[%c2_17, %c0_18, %c0_19] : memref<9x4x128xbf16, #tpu.memory_space<vmem>>, vector<1x4x128xbf16>
    %19 = vector.shape_cast %18 : vector<1x4x128xbf16> to vector<4x128xbf16>
    %cst_20 = arith.constant dense<0.000000e+00> : vector<256x128xf32>
    %20 = tpu.matmul %17, %19, %cst_20 {dimension_numbers = #tpu.dot_dimension_numbers<[1], [0], [0], [1], [0, 0, 1, 1], [], []>} : vector<256x4xbf16>, vector<4x128xbf16>, vector<256x128xf32> -> vector<256x128xf32>
    %21 = arith.addf %14, %20 : vector<256x128xf32>
    %c0_21 = arith.constant 0 : index
    %c1_22 = arith.constant 1 : index
    %c0_23 = arith.constant 0 : index
    %c0_24 = arith.constant 0 : index
    %22 = vector.load %arg2[%c0_21, %c1_22, %c0_23, %c0_24] : memref<1x18x18x4xbf16, #tpu.memory_space<vmem>>, vector<1x16x16x4xbf16>
    %23 = vector.shape_cast %22 : vector<1x16x16x4xbf16> to vector<16x16x4xbf16>
    %24 = vector.shape_cast %23 : vector<16x16x4xbf16> to vector<256x4xbf16>
    %c3 = arith.constant 3 : index
    %c0_25 = arith.constant 0 : index
    %c0_26 = arith.constant 0 : index
    %25 = vector.load %arg3[%c3, %c0_25, %c0_26] : memref<9x4x128xbf16, #tpu.memory_space<vmem>>, vector<1x4x128xbf16>
    %26 = vector.shape_cast %25 : vector<1x4x128xbf16> to vector<4x128xbf16>
    %cst_27 = arith.constant dense<0.000000e+00> : vector<256x128xf32>
    %27 = tpu.matmul %24, %26, %cst_27 {dimension_numbers = #tpu.dot_dimension_numbers<[1], [0], [0], [1], [0, 0, 1, 1], [], []>} : vector<256x4xbf16>, vector<4x128xbf16>, vector<256x128xf32> -> vector<256x128xf32>
    %28 = arith.addf %21, %27 : vector<256x128xf32>
    %c0_28 = arith.constant 0 : index
    %c1_29 = arith.constant 1 : index
    %c1_30 = arith.constant 1 : index
    %c0_31 = arith.constant 0 : index
    %29 = vector.load %arg2[%c0_28, %c1_29, %c1_30, %c0_31] : memref<1x18x18x4xbf16, #tpu.memory_space<vmem>>, vector<1x16x16x4xbf16>
    %30 = vector.shape_cast %29 : vector<1x16x16x4xbf16> to vector<16x16x4xbf16>
    %31 = vector.shape_cast %30 : vector<16x16x4xbf16> to vector<256x4xbf16>
    %c4 = arith.constant 4 : index
    %c0_32 = arith.constant 0 : index
    %c0_33 = arith.constant 0 : index
    %32 = vector.load %arg3[%c4, %c0_32, %c0_33] : memref<9x4x128xbf16, #tpu.memory_space<vmem>>, vector<1x4x128xbf16>
    %33 = vector.shape_cast %32 : vector<1x4x128xbf16> to vector<4x128xbf16>
    %cst_34 = arith.constant dense<0.000000e+00> : vector<256x128xf32>
    %34 = tpu.matmul %31, %33, %cst_34 {dimension_numbers = #tpu.dot_dimension_numbers<[1], [0], [0], [1], [0, 0, 1, 1], [], []>} : vector<256x4xbf16>, vector<4x128xbf16>, vector<256x128xf32> -> vector<256x128xf32>
    %35 = arith.addf %28, %34 : vector<256x128xf32>
    %c0_35 = arith.constant 0 : index
    %c1_36 = arith.constant 1 : index
    %c2_37 = arith.constant 2 : index
    %c0_38 = arith.constant 0 : index
    %36 = vector.load %arg2[%c0_35, %c1_36, %c2_37, %c0_38] : memref<1x18x18x4xbf16, #tpu.memory_space<vmem>>, vector<1x16x16x4xbf16>
    %37 = vector.shape_cast %36 : vector<1x16x16x4xbf16> to vector<16x16x4xbf16>
    %38 = vector.shape_cast %37 : vector<16x16x4xbf16> to vector<256x4xbf16>
    %c5 = arith.constant 5 : index
    %c0_39 = arith.constant 0 : index
    %c0_40 = arith.constant 0 : index
    %39 = vector.load %arg3[%c5, %c0_39, %c0_40] : memref<9x4x128xbf16, #tpu.memory_space<vmem>>, vector<1x4x128xbf16>
    %40 = vector.shape_cast %39 : vector<1x4x128xbf16> to vector<4x128xbf16>
    %cst_41 = arith.constant dense<0.000000e+00> : vector<256x128xf32>
    %41 = tpu.matmul %38, %40, %cst_41 {dimension_numbers = #tpu.dot_dimension_numbers<[1], [0], [0], [1], [0, 0, 1, 1], [], []>} : vector<256x4xbf16>, vector<4x128xbf16>, vector<256x128xf32> -> vector<256x128xf32>
    %42 = arith.addf %35, %41 : vector<256x128xf32>
    %c0_42 = arith.constant 0 : index
    %c2_43 = arith.constant 2 : index
    %c0_44 = arith.constant 0 : index
    %c0_45 = arith.constant 0 : index
    %43 = vector.load %arg2[%c0_42, %c2_43, %c0_44, %c0_45] : memref<1x18x18x4xbf16, #tpu.memory_space<vmem>>, vector<1x16x16x4xbf16>
    %44 = vector.shape_cast %43 : vector<1x16x16x4xbf16> to vector<16x16x4xbf16>
    %45 = vector.shape_cast %44 : vector<16x16x4xbf16> to vector<256x4xbf16>
    %c6 = arith.constant 6 : index
    %c0_46 = arith.constant 0 : index
    %c0_47 = arith.constant 0 : index
    %46 = vector.load %arg3[%c6, %c0_46, %c0_47] : memref<9x4x128xbf16, #tpu.memory_space<vmem>>, vector<1x4x128xbf16>
    %47 = vector.shape_cast %46 : vector<1x4x128xbf16> to vector<4x128xbf16>
    %cst_48 = arith.constant dense<0.000000e+00> : vector<256x128xf32>
    %48 = tpu.matmul %45, %47, %cst_48 {dimension_numbers = #tpu.dot_dimension_numbers<[1], [0], [0], [1], [0, 0, 1, 1], [], []>} : vector<256x4xbf16>, vector<4x128xbf16>, vector<256x128xf32> -> vector<256x128xf32>
    %49 = arith.addf %42, %48 : vector<256x128xf32>
    %c0_49 = arith.constant 0 : index
    %c2_50 = arith.constant 2 : index
    %c1_51 = arith.constant 1 : index
    %c0_52 = arith.constant 0 : index
    %50 = vector.load %arg2[%c0_49, %c2_50, %c1_51, %c0_52] : memref<1x18x18x4xbf16, #tpu.memory_space<vmem>>, vector<1x16x16x4xbf16>
    %51 = vector.shape_cast %50 : vector<1x16x16x4xbf16> to vector<16x16x4xbf16>
    %52 = vector.shape_cast %51 : vector<16x16x4xbf16> to vector<256x4xbf16>
    %c7 = arith.constant 7 : index
    %c0_53 = arith.constant 0 : index
    %c0_54 = arith.constant 0 : index
    %53 = vector.load %arg3[%c7, %c0_53, %c0_54] : memref<9x4x128xbf16, #tpu.memory_space<vmem>>, vector<1x4x128xbf16>
    %54 = vector.shape_cast %53 : vector<1x4x128xbf16> to vector<4x128xbf16>
    %cst_55 = arith.constant dense<0.000000e+00> : vector<256x128xf32>
    %55 = tpu.matmul %52, %54, %cst_55 {dimension_numbers = #tpu.dot_dimension_numbers<[1], [0], [0], [1], [0, 0, 1, 1], [], []>} : vector<256x4xbf16>, vector<4x128xbf16>, vector<256x128xf32> -> vector<256x128xf32>
    %56 = arith.addf %49, %55 : vector<256x128xf32>
    %c0_56 = arith.constant 0 : index
    %c2_57 = arith.constant 2 : index
    %c2_58 = arith.constant 2 : index
    %c0_59 = arith.constant 0 : index
    %57 = vector.load %arg2[%c0_56, %c2_57, %c2_58, %c0_59] : memref<1x18x18x4xbf16, #tpu.memory_space<vmem>>, vector<1x16x16x4xbf16>
    %58 = vector.shape_cast %57 : vector<1x16x16x4xbf16> to vector<16x16x4xbf16>
    %59 = vector.shape_cast %58 : vector<16x16x4xbf16> to vector<256x4xbf16>
    %c8 = arith.constant 8 : index
    %c0_60 = arith.constant 0 : index
    %c0_61 = arith.constant 0 : index
    %60 = vector.load %arg3[%c8, %c0_60, %c0_61] : memref<9x4x128xbf16, #tpu.memory_space<vmem>>, vector<1x4x128xbf16>
    %61 = vector.shape_cast %60 : vector<1x4x128xbf16> to vector<4x128xbf16>
    %cst_62 = arith.constant dense<0.000000e+00> : vector<256x128xf32>
    %62 = tpu.matmul %59, %61, %cst_62 {dimension_numbers = #tpu.dot_dimension_numbers<[1], [0], [0], [1], [0, 0, 1, 1], [], []>} : vector<256x4xbf16>, vector<4x128xbf16>, vector<256x128xf32> -> vector<256x128xf32>
    %63 = arith.addf %56, %62 : vector<256x128xf32>
    %c0_63 = arith.constant 0 : index
    %c0_64 = arith.constant 0 : index
    %64 = vector.load %arg4[%c0_63, %c0_64] : memref<1x128xf32, #tpu.memory_space<vmem>>, vector<1x128xf32>
    %65 = vector.broadcast %64 : vector<1x128xf32> to vector<256x128xf32>
    %66 = arith.addf %63, %65 : vector<256x128xf32>
    %cst_65 = arith.constant 0.000000e+00 : f32
    %67 = vector.broadcast %cst_65 : f32 to vector<256x128xf32>
    %68 = arith.cmpf oge, %66, %67 : vector<256x128xf32>
    %cst_66 = arith.constant 2.500000e-01 : f32
    %69 = vector.broadcast %cst_66 : f32 to vector<256x128xf32>
    %70 = arith.mulf %69, %66 : vector<256x128xf32>
    %71 = arith.select %68, %66, %70 : vector<256x128xi1>, vector<256x128xf32>
    %c0_67 = arith.constant 0 : index
    %c0_68 = arith.constant 0 : index
    %c0_69 = arith.constant 0 : index
    %72 = vector.load %arg5[%c0_67, %c0_68, %c0_69] : memref<1x256x128xf32, #tpu.memory_space<vmem>>, vector<1x256x128xf32>
    %73 = vector.shape_cast %72 : vector<1x256x128xf32> to vector<256x128xf32>
    %74 = vector.shape_cast %71 : vector<256x128xf32> to vector<1x256x128xf32>
    tpu.vector_store %arg5[%c0_67, %c0_68, %c0_69], %74 {strides = array<i32>} : memref<1x256x128xf32, #tpu.memory_space<vmem>>, vector<1x256x128xf32>,
    return
  }
  func.func @transform_0(%arg0: i32, %arg1: i32) -> (i32, i32, i32, i32) {
    %c0_i32 = arith.constant 0 : i32
    %c0_i32_0 = arith.constant 0 : i32
    %c0_i32_1 = arith.constant 0 : i32
    %c0_i32_2 = arith.constant 0 : i32
    return %arg0, %c0_i32, %c0_i32_0, %c0_i32_1 : i32, i32, i32, i32
  }
  func.func @transform_1(%arg0: i32, %arg1: i32) -> (i32, i32, i32) {
    %c0_i32 = arith.constant 0 : i32
    %c0_i32_0 = arith.constant 0 : i32
    %c0_i32_1 = arith.constant 0 : i32
    return %c0_i32, %c0_i32_0, %arg1 : i32, i32, i32
  }
  func.func @transform_2(%arg0: i32, %arg1: i32) -> (i32, i32) {
    %c0_i32 = arith.constant 0 : i32
    %c0_i32_0 = arith.constant 0 : i32
    return %c0_i32, %arg1 : i32, i32
  }
  func.func @transform_3(%arg0: i32, %arg1: i32) -> (i32, i32, i32) {
    %c0_i32 = arith.constant 0 : i32
    %c0_i32_0 = arith.constant 0 : i32
    return %arg0, %c0_i32, %arg1 : i32, i32, i32
  }
}

</mosaic_0001>

<bundles_post_ra>
// kernel: tpu_custom_call.1
= control target key start
LH: loop header
LB: loop body
LE: loop exit
PB: predicated region body
PF: predicated region fallthrough
CT: control target
= control target key end

     0   :  { %8 = vsyncpa [#allocation3], 0  ;;  %s9030_s0 = inlined_call_operand.vmem [shape: bf16[2,18,18,4], index: 0, kind: input, shape index: {}]   ;;  %s9031_s1 = inlined_call_operand.vmem [shape: bf16[9,4,128], index: 1, kind: input, shape index: {}]   ;;  %s9032_s2 = inlined_call_operand.vmem [shape: f32[1,128], index: 2, kind: input, shape index: {}]   ;;  %s9033_s3 = inlined_call_operand.hbm [shape: f32[2,256,128], index: 3, kind: output, shape index: {}]  }
   0x1   :  { %10 = vsyncpa [#allocation3 + $0x1], 0  ;;  %s6287_s12 = smov 0   ;;  %s6289_s13 = smov 0  }
   0x2   :  { %s6291_s14 = smov 0   ;;  %s6293_s15 = smov 0  }
   0x3   :  { %s6295_s16 = smov 0   ;;  %s6297_s17 = smov 0  }
   0x4 LB: > { %s5055_s18 = sadd.s32 4294967295, %s6262_s17   ;;  %s5056_s19 = sadd.s32 4294967294, %s6262_s17   ;;  %s6262_s17 = sphi %s6297_s17, %s16_s17   ;;  %s6258_s16 = sphi %s6295_s16, %s9312_s16   ;;  %s6254_s15 = sphi %s6293_s15, %s9311_s15   ;;  %s6250_s14 = sphi %s6291_s14, %s9310_s14   ;;  %s6246_s13 = sphi %s6289_s13, %s9309_s13   ;;  %s6242_s12 = sphi %s6287_s12, %s9308_s12  }
   0x5   : > { %s28_s20 = sadd.s32 1, %s6258_s16  ;;  %s115_s21 = sadd.s32 1, %s6250_s14 }
   0x6   : > { %p30_p0 = scmp.ge.s32.totalorder %s28_s20, 2  ;;  %p125_p1 = scmp.ne.s32.totalorder %s6250_s14, %s6246_s13 }
   0x7   : > { %p126_p2 = scmp.eq.s32.totalorder %s5055_s18, 1  ;;  %p131_p3 = scmp.ne.s32.totalorder %s6246_s13, %s6242_s12 }
   0x8   : > { %s9314_s20 = smov (%p30_p0, %s28_s20), 0  ;;  %p132_p5 = scmp.eq.s32.totalorder %s5056_s19, 1 }
   0x9   : > { %p6327_p4 = por %p126_p2, %p125_p1  ;;  %s110_s23 = ssub.s32 %s6258_s16, %s9314_s20 }
   0xa   : > { %p5061_p6 = scmp.ge.s32.totalorder %s6262_s17, 1  ;;  %p113_p7 = scmp.eq.s32.totalorder %s110_s23, 0 }
   0xb   : > { %p6334_p8 = por %p132_p5, %p131_p3  ;;  %p171_p9 = scmp.lt.s32.totalorder %s6262_s17, 3 }
   0xc   : > { %s6340_s25 = scalar_select %p113_p7, %s6250_s14, %s115_s21  }
   0xd   : > { %p172_p10 = pnand %p5061_p6, %p171_p9 }
   0xf   : > { %175 = sbr.rel (%p172_p10) target bundleno = 580 (0x244), region = 32 }
  0x14   : > { %v5064_v0 = vld [vmem:[%s9031_s1 + $0x2] sm:$0x3]  ;;  %vm750_vm0 = vcmask 1041408   ;;  %p202_p11 = scmp.lt.s32.totalorder %s6254_s15, 1  ;;  %v247_v2 = vld [vmem:[%s9031_s1] sm:$0x3] }
  0x15   : > { %6069 = vmatprep.subr.msk.bf16.mxu1 %vm750_vm0, %v5064_v0  ;;  %6068 = vmatprep.subr.msk.bf16.mxu0 %vm750_vm0, %v5064_v0  ;;  %v752_v1 = vsel %vm750_vm0, %v5064_v0, 0  ;;  %v5145_v3 = vld [vmem:[%s9031_s1 + $0x4] sm:$0x3]  ;;  %vm264_vm1 = vsmask.f32 3328  ;;  %v6364_v4 = vsel %vm750_vm0, %v247_v2, 0 }
  0x16   : > { %6067 = vmatpush3.bf16.msra.mxu1 %v752_v1  ;;  %5761 = vmatpush3.bf16.msra.mxu0 %v752_v1  ;;  %s203_s30 = scalar_select %p202_p11, %s6254_s15, 1  ;;  %vm265_vm2 = vsmask.f32 7440  ;;  %vm701_vm3 = vcmask 31744   ;;  %v6390_v16 = vsel %vm750_vm0, %v5145_v3, 0  ;;  %vm1255_vm5 = vcmask 1042432  }
  0x17   : > { %6070 = vmatprep.subr.msk.bf16.mxu1 %vm750_vm0, %v247_v2  ;;  %6071 = vmatprep.subr.msk.bf16.mxu0 %vm750_vm0, %v5145_v3  ;;  %vm6405_vm4 = vmor %vm264_vm1, %vm265_vm2  ;;  %vm1256_vm6 = vcmask 1046532   ;;  %s199_s5 = sand.u32 1, %s6246_s13   ;;  %s5606_s10 = sshll.u32 %s6254_s15, 12 }
  0x18   : > { %s6078_s6 = smul.u32 216, %s203_s30  ;;  %vm6691_vm7 = vmor %vm1255_vm5, %vm1256_vm6  ;;  %s5062_s8 = sshll.u32 %s199_s5, 8 }
  0x19   : > { %s8977_s21 = scalar_lea.hbm %s9033_s3, %s5606_s10  ;;  %s8985_s15 = scalar_lea.sflag [#allocation3], %s199_s5 }
  0x1a   : > { %s6361_s9 = scalar_lea.vmem %s9030_s0, %s6078_s6  ;;  %s6264_s26 = smov [#allocation2]  }
  0x1b   : > { %v6367_v5 = vld [vmem:[%s6361_s9] sm:$0xf]  ;;  %v6370_v6 = vld [vmem:[%s6361_s9 + $0x4] sm:$0xf]  ;;  %v6373_v7 = vld [vmem:[%s6361_s9 + $0x8] sm:$0x1] }
  0x1c   : > { %v268_v8 = vshrl.u32 %v6367_v5, 16  ;;  %v271_v9 = vshll.u32 %v6367_v5, 16  ;;  %v277_v10 = vshll.u32 %v6370_v6, 16  ;;  %v281_v11 = vshrl.u32 %v6370_v6, 16  ;;  %v6380_v12 = vld [vmem:[%s6361_s9 + $0x60] sm:$0xf] }
  0x1d   : > { %v287_v13 = vshll.u32 %v6373_v7, 16  ;;  %v6384_v14 = vld [vmem:[%s6361_s9 + $0x64] sm:$0xf]  ;;  %v6387_v15 = vld [vmem:[%s6361_s9 + $0x68] sm:$0x1]  ;;  %v460_v22 = vshrl.u32 %v6380_v12, 16 }
  0x1e   : > { %v270_v17 = vrot.slane %v268_v8, 4  ;;  %v273_v18 = vrot.slane %v271_v9, 5  ;;  %v279_v19 = vrot.slane %v277_v10, 5  ;;  %v283_v20 = vrot.slane %v281_v11, 4  ;;  %v6398_v29 = vld [vmem:[%s6361_s9 + $0xc] sm:$0xf] }
  0x1f   : > { %v289_v21 = vrot.slane %v287_v13, 5  ;;  %v463_v23 = vshll.u32 %v6380_v12, 16  ;;  %v469_v24 = vshll.u32 %v6384_v14, 16  ;;  %v473_v27 = vshrl.u32 %v6384_v14, 16  ;;  %v6401_v30 = vld [vmem:[%s6361_s9 + $0x10] sm:$0xf] }
  0x20   : > { %v274_v25 = vor.u32 %v273_v18, %v270_v17  ;;  %v284_v26 = vor.u32 %v283_v20, %v279_v19  ;;  %v479_v28 = vshll.u32 %v6387_v15, 16  ;;  %v462_v33 = vrot.slane %v460_v22, 4  ;;  %v6411_v41 = vld [vmem:[%s6361_s9 + $0x14] sm:$0x1]  ;;  %v6422_v53 = vld [vmem:[%s6361_s9 + $0x6c] sm:$0xf] }
  0x21   : > { %v465_v34 = vrot.slane %v463_v23, 5  ;;  %v471_v35 = vrot.slane %v469_v24, 5  ;;  %v475_v38 = vrot.slane %v473_v27, 4  ;;  %v292_v42 = vshrl.u32 %v6398_v29, 16  ;;  %v6426_v58 = vld [vmem:[%s6361_s9 + $0x70] sm:$0xf] }
  0x22   : > { %v275_v36 = vrot.slane %v274_v25, 4  ;;  %v285_v37 = vrot.slane %v284_v26, 4  ;;  %v481_v39 = vrot.slane %v479_v28, 5  ;;  %v295_v43 = vshll.u32 %v6398_v29, 16  ;;  %v6434_v63 = vld [vmem:[%s6361_s9 + $0x74] sm:$0x1] }
  0x23   : > { %v466_v40 = vor.u32 %v465_v34, %v462_v33  ;;  %v301_v44 = vshll.u32 %v6401_v30, 16  ;;  %v476_v47 = vor.u32 %v475_v38, %v471_v35  ;;  %v305_v48 = vshrl.u32 %v6401_v30, 16  ;;  %v6440_v8 = vld [vmem:[%s6361_s9 + $0x18] sm:$0xf]  ;;  %v6453_v25 = vld [vmem:[%s6361_s9 + $0x20] sm:$0x1] }
  0x24   : > { %v280_v45 = vsel %vm6405_vm4, %v275_v36, %v279_v19  ;;  %v290_v46 = vsel %vm6405_vm4, %v285_v37, %v289_v21  ;;  %v294_v51 = vrot.slane %v292_v42, 4  ;;  %v297_v52 = vrot.slane %v295_v43, 5  ;;  %v6447_v21 = vld [vmem:[%s6361_s9 + $0x1c] sm:$0xf]  ;;  %s6190_s27 = sshll.u32 %s6264_s26, 4  ;;  %s6191_s27 = int_to_ptr.vmem [resolvable:$false] %s6190_s27 }
  0x25   : > { %v5065_v49 = vcombine.low %v280_v45, %v290_v46  ;;  %v467_v50 = vrot.slane %v466_v40, 4  ;;  %v477_v54 = vrot.slane %v476_v47, 4  ;;  %v303_v55 = vrot.slane %v301_v44, 5  ;;  %v6466_v40 = vld [vmem:[%s9031_s1 + $0x8] sm:$0x3]  ;;  %s6192_s28 = scalar_lea.vmem %s6191_s27, 8192 }
  0x26   : > { %v307_v56 = vrot.slane %v305_v48, 4  ;;  %v311_v57 = vshll.u32 %v6411_v41, 16  ;;  %v298_v60 = vor.u32 %v297_v52, %v294_v51  ;;  %v484_v3 = vshrl.u32 %v6422_v53, 16  ;;  %v6471_v46 = vld [vmem:[%s6361_s9 + $0x7c] sm:$0xf] }
  0x27   : > { %5762 = vmatprep.mubr.msk.bf16.mxu0 %vm701_vm3, %v5065_v49  ;;  %v472_v59 = vsel %vm6405_vm4, %v467_v50, %v471_v35  ;;  %v482_v0 = vsel %vm6405_vm4, %v477_v54, %v481_v39  ;;  %v487_v11 = vshll.u32 %v6422_v53, 16  ;;  %v493_v13 = vshll.u32 %v6426_v58, 16  ;;  %v6460_v35 = vld [vmem:[%s6361_s9 + $0x78] sm:$0xf] }
  0x28   : > { %v308_v1 = vor.u32 %v307_v56, %v303_v55  ;;  %v313_v2 = vrot.slane %v311_v57, 5  ;;  %v5073_v9 = vcombine.low %v472_v59, %v482_v0  ;;  %v299_v10 = vrot.slane %v298_v60, 4  ;;  %v6478_v56 = vld [vmem:[%s6361_s9 + $0x80] sm:$0x1] }
  0x29   : > { %v486_v18 = vrot.slane %v484_v3, 4  ;;  %v497_v19 = vshrl.u32 %v6426_v58, 16  ;;  %v503_v20 = vshll.u32 %v6434_v63, 16  ;;  %v489_v23 = vrot.slane %v487_v11, 5  ;;  %9071 = vst [vmem:[#allocation5_spill] sm:$0xff] %v6478_v56 }
  0x2a   : > { %v309_v17 = vrot.slane %v308_v1, 4  ;;  %5778 = vmatprep.mubr.msk.bf16.mxu1 %vm701_vm3, %v5073_v9  ;;  %v304_v22 = vsel %vm6405_vm4, %v299_v10, %v303_v55  ;;  %v495_v24 = vrot.slane %v493_v13, 5  ;;  %v316_v26 = vshrl.u32 %v6440_v8, 16  ;;  %v6484_v1 = vld [vmem:[%s6361_s9 + $0x24] sm:$0xf] }
  0x2b   : > { %v499_v28 = vrot.slane %v497_v19, 4  ;;  %v505_v33 = vrot.slane %v503_v20, 5  ;;  %v319_v34 = vshll.u32 %v6440_v8, 16  ;;  %v490_v37 = vor.u32 %v489_v23, %v486_v18  ;;  %v6492_v10 = vld [vmem:[%s6361_s9 + $0x28] sm:$0xf] }
  0x2c   : > { %v314_v27 = vsel %vm6405_vm4, %v309_v17, %v313_v2  ;;  %v318_v38 = vrot.slane %v316_v26, 4  ;;  %v325_v39 = vshll.u32 %v6447_v21, 16  ;;  %v329_v44 = vshrl.u32 %v6447_v21, 16  ;;  %v6498_v19 = vld [vmem:[%s9031_s1 + $0x6] sm:$0x3] }
  0x2d   : > { %v5066_v36 = vcombine.low %v304_v22, %v314_v27  ;;  %v500_v42 = vor.u32 %v499_v28, %v495_v24  ;;  %v321_v43 = vrot.slane %v319_v34, 5  ;;  %v335_v45 = vshll.u32 %v6453_v25, 16 }
  0x2e   : > { %v491_v47 = vrot.slane %v490_v37, 4  ;;  %v327_v48 = vrot.slane %v325_v39, 5  ;;  %v508_v49 = vshrl.u32 %v6460_v35, 16  ;;  %v511_v50 = vshll.u32 %v6460_v35, 16 }
  0x2f   : > { %5763 = vmatmul.mubr.msk.bf16.vlgmr.msra.gmra.mxu0 %vm701_vm3, %v5066_v36  ;;  %v501_v51 = vrot.slane %v500_v42, 4  ;;  %v322_v52 = vor.u32 %v321_v43, %v318_v38  ;;  %v331_v54 = vrot.slane %v329_v44, 4  ;;  %v337_v55 = vrot.slane %v335_v45, 5  ;;  %v6510_v36 = vld [vmem:[%s6361_s9 + $0x84] sm:$0xf] }
  0x30   : > { %5829 = vmatpush3.bf16.msra.mxu0 %v6390_v16  ;;  %v496_v57 = vsel %vm6405_vm4, %v491_v47, %v495_v24  ;;  %v510_v59 = vrot.slane %v508_v49, 4  ;;  %v513_v60 = vrot.slane %v511_v50, 5  ;;  %v517_v0 = vshll.u32 %v6471_v46, 16  ;;  %v6503_v24 = vld [vmem:[%s6361_s9 + $0x2c] sm:$0x1] }
  0x31   : > { %6073 = vmatprep.subr.msk.bf16.mxu0 %vm750_vm0, %v6466_v40  ;;  %v506_v16 = vsel %vm6405_vm4, %v501_v51, %v505_v33  ;;  %v323_v2 = vrot.slane %v322_v52, 4  ;;  %v332_v3 = vor.u32 %v331_v54, %v327_v48  ;;  %v521_v9 = vshrl.u32 %v6471_v46, 16  ;;  %v6517_v43 = vld [vmem:[%s6361_s9 + $0x88] sm:$0xf]  ;;  %v6525_v51 = vld [vmem:[%s6361_s9 + $0x8c] sm:$0x1] }
  0x32   : > { %v5074_v11 = vcombine.low %v496_v57, %v506_v16  ;;  %v514_v13 = vor.u32 %v513_v60, %v510_v59  ;;  %v519_v17 = vrot.slane %v517_v0, 5  ;;  %v527_v18 = vshll.u32 %v6478_v56, 16  ;;  %9072 = vst [vmem:[#allocation6_spill] sm:$0xff] %v6525_v51  ;;  %v6533_v60 = vld [vmem:[%s6361_s9 + $0x30] sm:$0xf] }
  0x33   : > { %v328_v20 = vsel %vm6405_vm4, %v323_v2, %v327_v48  ;;  %v333_v22 = vrot.slane %v332_v3, 4  ;;  %v523_v23 = vrot.slane %v521_v9, 4  ;;  %v340_v26 = vshrl.u32 %v6484_v1, 16  ;;  %v6538_v9 = vld [vmem:[%s6361_s9 + $0x34] sm:$0xf] }
  0x34   : > { %5779 = vmatmul.mubr.msk.bf16.vlgmr.msra.gmra.mxu1 %vm701_vm3, %v5074_v11  ;;  %v515_v27 = vrot.slane %v514_v13, 4  ;;  %v529_v28 = vrot.slane %v527_v18, 5  ;;  %v343_v33 = vshll.u32 %v6484_v1, 16  ;;  %v349_v34 = vshll.u32 %v6492_v10, 16 }
  0x35   : > { %5795 = vmatpush3.bf16.msra.mxu1 %v6364_v4  ;;  %v338_v37 = vsel %vm6405_vm4, %v333_v22, %v337_v55  ;;  %v524_v38 = vor.u32 %v523_v23, %v519_v17  ;;  %v342_v39 = vrot.slane %v340_v26, 4  ;;  %v353_v42 = vshrl.u32 %v6492_v10, 16 }
  0x36   : > { %v5067_v44 = vcombine.low %v328_v20, %v338_v37  ;;  %v520_v45 = vsel %vm6405_vm4, %v515_v27, %v519_v17  ;;  %v345_v47 = vrot.slane %v343_v33, 5  ;;  %v351_v48 = vrot.slane %v349_v34, 5  ;;  %6072 = vmatprep.subr.msk.bf16.mxu1 %vm750_vm0, %v6498_v19  ;;  %v6546_v33 = vld [vmem:[%s6361_s9 + $0x38] sm:$0x1] }
  0x37   : > { %v525_v4 = vrot.slane %v524_v38, 4  ;;  %v355_v49 = vrot.slane %v353_v42, 4  ;;  %v359_v50 = vshll.u32 %v6503_v24, 16  ;;  %v532_v52 = vshrl.u32 %v6510_v36, 16  ;;  %v6551_v38 = vld [vmem:[%s6361_s9 + $0x90] sm:$0xf] }
  0x38   : > { %5766 = vmatprep.mubr.msk.bf16.mxu0 %vm701_vm3, %v5067_v44  ;;  %v346_v54 = vor.u32 %v345_v47, %v342_v39  ;;  %v535_v55 = vshll.u32 %v6510_v36, 16  ;;  %v541_v57 = vshll.u32 %v6517_v43, 16  ;;  %v545_v59 = vshrl.u32 %v6517_v43, 16  ;;  %9073 = vst [vmem:[#allocation7_spill] sm:$0xff] %v6551_v38  ;;  %v6556_v47 = vld [vmem:[%s6361_s9 + $0x94] sm:$0xf] }
  0x39   : > { %v530_v0 = vsel %vm6405_vm4, %v525_v4, %v529_v28  ;;  %v356_v16 = vor.u32 %v355_v49, %v351_v48  ;;  %v361_v2 = vrot.slane %v359_v50, 5  ;;  %v534_v3 = vrot.slane %v532_v52, 4  ;;  %9074 = vst [vmem:[#allocation8_spill] sm:$0xff] %v6556_v47 }
  0x3a   : > { %v5075_v11 = vcombine.low %v520_v45, %v530_v0  ;;  %v347_v13 = vrot.slane %v346_v54, 4  ;;  %v537_v17 = vrot.slane %v535_v55, 5  ;;  %v543_v18 = vrot.slane %v541_v57, 5 }
  0x3b   : > { %v357_v20 = vrot.slane %v356_v16, 4  ;;  %v547_v22 = vrot.slane %v545_v59, 4  ;;  %v551_v23 = vshll.u32 %v6525_v51, 16  ;;  %v364_v26 = vshrl.u32 %v6533_v60, 16  ;;  %v6565_v16 = vld [vmem:[%s6361_s9 + $0x98] sm:$0x1] }
  0x3c   : > { %5782 = vmatprep.mubr.msk.bf16.mxu1 %vm701_vm3, %v5075_v11  ;;  %v352_v27 = vsel %vm6405_vm4, %v347_v13, %v351_v48  ;;  %v538_v28 = vor.u32 %v537_v17, %v534_v3  ;;  %v367_v34 = vshll.u32 %v6533_v60, 16  ;;  %v373_v37 = vshll.u32 %v6538_v9, 16  ;;  %9075 = vst [vmem:[#allocation9_spill] sm:$0xff] %v6565_v16  ;;  %v6570_v11 = vld [vmem:[%s6361_s9 + $0x3c] sm:$0xf] }
  0x3d   : > { %v362_v39 = vsel %vm6405_vm4, %v357_v20, %v361_v2  ;;  %v548_v42 = vor.u32 %v547_v22, %v543_v18  ;;  %v553_v44 = vrot.slane %v551_v23, 5  ;;  %v366_v45 = vrot.slane %v364_v26, 4  ;;  %v6575_v23 = vld [vmem:[%s6361_s9 + $0x40] sm:$0xf]  ;;  %v1208_v51 = vld [vmem:[%s6361_s9 + $0xc] sm:$0xe] }
  0x3e   : > { %v5068_v48 = vcombine.low %v352_v27, %v362_v39  ;;  %v539_v4 = vrot.slane %v538_v28, 4  ;;  %v369_v49 = vrot.slane %v367_v34, 5  ;;  %v375_v50 = vrot.slane %v373_v37, 5 }
  0x3f   : > { %v549_v52 = vrot.slane %v548_v42, 4  ;;  %v377_v54 = vshrl.u32 %v6538_v9, 16  ;;  %v383_v55 = vshll.u32 %v6546_v33, 16  ;;  %v556_v57 = vshrl.u32 %v6551_v38, 16 }
  0x40   : > { %5767 = vmatmul.mubr.msk.bf16.gmra.mxu0 %vm701_vm3, %v5068_v48  ;;  %v544_v59 = vsel %vm6405_vm4, %v539_v4, %v543_v18  ;;  %v370_v0 = vor.u32 %v369_v49, %v366_v45  ;;  %v559_v2 = vshll.u32 %v6551_v38, 16  ;;  %v565_v3 = vshll.u32 %v6556_v47, 16  ;;  %v6584_v48 = vld [vmem:[%s6361_s9 + $0x44] sm:$0x1] }
  0x41   : > { %v554_v13 = vsel %vm6405_vm4, %v549_v52, %v553_v44  ;;  %v379_v17 = vrot.slane %v377_v54, 4  ;;  %v385_v20 = vrot.slane %v383_v55, 5  ;;  %v558_v22 = vrot.slane %v556_v57, 4  ;;  %v6589_v52 = vld [vmem:[%s6361_s9 + $0x9c] sm:$0xf] }
  0x42   : > { %v5076_v18 = vcombine.low %v544_v59, %v554_v13  ;;  %v371_v26 = vrot.slane %v370_v0, 4  ;;  %v561_v27 = vrot.slane %v559_v2, 5  ;;  %v567_v28 = vrot.slane %v565_v3, 5  ;;  %9076 = vst [vmem:[#allocation10_spill] sm:$0xff] %v6589_v52  ;;  %v6593_v13 = vld [vmem:[%s6361_s9 + $0xa0] sm:$0xf] }
  0x43   : > { %v380_v34 = vor.u32 %v379_v17, %v375_v50  ;;  %v569_v37 = vshrl.u32 %v6556_v47, 16  ;;  %v575_v39 = vshll.u32 %v6565_v16, 16  ;;  %v388_v42 = vshrl.u32 %v6570_v11, 16  ;;  %9077 = vst [vmem:[#allocation11_spill] sm:$0xff] %v6593_v13 }
  0x44   : > { %5783 = vmatmul.mubr.msk.bf16.gmra.mxu1 %vm701_vm3, %v5076_v18  ;;  %v376_v44 = vsel %vm6405_vm4, %v371_v26, %v375_v50  ;;  %v562_v45 = vor.u32 %v561_v27, %v558_v22  ;;  %v391_v4 = vshll.u32 %v6570_v11, 16  ;;  %v397_v49 = vshll.u32 %v6575_v23, 16  ;;  %v6599_v26 = vld [vmem:[%s6361_s9 + $0xa4] sm:$0x1] }
  0x45   : > { %v381_v54 = vrot.slane %v380_v34, 4  ;;  %v571_v55 = vrot.slane %v569_v37, 4  ;;  %v577_v57 = vrot.slane %v575_v39, 5  ;;  %v390_v59 = vrot.slane %v388_v42, 4  ;;  %9078 = vst [vmem:[#allocation12_spill] sm:$0xff] %v6599_v26 }
  0x46   : > { %v563_v0 = vrot.slane %v562_v45, 4  ;;  %v393_v2 = vrot.slane %v391_v4, 5  ;;  %v399_v3 = vrot.slane %v397_v49, 5  ;;  %v401_v50 = vshrl.u32 %v6575_v23, 16  ;;  %v6603_v34 = vld [vmem:[%s6361_s9 + $0x48] sm:$0xf] }
  0x47   : > { %v386_v17 = vsel %vm6405_vm4, %v381_v54, %v385_v20  ;;  %v572_v22 = vor.u32 %v571_v55, %v567_v28  ;;  %v407_v18 = vshll.u32 %v6584_v48, 16  ;;  %v580_v27 = vshrl.u32 %v6589_v52, 16 }
  0x48   : > { %v5069_v37 = vcombine.low %v376_v44, %v386_v17  ;;  %v568_v39 = vsel %vm6405_vm4, %v563_v0, %v567_v28  ;;  %v394_v42 = vor.u32 %v393_v2, %v390_v59  ;;  %v403_v45 = vrot.slane %v401_v50, 4  ;;  %v6612_v17 = vld [vmem:[%s6361_s9 + $0x4c] sm:$0xf]  ;;  %v6618_v2 = vld [vmem:[%s6361_s9 + $0x50] sm:$0x1] }
  0x49   : > { %v573_v4 = vrot.slane %v572_v22, 4  ;;  %v409_v49 = vrot.slane %v407_v18, 5  ;;  %v582_v20 = vrot.slane %v580_v27, 4  ;;  %v583_v54 = vshll.u32 %v6589_v52, 16 }
  0x4a   : > { %5770 = vmatprep.mubr.msk.bf16.mxu0 %vm701_vm3, %v5069_v37  ;;  %v395_v55 = vrot.slane %v394_v42, 4  ;;  %v404_v62 = vor.u32 %v403_v45, %v399_v3  ;;  %v589_v32 = vshll.u32 %v6593_v13, 16  ;;  %v593_v44 = vshrl.u32 %v6593_v13, 16  ;;  %v6624_v42 = vld [vmem:[%s6361_s9 + $0xa8] sm:$0xf] }
  0x4b   : > { %v578_v28 = vsel %vm6405_vm4, %v573_v4, %v577_v57  ;;  %v585_v59 = vrot.slane %v583_v54, 5  ;;  %v599_v0 = vshll.u32 %v6599_v26, 16  ;;  %v412_v50 = vshrl.u32 %v6603_v34, 16  ;;  %9079 = vst [vmem:[#allocation13_spill] sm:$0xff] %v6624_v42 }
  0x4c   : > { %v5077_v22 = vcombine.low %v568_v39, %v578_v28  ;;  %v400_v18 = vsel %vm6405_vm4, %v395_v55, %v399_v3  ;;  %v405_v27 = vrot.slane %v404_v62, 4  ;;  %v591_v37 = vrot.slane %v589_v32, 5 }
  0x4d   : > { %v586_v45 = vor.u32 %v585_v59, %v582_v20  ;;  %v595_v61 = vrot.slane %v593_v44, 4  ;;  %v601_v57 = vrot.slane %v599_v0, 5  ;;  %v414_v4 = vrot.slane %v412_v50, 4  ;;  %v6634_v44 = vld [vmem:[%s6361_s9 + $0xac] sm:$0xf] }
  0x4e   : > { %5786 = vmatprep.mubr.msk.bf16.mxu1 %vm701_vm3, %v5077_v22  ;;  %v410_v54 = vsel %vm6405_vm4, %v405_v27, %v409_v49  ;;  %v415_v39 = vshll.u32 %v6603_v34, 16  ;;  %v421_v28 = vshll.u32 %v6612_v17, 16  ;;  %v425_v62 = vshrl.u32 %v6612_v17, 16  ;;  %9080 = vst [vmem:[#allocation14_spill] sm:$0xff] %v6634_v44  ;;  %v6637_v22 = vld [vmem:[%s6361_s9 + $0xb0] sm:$0x1] }
  0x4f   : > { %v5070_v3 = vcombine.low %v400_v18, %v410_v54  ;;  %v587_v32 = vrot.slane %v586_v45, 4  ;;  %v596_v55 = vor.u32 %v595_v61, %v591_v37  ;;  %v431_v20 = vshll.u32 %v6618_v2, 16  ;;  %9081 = vst [vmem:[#allocation15_spill] sm:$0xff] %v6637_v22 }
  0x50   : > { %v417_v59 = vrot.slane %v415_v39, 5  ;;  %v423_v0 = vrot.slane %v421_v28, 5  ;;  %v427_v50 = vrot.slane %v425_v62, 4  ;;  %v604_v49 = vshrl.u32 %v6624_v42, 16  ;;  %v6646_v62 = vld [vmem:[%s6361_s9 + $0x54] sm:$0xf] }
  0x51   : > { %5771 = vmatmul.mubr.msk.bf16.gmra.mxu0 %vm701_vm3, %v5070_v3  ;;  %v592_v18 = vsel %vm6405_vm4, %v587_v32, %v591_v37  ;;  %v597_v27 = vrot.slane %v596_v55, 4  ;;  %v433_v61 = vrot.slane %v431_v20, 5  ;;  %v607_v45 = vshll.u32 %v6624_v42, 16  ;;  %v6653_v55 = vld [vmem:[%s6361_s9 + $0x58] sm:$0xf] }
  0x52   : > { %v418_v54 = vor.u32 %v417_v59, %v414_v4  ;;  %v428_v56 = vor.u32 %v427_v50, %v423_v0  ;;  %v606_v39 = vrot.slane %v604_v49, 4  ;;  %v613_v28 = vshll.u32 %v6634_v44, 16  ;;  %v6656_v49 = vld [vmem:[%s6361_s9 + $0x5c] sm:$0x1] }
  0x53   : > { %v602_v3 = vsel %vm6405_vm4, %v597_v27, %v601_v57  ;;  %v609_v26 = vrot.slane %v607_v45, 5  ;;  %v617_v37 = vshrl.u32 %v6634_v44, 16  ;;  %v623_v32 = vshll.u32 %v6637_v22, 16  ;;  %v1207_v22 = vld [vmem:[%s6361_s9] sm:$0xe] }
  0x54   : > { %v5078_v4 = vcombine.low %v592_v18, %v602_v3  ;;  %v419_v20 = vrot.slane %v418_v54, 4  ;;  %v429_v59 = vrot.slane %v428_v56, 4  ;;  %v615_v50 = vrot.slane %v613_v28, 5  ;;  %v6667_v54 = vld [vmem:[%s6361_s9 + $0xb4] sm:$0xf] }
  0x55   : > { %v610_v42 = vor.u32 %v609_v26, %v606_v39  ;;  %v619_v52 = vrot.slane %v617_v37, 4  ;;  %v625_v13 = vrot.slane %v623_v32, 5  ;;  %v436_v57 = vshrl.u32 %v6646_v62, 16  ;;  %9082 = vst [vmem:[#allocation16_spill] sm:$0xff] %v6667_v54  ;;  %v6670_v37 = vld [vmem:[%s6361_s9 + $0xb8] sm:$0xf] }
  0x56   : > { %5787 = vmatmul.mubr.msk.bf16.gmra.mxu1 %vm701_vm3, %v5078_v4  ;;  %v424_v27 = vsel %vm6405_vm4, %v419_v20, %v423_v0  ;;  %v434_v18 = vsel %vm6405_vm4, %v429_v59, %v433_v61  ;;  %v439_v56 = vshll.u32 %v6646_v62, 16  ;;  %v445_v45 = vshll.u32 %v6653_v55, 16  ;;  %v6675_v61 = vld [vmem:[%s6361_s9 + $0xbc] sm:$0x1] }
  0x57   : > { %v5071_v26 = vcombine.low %v424_v27, %v434_v18  ;;  %v611_v39 = vrot.slane %v610_v42, 4  ;;  %v620_v28 = vor.u32 %v619_v52, %v615_v50  ;;  %v438_v3 = vrot.slane %v436_v57, 4 }
  0x58   : > { %v441_v32 = vrot.slane %v439_v56, 5  ;;  %v447_v4 = vrot.slane %v445_v45, 5  ;;  %v449_v0 = vshrl.u32 %v6653_v55, 16  ;;  %v455_v20 = vshll.u32 %v6656_v49, 16 }
  0x59   : > { %5774 = vmatprep.mubr.msk.bf16.mxu0 %vm701_vm3, %v5071_v26  ;;  %v616_v59 = vsel %vm6405_vm4, %v611_v39, %v615_v50  ;;  %v621_v27 = vrot.slane %v620_v28, 4  ;;  %v628_v52 = vshrl.u32 %v6667_v54, 16  ;;  %v631_v42 = vshll.u32 %v6667_v54, 16 }
  0x5a   : > { %v442_v57 = vor.u32 %v441_v32, %v438_v3  ;;  %v451_v18 = vrot.slane %v449_v0, 4  ;;  %v457_v56 = vrot.slane %v455_v20, 5  ;;  %v637_v45 = vshll.u32 %v6670_v37, 16 }
  0x5b   : > { %v626_v44 = vsel %vm6405_vm4, %v621_v27, %v625_v13  ;;  %v630_v16 = vrot.slane %v628_v52, 4  ;;  %v633_v26 = vrot.slane %v631_v42, 5  ;;  %v641_v38 = vshrl.u32 %v6670_v37, 16 }
  0x5c   : > { %v5079_v50 = vcombine.low %v616_v59, %v626_v44  ;;  %v443_v39 = vrot.slane %v442_v57, 4  ;;  %v452_v28 = vor.u32 %v451_v18, %v447_v4  ;;  %v639_v47 = vrot.slane %v637_v45, 5  ;;  %v1209_v57 = vld [vmem:[%s6361_s9 + $0x18] sm:$0xe] }
  0x5d   : > { %v634_v54 = vor.u32 %v633_v26, %v630_v16  ;;  %v643_v3 = vrot.slane %v641_v38, 4  ;;  %v647_v32 = vshll.u32 %v6675_v61, 16  ;;  %v5129_v13 = vrot.slane %v1207_v22, 9 }
  0x5e   : > { %5790 = vmatprep.mubr.msk.bf16.mxu1 %vm701_vm3, %v5079_v50  ;;  %v448_v44 = vsel %vm6405_vm4, %v443_v39, %v447_v4  ;;  %v453_v20 = vrot.slane %v452_v28, 4  ;;  %v1260_v59 = vrot.slane %v6370_v6, 5  ;;  %v5098_v38 = vcombine.low %v6398_v29, %v6401_v30 }
  0x5f   : > { %v635_v16 = vrot.slane %v634_v54, 4  ;;  %v644_v27 = vor.u32 %v643_v3, %v639_v47  ;;  %v649_v52 = vrot.slane %v647_v32, 5  ;;  %v5130_v42 = vrot.slane %v1208_v51, 9 }
  0x60   : > { %v458_v18 = vsel %vm6405_vm4, %v453_v20, %v457_v56  ;;  %v1261_v22 = vsel %vm6691_vm7, %v5129_v13, %v1260_v59  ;;  %v1262_v45 = vrot.slane %v1260_v59, 4  ;;  %v9085_v4 = vrot.slane %v6401_v30, 5 }
  0x61   : > { %v5072_v50 = vcombine.low %v448_v44, %v458_v18  ;;  %v640_v54 = vsel %vm6405_vm4, %v635_v16, %v639_v47  ;;  %v645_v39 = vrot.slane %v644_v27, 4  ;;  %v5097_v51 = vcombine.low %v6367_v5, %v6370_v6  ;;  %v1210_v27 = vld [vmem:[%s6361_s9 + $0x24] sm:$0xe] }
  0x62   : > { %v1269_v26 = vrot.slane %v9085_v4, 4  ;;  %v9086_v28 = vrot.slane %v6373_v7, 5  ;;  %v9087_v3 = vmov %v9085_v4  ;;  %v5099_v13 = vcombine.low %v6440_v8, %v6447_v21  ;;  %v1212_v4 = vld [vmem:[%s6361_s9 + $0x3c] sm:$0xe] }
  0x63   : > { %v1268_v32 = vsel %vm6691_vm7, %v5130_v42, %v9087_v3  ;;  %v5131_v44 = vrot.slane %v1209_v57, 9  ;;  %5775 = vmatmul.mubr.msk.bf16.gmra.mxu0 %vm701_vm3, %v5072_v50  ;;  %v650_v47 = vsel %vm6405_vm4, %v645_v39, %v649_v52  ;;  %v9088_v6 = vrot.slane %v6411_v41, 5  ;;  %v1211_v42 = vld [vmem:[%s6361_s9 + $0x30] sm:$0xe]  ;;  %v1213_v39 = vld [vmem:[%s6361_s9 + $0x48] sm:$0xe] }
  0x64   : > { %v1264_v56 = vsel %vm6691_vm7, %v1262_v45, %v9086_v28  ;;  %v1274_v20 = vrot.slane %v6447_v21, 5  ;;  %v5080_v59 = vcombine.low %v640_v54, %v650_v47  ;;  %v1277_v16 = vrot.slane %v6453_v25, 5  ;;  %v1214_v47 = vld [vmem:[%s6361_s9 + $0x54] sm:$0xe]  ;;  %v6986_v21 = vld [vmem:[%s6361_s9 + $0x2c] sm:$0x1] }
  0x65   : > { %v5146_v5 = vcombine.low %v1261_v22, %v1264_v56  ;;  %v1271_v7 = vsel %vm6691_vm7, %v1269_v26, %v9088_v6  ;;  %v1828_v52 = vsel %vm750_vm0, %v6498_v19, 0  ;;  %v1281_v18 = vrot.slane %v6492_v10, 5 }
  0x66   : > { %v1275_v41 = vsel %vm6691_vm7, %v5131_v44, %v1274_v20  ;;  %v1276_v57 = vrot.slane %v1274_v20, 4  ;;  %5791 = vmatmul.mubr.msk.bf16.gmra.mxu1 %vm701_vm3, %v5080_v59  ;;  %v5147_v22 = vcombine.low %v1268_v32, %v1271_v7  ;;  %v2554_v25 = vsel %vm750_vm0, %v6466_v40, 0 }
  0x67   : > { %5830 = vmatprep.mubr.msk.bf16.mxu0 %vm701_vm3, %v5146_v5  ;;  %v1288_v45 = vrot.slane %v6538_v9, 5  ;;  %5796 = vmatprep.mubr.msk.bf16.mxu1 %vm701_vm3, %v5097_v51  ;;  %v5132_v26 = vrot.slane %v1210_v27, 9  ;;  %v1284_v50 = vrot.slane %v6503_v24, 5  ;;  %v5133_v54 = vrot.slane %v1211_v42, 9  ;;  %v6758_v24 = vld [vmem:[%s9031_s1 + $0xc] sm:$0x3] }
  0x68   : > { %v1278_v19 = vsel %vm6691_vm7, %v1276_v57, %v1277_v16  ;;  %v1283_v56 = vrot.slane %v1281_v18, 4  ;;  %v1291_v32 = vrot.slane %v6546_v33, 5  ;;  %v5134_v44 = vrot.slane %v1212_v4, 9 }
  0x69   : > { %v5148_v28 = vcombine.low %v1275_v41, %v1278_v19  ;;  %v1290_v3 = vrot.slane %v1288_v45, 4  ;;  %v1295_v40 = vrot.slane %v6575_v23, 5  ;;  %v1319_v5 = vrot.slane %v6387_v15, 5 }
  0x6a   : > { %v1298_v51 = vrot.slane %v6584_v48, 5  ;;  %v5135_v6 = vrot.slane %v1213_v39, 9  ;;  %v1302_v7 = vrot.slane %v6612_v17, 5  ;;  %v5100_v33 = vcombine.low %v6484_v1, %v6492_v10  ;;  %v1215_v1 = vld [vmem:[%s6361_s9 + $0x60] sm:$0xe] }
  0x6b   : > { %5831 = vmatmul.mubr.msk.bf16.vlgmr.msra.gmra.mxu0 %vm701_vm3, %v5147_v22  ;;  %v1282_v20 = vsel %vm6691_vm7, %v5132_v26, %v1281_v18  ;;  %v1297_v59 = vrot.slane %v1295_v40, 4  ;;  %v1305_v16 = vrot.slane %v6618_v2, 5  ;;  %v1285_v48 = vsel %vm6691_vm7, %v1283_v56, %v1284_v50  ;;  %v6786_v22 = vld [vmem:[%s9031_s1 + $0xa] sm:$0x3]  ;;  %v6811_v50 = vld [vmem:[%s6361_s9 + $0x6c] sm:$0xe] }
  0x6c   : > { %5897 = vmatpush3.bf16.msra.mxu0 %v2554_v25  ;;  %5834 = vmatprep.mubr.msk.bf16.mxu0 %vm701_vm3, %v5148_v28  ;;  %v1289_v27 = vsel %vm6691_vm7, %v5133_v54, %v1288_v45  ;;  %v1292_v42 = vsel %vm6691_vm7, %v1290_v3, %v1291_v32  ;;  %v1304_v41 = vrot.slane %v1302_v7, 4  ;;  %v6776_v10 = vsel %vm6691_vm7, %v5134_v44, %v1295_v40  ;;  %v1218_v39 = vld [vmem:[%s6361_s9 + $0x84] sm:$0xe]  ;;  %v6840_v44 = vld [vmem:[%s6361_s9 + $0x78] sm:$0xe] }
  0x6d   : > { %v6780_v2 = vsel %vm6691_vm7, %v5135_v6, %v1302_v7  ;;  %v5136_v57 = vrot.slane %v1214_v47, 9  ;;  %v1309_v18 = vrot.slane %v6653_v55, 5  ;;  %6075 = vmatprep.subr.msk.bf16.mxu0 %vm750_vm0, %v6758_v24  ;;  %v6796_v25 = vsel %vm6691_vm7, %v1297_v59, %v1298_v51  ;;  %v1219_v40 = vld [vmem:[%s6361_s9 + $0x90] sm:$0xe] }
  0x6e   : > { %5797 = vmatmul.mubr.msk.bf16.vlgmr.msra.gmra.mxu1 %vm701_vm3, %v5098_v38  ;;  %v6800_v45 = vsel %vm6691_vm7, %v1304_v41, %v1305_v16  ;;  %v1312_v4 = vrot.slane %v6656_v49, 5  ;;  %v1316_v19 = vrot.slane %v6384_v14, 5  ;;  %v5149_v29 = vcombine.low %v1282_v20, %v1285_v48  ;;  %v9089_v48 = vld [vmem:[#allocation6_spill] sm:$0xff] }
  0x6f   : > { %5863 = vmatpush3.bf16.msra.mxu1 %v1828_v52  ;;  %5800 = vmatprep.mubr.msk.bf16.mxu1 %vm701_vm3, %v5099_v13  ;;  %v5101_v30 = vcombine.low %v6533_v60, %v6538_v9  ;;  %v1311_v38 = vrot.slane %v1309_v18, 4  ;;  %v5137_v26 = vrot.slane %v1215_v1, 9  ;;  %v5150_v49 = vcombine.low %v1289_v27, %v1292_v42  ;;  %v1220_v42 = vld [vmem:[%s6361_s9 + $0x9c] sm:$0xe] }
  0x70   : > { %v5102_v52 = vcombine.low %v6570_v11, %v6575_v23  ;;  %v5103_v8 = vcombine.low %v6603_v34, %v6612_v17  ;;  %6074 = vmatprep.subr.msk.bf16.mxu1 %vm750_vm0, %v6786_v22  ;;  %v5151_v60 = vcombine.low %v6776_v10, %v6796_v25  ;;  %v5152_v9 = vcombine.low %v6780_v2, %v6800_v45  ;;  %v9090_v10 = vld [vmem:[#allocation8_spill] sm:$0xff]  ;;  %v9091_v2 = vld [vmem:[#allocation7_spill] sm:$0xff] }
  0x71   : > { %v1318_v54 = vrot.slane %v1316_v19, 4  ;;  %v6830_v28 = vsel %vm6691_vm7, %v5136_v57, %v1309_v18  ;;  %v6834_v56 = vsel %vm6691_vm7, %v1311_v38, %v1312_v4  ;;  %v5138_v32 = vrot.slane %v6811_v50, 9  ;;  %v1221_v18 = vld [vmem:[%s6361_s9 + $0xa8] sm:$0xe]  ;;  %v9093_v38 = vld [vmem:[#allocation11_spill] sm:$0xff] }
  0x72   : > { %v6846_v47 = vsel %vm6691_vm7, %v5137_v26, %v1316_v19  ;;  %v1323_v51 = vrot.slane %v6426_v58, 5  ;;  %v1326_v6 = vrot.slane %v6434_v63, 5  ;;  %v5140_v59 = vrot.slane %v1218_v39, 9  ;;  %v9092_v19 = vld [vmem:[#allocation9_spill] sm:$0xff]  ;;  %v9094_v26 = vld [vmem:[#allocation10_spill] sm:$0xff] }
  0x73   : > { %5835 = vmatmul.mubr.msk.bf16.gmra.mxu0 %vm701_vm3, %v5149_v29  ;;  %v1337_v16 = vrot.slane %v6517_v43, 5  ;;  %v1340_v27 = vrot.slane %v9089_v48, 5  ;;  %v5153_v41 = vcombine.low %v6830_v28, %v6834_v56  ;;  %v6864_v63 = vsel %vm6691_vm7, %v1318_v54, %v1319_v5  ;;  %v9096_v48 = vld [vmem:[#allocation14_spill] sm:$0xff] }
  0x74   : > { %5838 = vmatprep.mubr.msk.bf16.mxu0 %vm701_vm3, %v5150_v49  ;;  %v5139_v1 = vrot.slane %v6840_v44, 9  ;;  %v5141_v4 = vrot.slane %v1219_v40, 9  ;;  %v1344_v15 = vrot.slane %v9090_v10, 5  ;;  %v1325_v5 = vrot.slane %v1323_v51, 4  ;;  %v5243_v57 = vld [vmem:[%s6361_s9 + $0xc] sm:$0xf] }
  0x75   : > { %v6873_v25 = vsel %vm6691_vm7, %v5140_v59, %v1337_v16  ;;  %v1339_v45 = vrot.slane %v1337_v16, 4  ;;  %v1347_v29 = vrot.slane %v9092_v19, 5  ;;  %v5142_v49 = vrot.slane %v1220_v42, 9  ;;  %v9095_v59 = vld [vmem:[#allocation12_spill] sm:$0xff]  ;;  %v9097_v42 = vld [vmem:[#allocation13_spill] sm:$0xff] }
  0x76   : > { %5801 = vmatmul.mubr.msk.bf16.gmra.mxu1 %vm701_vm3, %v5100_v33  ;;  %v1330_v33 = vrot.slane %v6471_v46, 5  ;;  %v6887_v39 = vsel %vm6691_vm7, %v5141_v4, %v1344_v15  ;;  %v1346_v44 = vrot.slane %v1344_v15, 4  ;;  %v1351_v40 = vrot.slane %v9093_v38, 5  ;;  %v9098_v15 = vld [vmem:[#allocation15_spill] sm:$0xff] }
  0x77   : > { %5804 = vmatprep.mubr.msk.bf16.mxu1 %vm701_vm3, %v5101_v30  ;;  %v6883_v54 = vsel %vm6691_vm7, %v1339_v45, %v1340_v27  ;;  %v1354_v16 = vrot.slane %v9095_v59, 5  ;;  %v5143_v45 = vrot.slane %v1221_v18, 9  ;;  %v1358_v4 = vrot.slane %v9096_v48, 5 }
  0x78   : > { %v6897_v27 = vsel %vm6691_vm7, %v1346_v44, %v1347_v29  ;;  %v1361_v50 = vrot.slane %v9098_v15, 5  ;;  %v6907_v19 = vsel %vm6691_vm7, %v5142_v49, %v1351_v40  ;;  %v1353_v7 = vrot.slane %v1351_v40, 4  ;;  %v9099_v29 = vld [vmem:[#allocation16_spill] sm:$0xff]  ;;  %v9100_v15 = vld [vmem:[#allocation5_spill] sm:$0xff]  ;;  %v6922_v49 = vld [vmem:[%s6361_s9 + $0x10] sm:$0xf] }
  0x79   : > { %v6914_v18 = vsel %vm6691_vm7, %v5138_v32, %v1323_v51  ;;  %v6919_v59 = vsel %vm6691_vm7, %v5143_v45, %v1358_v4  ;;  %v1360_v30 = vrot.slane %v1358_v4, 4  ;;  %v5246_v40 = vld [vmem:[%s6361_s9 + $0x18] sm:$0xf]  ;;  %v1332_v20 = vrot.slane %v1330_v33, 4 }
  0x7a   : > { %v2072_v44 = vshrl.u32 %v5243_v57, 16  ;;  %v2075_v32 = vshll.u32 %v5243_v57, 16  ;;  %v5154_v51 = vcombine.low %v6846_v47, %v6864_v63  ;;  %v6937_v45 = vsel %vm6691_vm7, %v1325_v5, %v1326_v6  ;;  %v1222_v57 = vld [vmem:[%s6361_s9 + $0xb4] sm:$0xe]  ;;  %v6958_v47 = vld [vmem:[%s6361_s9 + $0x14] sm:$0x1] }
  0x7b   : > { %5839 = vmatmul.mubr.msk.bf16.gmra.mxu0 %vm701_vm3, %v5151_v60  ;;  %v1333_v60 = vrot.slane %v9100_v15, 5  ;;  %v6952_v11 = vsel %vm6691_vm7, %v5139_v1, %v1330_v33  ;;  %v2081_v6 = vshll.u32 %v6922_v49, 16  ;;  %v5247_v63 = vld [vmem:[%s6361_s9 + $0x1c] sm:$0xf]  ;;  %v2085_v17 = vshrl.u32 %v6922_v49, 16 }
  0x7c   : > { %5842 = vmatprep.mubr.msk.bf16.mxu0 %vm701_vm3, %v5152_v9  ;;  %v6927_v9 = vsel %vm6691_vm7, %v1353_v7, %v1354_v16  ;;  %v6943_v7 = vsel %vm6691_vm7, %v1360_v30, %v1361_v50  ;;  %v2074_v5 = vrot.slane %v2072_v44, 4  ;;  %v2077_v34 = vrot.slane %v2075_v32, 5  ;;  %v5249_v15 = vld [vmem:[%s6361_s9 + $0x24] sm:$0xf]  ;;  %v6971_v44 = vld [vmem:[%s6361_s9 + $0x28] sm:$0xf] }
  0x7d   : > { %v2096_v50 = vshrl.u32 %v5246_v40, 16  ;;  %v1334_v1 = vsel %vm6691_vm7, %v1332_v20, %v1333_v60  ;;  %v5144_v33 = vrot.slane %v1222_v57, 9  ;;  %v6966_v30 = vrot.slane %v2081_v6, 5 }
  0x7e   : > { %5805 = vmatmul.mubr.msk.bf16.gmra.mxu1 %vm701_vm3, %v5102_v52  ;;  %v1365_v52 = vrot.slane %v6670_v37, 5  ;;  %v2099_v16 = vshll.u32 %v5246_v40, 16  ;;  %v1368_v23 = vrot.slane %v6675_v61, 5  ;;  %v2087_v4 = vrot.slane %v2085_v17, 4 }
  0x7f   : > { %5808 = vmatprep.mubr.msk.bf16.mxu1 %vm701_vm3, %v5103_v8  ;;  %v5248_v8 = vld [vmem:[%s6361_s9 + $0x20] sm:$0x1]  ;;  %v2098_v3 = vrot.slane %v2096_v50, 4  ;;  %v2105_v13 = vshll.u32 %v5247_v63, 16  ;;  %v2091_v20 = vshll.u32 %v6958_v47, 16  ;;  %v2109_v57 = vshrl.u32 %v5247_v63, 16 }
  0x80   : > { %v1367_v32 = vrot.slane %v1365_v52, 4  ;;  %v2101_v60 = vrot.slane %v2099_v16, 5  ;;  %v5155_v61 = vcombine.low %v6914_v18, %v6937_v45  ;;  %v5156_v40 = vcombine.low %v6952_v11, %v1334_v1 }
  0x81   : > { %v2078_v6 = vor.u32 %v2077_v34, %v2074_v5  ;;  %v6982_v17 = vrot.slane %v2105_v13, 5  ;;  %v2088_v28 = vor.u32 %v2087_v4, %v6966_v30  ;;  %v2115_v50 = vshll.u32 %v5248_v8, 16  ;;  %v7009_v5 = vld [vmem:[%s6361_s9 + $0x34] sm:$0xf] }
  0x82   : > { %v2102_v56 = vor.u32 %v2101_v60, %v2098_v3  ;;  %v6994_v18 = vsel %vm6691_vm7, %v5144_v33, %v1365_v52  ;;  %v2120_v13 = vshrl.u32 %v5249_v15, 16  ;;  %v2123_v45 = vshll.u32 %v5249_v15, 16  ;;  %v5252_v52 = vld [vmem:[%s6361_s9 + $0x30] sm:$0xf] }
  0x83   : > { %5843 = vmatmul.mubr.msk.bf16.gmra.mxu0 %vm701_vm3, %v5153_v41  ;;  %v2111_v41 = vrot.slane %v2109_v57, 4  ;;  %v2129_v11 = vshll.u32 %v6971_v44, 16  ;;  %v9102_v3 = vcombine.low %v6380_v12, %v6384_v14  ;;  %v7003_v4 = vsel %vm6691_vm7, %v1367_v32, %v1368_v23 }
  0x84   : > { %5846 = vmatprep.mubr.msk.bf16.mxu0 %vm701_vm3, %v5154_v51  ;;  %v9101_v51 = vcombine.low %v6646_v62, %v6653_v55  ;;  %v2093_v62 = vrot.slane %v2091_v20, 5  ;;  %v2133_v63 = vshrl.u32 %v6971_v44, 16  ;;  %v2079_v34 = vrot.slane %v2078_v6, 4 }
  0x85   : > { %v2112_v55 = vor.u32 %v2111_v41, %v6982_v17  ;;  %v2122_v8 = vrot.slane %v2120_v13, 4  ;;  %v2125_v1 = vrot.slane %v2123_v45, 5  ;;  %v7011_v33 = vrot.slane %v2129_v11, 5  ;;  %v7017_v41 = vld [vmem:[%s6361_s9 + $0x38] sm:$0x1] }
  0x86   : > { %5809 = vmatmul.mubr.msk.bf16.gmra.mxu1 %vm701_vm3, %v9101_v51  ;;  %v2089_v12 = vrot.slane %v2088_v28, 4  ;;  %v2103_v14 = vrot.slane %v2102_v56, 4  ;;  %v2117_v16 = vrot.slane %v2115_v50, 5  ;;  %v2135_v23 = vrot.slane %v2133_v63, 4  ;;  %v5255_v13 = vld [vmem:[%s6361_s9 + $0x3c] sm:$0xf] }
  0x87   : > { %5812 = vmatprep.mubr.msk.bf16.mxu1 %vm701_vm3, %v9102_v3  ;;  %v2113_v15 = vrot.slane %v2112_v55, 4  ;;  %v2139_v32 = vshll.u32 %v6986_v21, 16  ;;  %v2144_v20 = vshrl.u32 %v5252_v52, 16  ;;  %v2147_v60 = vshll.u32 %v5252_v52, 16 }
  0x88   : > { %v2126_v57 = vor.u32 %v2125_v1, %v2122_v8  ;;  %v2136_v6 = vor.u32 %v2135_v23, %v7011_v33  ;;  %v2153_v28 = vshll.u32 %v7009_v5, 16  ;;  %v2157_v56 = vshrl.u32 %v7009_v5, 16  ;;  %v5258_v8 = vld [vmem:[%s6361_s9 + $0x48] sm:$0xf]  ;;  %v7044_v1 = vld [vmem:[%s6361_s9 + $0x4c] sm:$0xf] }
  0x89   : > { %v2146_v50 = vrot.slane %v2144_v20, 4  ;;  %v2149_v51 = vrot.slane %v2147_v60, 5  ;;  %v9103_v3 = vcombine.low %v6422_v53, %v6426_v58  ;;  %v5161_v55 = vcombine.low %v6994_v18, %v7003_v4 }
  0x8a   : > { %v7023_v45 = vrot.slane %v2153_v28, 5  ;;  %v2159_v11 = vrot.slane %v2157_v56, 4  ;;  %v2094_v63 = vsel %vm6405_vm4, %v2089_v12, %v2093_v62  ;;  %v2108_v52 = vsel %vm6405_vm4, %v2103_v14, %v6982_v17 }
  0x8b   : > { %5847 = vmatmul.mubr.msk.bf16.gmra.mxu0 %vm701_vm3, %v5155_v61  ;;  %v7026_v61 = vld [vmem:[%s6361_s9 + $0x40] sm:$0xf]  ;;  %v9104_v53 = vcombine.low %v6460_v35, %v6471_v46  ;;  %v2118_v58 = vsel %vm6405_vm4, %v2113_v15, %v2117_v16  ;;  %v2127_v23 = vrot.slane %v2126_v57, 4  ;;  %v2150_v20 = vor.u32 %v2149_v51, %v2146_v50  ;;  %v7078_v50 = vld [vmem:[%s6361_s9 + $0x44] sm:$0x1] }
  0x8c   : > { %5850 = vmatprep.mubr.msk.bf16.mxu0 %vm701_vm3, %v5156_v40  ;;  %v2084_v40 = vsel %vm6405_vm4, %v2079_v34, %v6966_v30  ;;  %v2137_v30 = vrot.slane %v2136_v6, 4  ;;  %v2141_v34 = vrot.slane %v2139_v32, 5  ;;  %v2163_v62 = vshll.u32 %v7017_v41, 16  ;;  %v5261_v51 = vld [vmem:[%s6361_s9 + $0x54] sm:$0xf] }
  0x8d   : > { %v2168_v12 = vshrl.u32 %v5255_v13, 16  ;;  %v2171_v17 = vshll.u32 %v5255_v13, 16  ;;  %v7055_v14 = vsel %vm750_vm0, %v6786_v22, 0  ;;  %v2160_v35 = vor.u32 %v2159_v11, %v7023_v45 }
  0x8e   : > { %5813 = vmatmul.mubr.msk.bf16.gmra.mxu1 %vm701_vm3, %v9103_v3  ;;  %v2177_v46 = vshll.u32 %v7026_v61, 16  ;;  %v2181_v16 = vshrl.u32 %v7026_v61, 16  ;;  %v7060_v15 = vcombine.low %v2084_v40, %v2094_v63  ;;  %v7064_v32 = vsel %vm750_vm0, %v6758_v24, 0  ;;  %v7087_v40 = vld [vmem:[%s6361_s9 + $0x58] sm:$0xf] }
  0x8f   : > { %5816 = vmatprep.mubr.msk.bf16.mxu1 %vm701_vm3, %v9104_v53  ;;  %v2192_v60 = vshrl.u32 %v5258_v8, 16  ;;  %v2195_v57 = vshll.u32 %v5258_v8, 16  ;;  %v9105_v6 = vcombine.low %v6873_v25, %v6883_v54  ;;  %v7070_v22 = vcombine.low %v2108_v52, %v2118_v58  ;;  %v7092_v8 = vld [vmem:[%s6361_s9 + $0x50] sm:$0x1] }
  0x90   : > { %v2132_v28 = vsel %vm6405_vm4, %v2127_v23, %v7011_v33  ;;  %v2142_v56 = vsel %vm6405_vm4, %v2137_v30, %v2141_v34  ;;  %v2201_v24 = vshll.u32 %v7044_v1, 16  ;;  %v9106_v25 = vcombine.low %v6887_v39, %v6897_v27  ;;  %v5264_v34 = vld [vmem:[%s6361_s9 + $0x60] sm:$0xf] }
  0x91   : > { %v2151_v54 = vrot.slane %v2150_v20, 4  ;;  %v2165_v13 = vrot.slane %v2163_v62, 5  ;;  %v2170_v11 = vrot.slane %v2168_v12, 4  ;;  %v2173_v3 = vrot.slane %v2171_v17, 5 }
  0x92   : > { %v2161_v33 = vrot.slane %v2160_v35, 4  ;;  %v7089_v63 = vrot.slane %v2177_v46, 5  ;;  %v2183_v52 = vrot.slane %v2181_v16, 4  ;;  %v2205_v53 = vshrl.u32 %v7044_v1, 16  ;;  %v7109_v35 = vld [vmem:[%s6361_s9 + $0x5c] sm:$0x1] }
  0x93   : > { %5851 = vmatmul.mubr.msk.bf16.gmra.mxu0 %vm701_vm3, %v9105_v6  ;;  %v9107_v39 = vcombine.low %v6510_v36, %v6517_v43  ;;  %v2194_v27 = vrot.slane %v2192_v60, 4  ;;  %v2197_v58 = vrot.slane %v2195_v57, 5  ;;  %v2216_v23 = vshrl.u32 %v5261_v51, 16 }
  0x94   : > { %5854 = vmatprep.mubr.msk.bf16.mxu0 %vm701_vm3, %v9106_v25  ;;  %v2219_v30 = vshll.u32 %v5261_v51, 16  ;;  %v9108_v20 = vcombine.low %v9091_v2, %v9090_v10  ;;  %v7104_v62 = vcombine.low %v2132_v28, %v2142_v56  ;;  %v7106_v12 = vrot.slane %v2201_v24, 5  ;;  %v7122_v28 = vld [vmem:[%s6361_s9 + $0x64] sm:$0xf] }
  0x95   : > { %v2207_v17 = vrot.slane %v2205_v53, 4  ;;  %v2225_v36 = vshll.u32 %v7087_v40, 16  ;;  %v2187_v43 = vshll.u32 %v7078_v50, 16  ;;  %v2218_v46 = vrot.slane %v2216_v23, 4 }
  0x96   : > { %5817 = vmatmul.mubr.msk.bf16.gmra.mxu1 %vm701_vm3, %v9107_v39  ;;  %v2221_v16 = vrot.slane %v2219_v30, 5  ;;  %v2229_v60 = vshrl.u32 %v7087_v40, 16  ;;  %v2156_v10 = vsel %vm6405_vm4, %v2151_v54, %v7023_v45  ;;  %v2166_v2 = vsel %vm6405_vm4, %v2161_v33, %v2165_v13  ;;  %v7144_v30 = vld [vmem:[%s6361_s9 + $0x68] sm:$0x1] }
  0x97   : > { %5820 = vmatprep.mubr.msk.bf16.mxu1 %vm701_vm3, %v9108_v20  ;;  %v2174_v57 = vor.u32 %v2173_v3, %v2170_v11  ;;  %v7119_v6 = vrot.slane %v2225_v36, 5  ;;  %v2184_v56 = vor.u32 %v2183_v52, %v7089_v63  ;;  %v2198_v24 = vor.u32 %v2197_v58, %v2194_v27  ;;  %v5267_v3 = vld [vmem:[%s6361_s9 + $0x6c] sm:$0xf]  ;;  %v7141_v27 = vld [vmem:[%s6361_s9 + $0x70] sm:$0xf] }
  0x98   : > { %v2211_v51 = vshll.u32 %v7092_v8, 16  ;;  %v2231_v25 = vrot.slane %v2229_v60, 4  ;;  %v9109_v53 = vcombine.low %v6907_v19, %v6927_v9  ;;  %v2208_v45 = vor.u32 %v2207_v17, %v7106_v12 }
  0x99   : > { %v2222_v54 = vor.u32 %v2221_v16, %v2218_v46  ;;  %v2240_v13 = vshrl.u32 %v5264_v34, 16  ;;  %v2243_v11 = vshll.u32 %v5264_v34, 16  ;;  %v9110_v33 = vcombine.low %v6919_v59, %v6943_v7  ;;  %v5270_v16 = vld [vmem:[%s6361_s9 + $0x78] sm:$0xf] }
  0x9a   : > { %v2232_v52 = vor.u32 %v2231_v25, %v7119_v6  ;;  %v2235_v39 = vshll.u32 %v7109_v35, 16  ;;  %v2249_v19 = vshll.u32 %v7122_v28, 16  ;;  %v2253_v9 = vshrl.u32 %v7122_v28, 16 }
  0x9b   : > { %5855 = vmatmul.mubr.msk.bf16.gmra.mxu0 %vm701_vm3, %v9109_v53  ;;  %v2175_v58 = vrot.slane %v2174_v57, 4  ;;  %v2189_v23 = vrot.slane %v2187_v43, 5  ;;  %v2242_v34 = vrot.slane %v2240_v13, 4  ;;  %v2245_v20 = vrot.slane %v2243_v11, 5 }
  0x9c   : > { %5858 = vmatprep.mubr.msk.bf16.mxu0 %vm701_vm3, %v9110_v33  ;;  %v9111_v59 = vcombine.low %v9094_v26, %v9093_v38  ;;  %v7150_v7 = vcombine.low %v2156_v10, %v2166_v2  ;;  %v2185_v17 = vrot.slane %v2184_v56, 4  ;;  %v2199_v36 = vrot.slane %v2198_v24, 4  ;;  %v7160_v2 = vld [vmem:[%s6361_s9 + $0x7c] sm:$0xf] }
  0x9d   : > { %v7152_v46 = vrot.slane %v2249_v19, 5  ;;  %v9112_v43 = vcombine.low %v9097_v42, %v9096_v48  ;;  %v2209_v60 = vrot.slane %v2208_v45, 4  ;;  %v2213_v57 = vrot.slane %v2211_v51, 5  ;;  %9113 = vst [vmem:[#allocation6_spill] sm:$0xff] %v7160_v2  ;;  %v5273_v19 = vld [vmem:[%s6361_s9 + $0x84] sm:$0xf] }
  0x9e   : > { %5821 = vmatmul.mubr.msk.bf16.gmra.mxu1 %vm701_vm3, %v9111_v59  ;;  %v2223_v25 = vrot.slane %v2222_v54, 4  ;;  %v2255_v38 = vrot.slane %v2253_v9, 4  ;;  %v2233_v26 = vrot.slane %v2232_v52, 4  ;;  %v2237_v53 = vrot.slane %v2235_v39, 5 }
  0x9f   : > { %5824 = vmatprep.mubr.msk.bf16.mxu1 %vm701_vm3, %v9112_v43  ;;  %v2246_v13 = vor.u32 %v2245_v20, %v2242_v34  ;;  %v2264_v10 = vshrl.u32 %v5267_v3, 16  ;;  %v2180_v56 = vsel %vm6405_vm4, %v2175_v58, %v7089_v63  ;;  %v2267_v24 = vshll.u32 %v5267_v3, 16  ;;  %v6152_v63 = vld [vmem:[%s6361_s9 + $0xc] sm:$0xff]   ;;  %v7194_v34 = vld [vmem:[%s6361_s9 + $0x88] sm:$0xf] }
  0xa0   : > { %v2273_v48 = vshll.u32 %v7141_v27, 16  ;;  %v2277_v42 = vshrl.u32 %v7141_v27, 16  ;;  %v2190_v51 = vsel %vm6405_vm4, %v2185_v17, %v2189_v23  ;;  %v2204_v45 = vsel %vm6405_vm4, %v2199_v36, %v7106_v12  ;;  %9114 = vst [vmem:[#allocation8_spill] sm:$0xff] %v7194_v34  ;;  %v7203_v36 = vld [vmem:[%s6361_s9 + $0x74] sm:$0x1] }
  0xa1   : > { %v2256_v54 = vor.u32 %v2255_v38, %v7152_v46  ;;  %v2259_v11 = vshll.u32 %v7144_v30, 16  ;;  %v2214_v3 = vsel %vm6405_vm4, %v2209_v60, %v2213_v57  ;;  %v2228_v33 = vsel %vm6405_vm4, %v2223_v25, %v7119_v6  ;;  %9116 = vst [vmem:[#allocation7_spill] sm:$0xff] %v7203_v36  ;;  %v7213_v38 = vld [vmem:[%s6361_s9 + $0x80] sm:$0x1] }
  0xa2   : > { %v2288_v52 = vshrl.u32 %v5270_v16, 16  ;;  %v2291_v12 = vshll.u32 %v5270_v16, 16  ;;  %v2238_v18 = vsel %vm6405_vm4, %v2233_v26, %v2237_v53  ;;  %v2247_v4 = vrot.slane %v2246_v13, 4  ;;  %9117 = vst [vmem:[#allocation9_spill] sm:$0xff] %v7213_v38  ;;  %v7216_v26 = vld [vmem:[%s6361_s9 + $0x8c] sm:$0x1] }
  0xa3   : > { %5859 = vmatmul.mubr.msk.bf16.gmra.mxu0 %vm701_vm3, %v5161_v55  ;;  %v2266_v55 = vrot.slane %v2264_v10, 4  ;;  %v2297_v39 = vshll.u32 %v7160_v2, 16  ;;  %v2269_v9 = vrot.slane %v2267_v24, 5  ;;  %v7190_v58 = vrot.slane %v2273_v48, 5  ;;  %9118 = vst [vmem:[#allocation11_spill] sm:$0xff] %v7216_v26  ;;  %v6153_v10 = vld [vmem:[%s6361_s9 + $0x18] sm:$0xff]  }
  0xa4   : > { %5898 = vmatprep.mubr.msk.bf16.mxu0 %vm701_vm3, %v7060_v15  ;;  %v2279_v23 = vrot.slane %v2277_v42, 4  ;;  %v2301_v6 = vshrl.u32 %v7160_v2, 16  ;;  %v9115_v15 = vcombine.low %v9099_v29, %v6670_v37  ;;  %v7200_v20 = vcombine.low %v2180_v56, %v2190_v51  ;;  %v5276_v51 = vld [vmem:[%s6361_s9 + $0x90] sm:$0xf] }
  0xa5   : > { %v2257_v59 = vrot.slane %v2256_v54, 4  ;;  %v2261_v17 = vrot.slane %v2259_v11, 5  ;;  %v2290_v16 = vrot.slane %v2288_v52, 4  ;;  %v2293_v43 = vrot.slane %v2291_v12, 5 }
  0xa6   : > { %5825 = vmatmul.mubr.msk.bf16.gmra.mxu1 %vm701_vm3, %v9115_v15  ;;  %v7206_v60 = vrot.slane %v2297_v39, 5  ;;  %v2303_v57 = vrot.slane %v2301_v6, 4  ;;  %v2312_v25 = vshrl.u32 %v5273_v19, 16  ;;  %v7208_v37 = vcombine.low %v2204_v45, %v2214_v3  ;;  %v7227_v45 = vld [vmem:[%s6361_s9 + $0x94] sm:$0xf] }
  0xa7   : > { %5864 = vmatprep.mubr.msk.bf16.mxu1 %vm701_vm3, %v6152_v63  ;;  %v7210_v29 = vcombine.low %v2228_v33, %v2238_v18  ;;  %v2315_v53 = vshll.u32 %v5273_v19, 16  ;;  %v2321_v13 = vshll.u32 %v7194_v34, 16  ;;  %v2252_v56 = vsel %vm6405_vm4, %v2247_v4, %v7152_v46  ;;  %9119 = vst [vmem:[#allocation10_spill] sm:$0xff] %v7227_v45  ;;  %v7235_v33 = vld [vmem:[%s9031_s1 + $0x10] sm:$0x3]  ;;  %v6154_v46 = vld [vmem:[%s6361_s9 + $0x24] sm:$0xff]  }
  0xa8   : > { %v2270_v24 = vor.u32 %v2269_v9, %v2266_v55  ;;  %v2280_v48 = vor.u32 %v2279_v23, %v7190_v58  ;;  %v2283_v42 = vshll.u32 %v7203_v36, 16  ;;  %v2314_v54 = vrot.slane %v2312_v25, 4  ;;  %9120 = vst [vmem:[#allocation12_spill] sm:$0xff] %v7235_v33 }
  0xa9   : > { %v2317_v11 = vrot.slane %v2315_v53, 5  ;;  %v7229_v63 = vrot.slane %v2321_v13, 5  ;;  %v2325_v3 = vshrl.u32 %v7194_v34, 16  ;;  %v2262_v52 = vsel %vm6405_vm4, %v2257_v59, %v2261_v17 }
  0xaa   : > { %v2294_v12 = vor.u32 %v2293_v43, %v2290_v16  ;;  %v2304_v18 = vor.u32 %v2303_v57, %v7206_v60  ;;  %v2307_v4 = vshll.u32 %v7213_v38, 16  ;;  %v2336_v19 = vshrl.u32 %v5276_v51, 16  ;;  %v7269_v57 = vld [vmem:[%s6361_s9 + $0xa0] sm:$0xf] }
  0xab   : > { %5899 = vmatmul.mubr.msk.bf16.vlgmr.msra.gmra.mxu0 %vm701_vm3, %v7070_v22  ;;  %v2318_v55 = vor.u32 %v2317_v11, %v2314_v54  ;;  %v2327_v39 = vrot.slane %v2325_v3, 4  ;;  %v2339_v9 = vshll.u32 %v5276_v51, 16  ;;  %v5279_v22 = vld [vmem:[%s6361_s9 + $0x9c] sm:$0xf]  ;;  %v7248_v23 = vrot.slane %v2270_v24, 4  ;;  %9122 = vst [vmem:[#allocation13_spill] sm:$0xff] %v7269_v57 }
  0xac   : > { %5965 = vmatpush3.bf16.msra.mxu0 %v7064_v32  ;;  %5902 = vmatprep.mubr.msk.bf16.mxu0 %vm701_vm3, %v7104_v62  ;;  %v7250_v6 = vrot.slane %v2283_v42, 5  ;;  %v2331_v15 = vshll.u32 %v7216_v26, 16  ;;  %v2345_v59 = vshll.u32 %v7227_v45, 16  ;;  %v7257_v32 = vld [vmem:[%s9031_s1 + $0xe] sm:$0x3]  ;;  %v7262_v62 = vcombine.low %v2252_v56, %v2262_v52 }
  0xad   : > { %9121 = vst [vmem:[#allocation14_spill] sm:$0xff] %v7257_v32  ;;  %6077 = vmatprep.subr.msk.bf16.mxu0 %vm750_vm0, %v7235_v33  ;;  %v7264_v17 = vrot.slane %v2280_v48, 4  ;;  %v2328_v16 = vor.u32 %v2327_v39, %v7229_v63  ;;  %v2349_v43 = vshrl.u32 %v7227_v45, 16  ;;  %v7273_v25 = vrot.slane %v2294_v12, 4  ;;  %v7282_v56 = vld [vmem:[%s6361_s9 + $0x98] sm:$0x1] }
  0xae   : > { %5865 = vmatmul.mubr.msk.bf16.vlgmr.msra.gmra.mxu1 %vm701_vm3, %v6153_v10  ;;  %v7275_v53 = vrot.slane %v2304_v18, 4  ;;  %v7277_v13 = vrot.slane %v2307_v4, 5  ;;  %v7279_v10 = vrot.slane %v2318_v55, 4  ;;  %9123 = vst [vmem:[#allocation15_spill] sm:$0xff] %v7282_v56  ;;  %v2338_v24 = vrot.slane %v2336_v19, 4  ;;  %v6156_v19 = vld [vmem:[%s6361_s9 + $0x3c] sm:$0xff]  }
  0xaf   : > { %5931 = vmatpush3.bf16.msra.mxu1 %v7055_v14  ;;  %5868 = vmatprep.mubr.msk.bf16.mxu1 %vm701_vm3, %v6154_v46  ;;  %v2341_v48 = vrot.slane %v2339_v9, 5  ;;  %v2360_v42 = vshrl.u32 %v5279_v22, 16  ;;  %v2363_v51 = vshll.u32 %v5279_v22, 16  ;;  %v6155_v14 = vld [vmem:[%s6361_s9 + $0x30] sm:$0xff]   ;;  %v7291_v11 = vrot.slane %v2331_v15, 5 }
  0xb0   : > { %6076 = vmatprep.subr.msk.bf16.mxu1 %vm750_vm0, %v7257_v32  ;;  %v7293_v3 = vrot.slane %v2345_v59, 5  ;;  %v2369_v46 = vshll.u32 %v7269_v57, 16  ;;  %v5282_v52 = vld [vmem:[%s6361_s9 + $0xa8] sm:$0xf]  ;;  %v7297_v12 = vrot.slane %v2328_v16, 4  ;;  %v2351_v18 = vrot.slane %v2349_v43, 4 }
  0xb1   : > { %v2355_v4 = vshll.u32 %v7282_v56, 16  ;;  %v2373_v55 = vshrl.u32 %v7269_v57, 16  ;;  %v7302_v39 = vld [vmem:[%s6361_s9 + $0xac] sm:$0xf]  ;;  %v2342_v59 = vor.u32 %v2341_v48, %v2338_v24  ;;  %v7326_v16 = vld [vmem:[%s6361_s9 + $0xa4] sm:$0x1] }
  0xb2   : > { %9124 = vst [vmem:[#allocation16_spill] sm:$0xff] %v7302_v39  ;;  %9125 = vst [vmem:[#allocation5_spill] sm:$0xff] %v7326_v16  ;;  %v2362_v43 = vrot.slane %v2360_v42, 4  ;;  %v2365_v22 = vrot.slane %v2363_v51, 5  ;;  %v2384_v54 = vshrl.u32 %v5282_v52, 16  ;;  %v7328_v9 = vrot.slane %v2369_v46, 5 }
  0xb3   : > { %5903 = vmatmul.mubr.msk.bf16.gmra.mxu0 %vm701_vm3, %v7150_v7  ;;  %v2375_v32 = vrot.slane %v2373_v55, 4  ;;  %v2387_v15 = vshll.u32 %v5282_v52, 16  ;;  %v2393_v33 = vshll.u32 %v7302_v39, 16  ;;  %v5285_v57 = vld [vmem:[%s6361_s9 + $0xb4] sm:$0xf]  ;;  %v2352_v24 = vor.u32 %v2351_v18, %v7293_v3 }
  0xb4   : > { %5906 = vmatprep.mubr.msk.bf16.mxu0 %vm701_vm3, %v7200_v20  ;;  %v2334_v20 = vsel %vm6405_vm4, %v7297_v12, %v7291_v11  ;;  %v7338_v48 = vrot.slane %v2355_v4, 5  ;;  %v7341_v42 = vld [vmem:[%s6361_s9 + $0xb0] sm:$0x1]  ;;  %v2386_v51 = vrot.slane %v2384_v54, 4  ;;  %v7344_v46 = vld [vmem:[%s6361_s9 + $0xb8] sm:$0xf]  ;;  %v2366_v18 = vor.u32 %v2365_v22, %v2362_v43 }
  0xb5   : > { %9126 = vst [vmem:[#allocation17_spill] sm:$0xff] %v7341_v42  ;;  %9127 = vst [vmem:[#allocation18_spill] sm:$0xff] %v7344_v46  ;;  %v2389_v52 = vrot.slane %v2387_v15, 5  ;;  %v7348_v55 = vrot.slane %v2393_v33, 5  ;;  %v2397_v11 = vshrl.u32 %v7302_v39, 16  ;;  %v7351_v12 = vrot.slane %v2342_v59, 4 }
  0xb6   : > { %5869 = vmatmul.mubr.msk.bf16.gmra.mxu1 %vm701_vm3, %v6155_v14  ;;  %v2379_v14 = vshll.u32 %v7326_v16, 16  ;;  %v7354_v4 = vld [vmem:[%s6361_s9 + $0xbc] sm:$0x1]  ;;  %v2408_v54 = vshrl.u32 %v5285_v57, 16  ;;  %v2411_v7 = vshll.u32 %v5285_v57, 16  ;;  %v2376_v56 = vor.u32 %v2375_v32, %v7328_v9  ;;  %v6157_v16 = vld [vmem:[%s6361_s9 + $0x48] sm:$0xff]  }
  0xb7   : > { %5872 = vmatprep.mubr.msk.bf16.mxu1 %vm701_vm3, %v6156_v19  ;;  %v2399_v45 = vrot.slane %v2397_v11, 4  ;;  %v2403_v19 = vshll.u32 %v7341_v42, 16  ;;  %v2417_v15 = vshll.u32 %v7344_v46, 16  ;;  %v5288_v33 = vld [vmem:[%s6361_s9 + $0xc0] sm:$0xf]  ;;  %v2390_v26 = vor.u32 %v2389_v52, %v2386_v51  ;;  %v6158_v57 = vld [vmem:[%s6361_s9 + $0x54] sm:$0xff]  }
  0xb8   : > { %v2410_v39 = vrot.slane %v2408_v54, 4  ;;  %v2413_v34 = vrot.slane %v2411_v7, 5  ;;  %v2421_v59 = vshrl.u32 %v7344_v46, 16  ;;  %v7363_v22 = vld [vmem:[%s6361_s9 + $0xc4] sm:$0xf]  ;;  %v2353_v43 = vrot.slane %v2352_v24, 4 }
  0xb9   : > { %v2381_v32 = vrot.slane %v2379_v14, 5  ;;  %v2400_v11 = vor.u32 %v2399_v45, %v7348_v55  ;;  %v2419_v42 = vrot.slane %v2417_v15, 5  ;;  %v2427_v7 = vshll.u32 %v7354_v4, 16  ;;  %v7375_v45 = vld [vmem:[%s6361_s9 + $0xc8] sm:$0x1] }
  0xba   : > { %v2414_v51 = vor.u32 %v2413_v34, %v2410_v39  ;;  %v2423_v52 = vrot.slane %v2421_v59, 4  ;;  %v2432_v54 = vshrl.u32 %v5288_v33, 16  ;;  %v2367_v46 = vrot.slane %v2366_v18, 4 }
  0xbb   : > { %5907 = vmatmul.mubr.msk.bf16.gmra.mxu0 %vm701_vm3, %v7208_v37  ;;  %v2377_v38 = vrot.slane %v2376_v56, 4  ;;  %v2435_v2 = vshll.u32 %v5288_v33, 16  ;;  %v2441_v37 = vshll.u32 %v7363_v22, 16  ;;  %v2391_v24 = vrot.slane %v2390_v26, 4 }
  0xbc   : > { %5910 = vmatprep.mubr.msk.bf16.mxu0 %vm701_vm3, %v7210_v29  ;;  %v2405_v14 = vrot.slane %v2403_v19, 5  ;;  %v2424_v36 = vor.u32 %v2423_v52, %v2419_v42  ;;  %v2434_v15 = vrot.slane %v2432_v54, 4  ;;  %v2401_v34 = vrot.slane %v2400_v11, 4 }
  0xbd   : > { %v2437_v29 = vrot.slane %v2435_v2, 5  ;;  %v7378_v39 = vrot.slane %v2441_v37, 5  ;;  %v2445_v56 = vshrl.u32 %v7363_v22, 16  ;;  %v9128_v26 = vsel %vm6405_vm4, %v7264_v17, %v7250_v6 }
  0xbe   : > { %5873 = vmatmul.mubr.msk.bf16.gmra.mxu1 %vm701_vm3, %v6157_v16  ;;  %v9129_v16 = vsel %vm6405_vm4, %v7248_v23, %v7190_v58  ;;  %v2415_v19 = vrot.slane %v2414_v51, 4  ;;  %v2425_v33 = vrot.slane %v2424_v36, 4  ;;  %v2429_v2 = vrot.slane %v2427_v7, 5  ;;  %v6159_v23 = vld [vmem:[%s6361_s9 + $0x60] sm:$0xff]  }
  0xbf   : > { %5876 = vmatprep.mubr.msk.bf16.mxu1 %vm701_vm3, %v6158_v57  ;;  %v5300_v18 = vcombine.low %v9129_v16, %v9128_v26  ;;  %v9130_v59 = vsel %vm6405_vm4, %v7275_v53, %v7277_v13  ;;  %v9131_v6 = vsel %vm6405_vm4, %v7273_v25, %v7206_v60  ;;  %v2438_v57 = vor.u32 %v2437_v29, %v2434_v15  ;;  %v5326_v13 = vld [vmem:[%s6361_s9 + $0x24] sm:$0xe]  ;;  %v5329_v26 = vld [vmem:[%s6361_s9 + $0x48] sm:$0xe] }
  0xc0   : > { %v5301_v17 = vcombine.low %v9131_v6, %v9130_v59  ;;  %v2447_v11 = vrot.slane %v2445_v56, 4  ;;  %v2451_v58 = vshll.u32 %v7375_v45, 16  ;;  %v9132_v36 = vsel %vm6405_vm4, %v7279_v10, %v7229_v63  ;;  %v6160_v63 = vld [vmem:[%s6361_s9 + $0x6c] sm:$0xff]   ;;  %v5330_v6 = vld [vmem:[%s6361_s9 + $0x54] sm:$0xe] }
  0xc1   : > { %v5302_v51 = vcombine.low %v9132_v36, %v2334_v20  ;;  %v2348_v53 = vsel %vm6405_vm4, %v7351_v12, %v7293_v3  ;;  %v2358_v60 = vsel %vm6405_vm4, %v2353_v43, %v7338_v48  ;;  %v2372_v25 = vsel %vm6405_vm4, %v2367_v46, %v7328_v9  ;;  %v7431_v12 = vld [vmem:[%s6361_s9 + $0xc] sm:$0xe] }
  0xc2   : > { %v2382_v10 = vsel %vm6405_vm4, %v2377_v38, %v2381_v32  ;;  %v2396_v3 = vsel %vm6405_vm4, %v2391_v24, %v7348_v55  ;;  %v2406_v20 = vsel %vm6405_vm4, %v2401_v34, %v2405_v14  ;;  %v2448_v48 = vor.u32 %v2447_v11, %v7378_v39  ;;  %v5327_v55 = vld [vmem:[%s6361_s9 + $0x30] sm:$0xe]  ;;  %v5328_v14 = vld [vmem:[%s6361_s9 + $0x3c] sm:$0xe] }
  0xc3   : > { %5911 = vmatmul.mubr.msk.bf16.gmra.mxu0 %vm701_vm3, %v7262_v62  ;;  %v2420_v62 = vsel %vm6405_vm4, %v2415_v19, %v2419_v42  ;;  %v2430_v38 = vsel %vm6405_vm4, %v2425_v33, %v2429_v2  ;;  %v7438_v9 = vrot.slane %v2438_v57, 4  ;;  %v2815_v46 = vrot.slane %v6922_v49, 5  ;;  %v6161_v57 = vld [vmem:[%s6361_s9 + $0x78] sm:$0xff]  }
  0xc4   : > { %5914 = vmatprep.mubr.msk.bf16.mxu0 %vm701_vm3, %v5300_v18  ;;  %v7442_v43 = vcombine.low %v2348_v53, %v2358_v60  ;;  %v7444_v32 = vrot.slane %v2448_v48, 4  ;;  %v7446_v52 = vrot.slane %v2451_v58, 5  ;;  %v5342_v7 = vrot.slane %v5326_v13, 9  ;;  %v6162_v53 = vld [vmem:[%s6361_s9 + $0x84] sm:$0xff]   ;;  %v5331_v13 = vld [vmem:[%s6361_s9 + $0x60] sm:$0xe] }
  0xc5   : > { %v7449_v54 = vcombine.low %v2372_v25, %v2382_v10  ;;  %v7451_v42 = vcombine.low %v2396_v3, %v2406_v20  ;;  %v5340_v37 = vrot.slane %v7431_v12, 9  ;;  %v2829_v24 = vrot.slane %v6971_v44, 5  ;;  %v6168_v49 = vld [vmem:[%s6361_s9 + $0x18] sm:$0xff]  }
  0xc6   : > { %5877 = vmatmul.mubr.msk.bf16.gmra.mxu1 %vm701_vm3, %v6159_v23  ;;  %v7457_v15 = vcombine.low %v2420_v62, %v2430_v38  ;;  %v2818_v34 = vrot.slane %v6958_v47, 5  ;;  %v2832_v29 = vrot.slane %v6986_v21, 5  ;;  %v5343_v56 = vrot.slane %v5327_v55, 9  ;;  %v5333_v55 = vld [vmem:[%s6361_s9 + $0x78] sm:$0xe] }
  0xc7   : > { %5880 = vmatprep.mubr.msk.bf16.mxu1 %vm701_vm3, %v6160_v63  ;;  %v2444_v16 = vsel %vm6405_vm4, %v7438_v9, %v7378_v39  ;;  %v7468_v44 = vrot.slane %v2815_v46, 4  ;;  %v7472_v18 = vsel %vm6691_vm7, %v5342_v7, %v2829_v24  ;;  %v2831_v19 = vrot.slane %v2829_v24, 4 }
  0xc8   : > { %v2454_v21 = vsel %vm6405_vm4, %v7444_v32, %v7446_v52  ;;  %v2836_v33 = vrot.slane %v7009_v5, 5  ;;  %v2839_v2 = vrot.slane %v7017_v41, 5  ;;  %v5344_v59 = vrot.slane %v5328_v14, 9  ;;  %v6167_v52 = vld [vmem:[%s6361_s9 + $0xc0] sm:$0xff]  }
  0xc9   : > { %v7484_v11 = vsel %vm6691_vm7, %v2831_v19, %v2832_v29  ;;  %v2843_v58 = vrot.slane %v7026_v61, 5  ;;  %v2846_v23 = vrot.slane %v7078_v50, 5  ;;  %v5345_v36 = vrot.slane %v5329_v26, 9  ;;  %v5334_v19 = vld [vmem:[%s6361_s9 + $0x84] sm:$0xe] }
  0xca   : > { %v5359_v5 = vcombine.low %v7472_v18, %v7484_v11  ;;  %v7494_v41 = vsel %vm6691_vm7, %v5343_v56, %v2836_v33  ;;  %v2838_v60 = vrot.slane %v2836_v33, 4  ;;  %v2850_v25 = vrot.slane %v7044_v1, 5 }
  0xcb   : > { %5915 = vmatmul.mubr.msk.bf16.gmra.mxu0 %vm701_vm3, %v5301_v17  ;;  %v7501_v61 = vsel %vm6691_vm7, %v5344_v59, %v2843_v58  ;;  %v2845_v50 = vrot.slane %v2843_v58, 4  ;;  %v2853_v17 = vrot.slane %v7092_v8, 5  ;;  %v5346_v63 = vrot.slane %v5330_v6, 9  ;;  %v9133_v59 = vld [vmem:[#allocation7_spill] sm:$0xff] }
  0xcc   : > { %5918 = vmatprep.mubr.msk.bf16.mxu0 %vm701_vm3, %v5302_v51  ;;  %v7506_v10 = vsel %vm6691_vm7, %v2838_v60, %v2839_v2  ;;  %v7510_v3 = vsel %vm6691_vm7, %v5345_v36, %v2850_v25  ;;  %v2852_v1 = vrot.slane %v2850_v25, 4  ;;  %v2857_v20 = vrot.slane %v7087_v40, 5  ;;  %v5332_v51 = vld [vmem:[%s6361_s9 + $0x6c] sm:$0xe]  ;;  %v6163_v58 = vld [vmem:[%s6361_s9 + $0x90] sm:$0xff]  }
  0xcd   : > { %v5360_v48 = vcombine.low %v7494_v41, %v7506_v10  ;;  %v7519_v8 = vsel %vm6691_vm7, %v2845_v50, %v2846_v23  ;;  %v2860_v62 = vrot.slane %v7109_v35, 5  ;;  %v5347_v38 = vrot.slane %v5331_v13, 9  ;;  %v9134_v36 = vld [vmem:[#allocation6_spill] sm:$0xff]  ;;  %v5335_v60 = vld [vmem:[%s6361_s9 + $0x90] sm:$0xe]  ;;  %v9135_v50 = vld [vmem:[#allocation9_spill] sm:$0xff] }
  0xce   : > { %5881 = vmatmul.mubr.msk.bf16.gmra.mxu1 %vm701_vm3, %v6161_v57  ;;  %v5361_v40 = vcombine.low %v7501_v61, %v7519_v8  ;;  %v7528_v7 = vsel %vm6691_vm7, %v2852_v1, %v2853_v17  ;;  %v7532_v24 = vsel %vm6691_vm7, %v5346_v63, %v2857_v20  ;;  %v2859_v14 = vrot.slane %v2857_v20, 4 }
  0xcf   : > { %5884 = vmatprep.mubr.msk.bf16.mxu1 %vm701_vm3, %v6162_v53  ;;  %v5362_v35 = vcombine.low %v7510_v3, %v7528_v7  ;;  %v2864_v29 = vrot.slane %v7122_v28, 5  ;;  %v2867_v56 = vrot.slane %v7144_v30, 5  ;;  %v5348_v26 = vrot.slane %v5332_v51, 9  ;;  %v9136_v51 = vld [vmem:[#allocation8_spill] sm:$0xff]  ;;  %v5466_v3 = vld [vmem:[%s6361_s9 + $0x48] sm:$0xf] }
  0xd0   : > { %v7541_v33 = vsel %vm6691_vm7, %v2859_v14, %v2860_v62  ;;  %v2871_v2 = vrot.slane %v7141_v27, 5  ;;  %v2874_v6 = vrot.slane %v9133_v59, 5  ;;  %v5349_v57 = vrot.slane %v5333_v55, 9  ;;  %v6164_v27 = vld [vmem:[%s6361_s9 + $0x9c] sm:$0xff]   ;;  %v9144_v55 = vld [vmem:[#allocation18_spill] sm:$0xff] }
  0xd1   : > { %v5363_v23 = vcombine.low %v7532_v24, %v7541_v33  ;;  %v7550_v28 = vsel %vm6691_vm7, %v5347_v38, %v2864_v29  ;;  %v2866_v30 = vrot.slane %v2864_v29, 4  ;;  %v2878_v53 = vrot.slane %v9134_v36, 5  ;;  %v5336_v38 = vld [vmem:[%s6361_s9 + $0x9c] sm:$0xe]  ;;  %v9139_v36 = vld [vmem:[#allocation15_spill] sm:$0xff] }
  0xd2   : > { %v7559_v25 = vsel %vm6691_vm7, %v5348_v26, %v2871_v2  ;;  %v2873_v13 = vrot.slane %v2871_v2, 4  ;;  %v2881_v17 = vrot.slane %v9135_v50, 5  ;;  %v5350_v63 = vrot.slane %v5334_v19, 9  ;;  %v5337_v26 = vld [vmem:[%s6361_s9 + $0xa8] sm:$0xe] }
  0xd3   : > { %5919 = vmatmul.mubr.msk.bf16.gmra.mxu0 %vm701_vm3, %v7442_v43  ;;  %v7566_v1 = vsel %vm6691_vm7, %v2866_v30, %v2867_v56  ;;  %v7570_v43 = vsel %vm6691_vm7, %v5349_v57, %v2878_v53  ;;  %v2880_v20 = vrot.slane %v2878_v53, 4  ;;  %v2885_v62 = vrot.slane %v9136_v51, 5  ;;  %v5339_v57 = vld [vmem:[%s6361_s9 + $0xc0] sm:$0xe]  ;;  %v6165_v19 = vld [vmem:[%s6361_s9 + $0xa8] sm:$0xff]  }
  0xd4   : > { %5922 = vmatprep.mubr.msk.bf16.mxu0 %vm701_vm3, %v7449_v54  ;;  %v7578_v14 = vsel %vm6691_vm7, %v2873_v13, %v2874_v6  ;;  %v9137_v54 = vld [vmem:[#allocation11_spill] sm:$0xff]  ;;  %v5351_v56 = vrot.slane %v5335_v60, 9  ;;  %v2895_v53 = vrot.slane %v9139_v36, 5  ;;  %v5352_v60 = vrot.slane %v5336_v38, 9  ;;  %v9142_v38 = vld [vmem:[#allocation16_spill] sm:$0xff] }
  0xd5   : > { %v2888_v29 = vrot.slane %v9137_v54, 5  ;;  %v7587_v2 = vsel %vm6691_vm7, %v2880_v20, %v2881_v17  ;;  %v7591_v59 = vsel %vm6691_vm7, %v5350_v63, %v2885_v62  ;;  %v2887_v6 = vrot.slane %v2885_v62, 4  ;;  %v5338_v13 = vld [vmem:[%s6361_s9 + $0xb4] sm:$0xe]  ;;  %v9140_v17 = vld [vmem:[#allocation13_spill] sm:$0xff] }
  0xd6   : > { %5885 = vmatmul.mubr.msk.bf16.gmra.mxu1 %vm701_vm3, %v6163_v58  ;;  %v9138_v58 = vld [vmem:[#allocation10_spill] sm:$0xff]  ;;  %v2899_v63 = vrot.slane %v9140_v17, 5  ;;  %v9141_v20 = vld [vmem:[#allocation5_spill] sm:$0xff]  ;;  %v5353_v62 = vrot.slane %v5337_v26, 9  ;;  %v2906_v36 = vrot.slane %v9142_v38, 5  ;;  %v5354_v26 = vrot.slane %v5338_v13, 9 }
  0xd7   : > { %5888 = vmatprep.mubr.msk.bf16.mxu1 %vm701_vm3, %v6164_v27  ;;  %v2892_v30 = vrot.slane %v9138_v58, 5  ;;  %v7601_v50 = vsel %vm6691_vm7, %v2887_v6, %v2888_v29  ;;  %v2902_v51 = vrot.slane %v9141_v20, 5  ;;  %v9143_v17 = vld [vmem:[#allocation17_spill] sm:$0xff]  ;;  %v6166_v27 = vld [vmem:[%s6361_s9 + $0xb4] sm:$0xff]   ;;  %v2819_v39 = vsel %vm6691_vm7, %v7468_v44, %v2818_v34  ;;  %v7818_v7 = vld [vmem:[%s6361_s9 + $0x4c] sm:$0xf] }
  0xd8   : > { %v7616_v29 = vsel %vm6691_vm7, %v5352_v60, %v2899_v63  ;;  %v2901_v6 = vrot.slane %v2899_v63, 4  ;;  %v2909_v20 = vrot.slane %v9143_v17, 5  ;;  %v2908_v38 = vrot.slane %v2906_v36, 4  ;;  %v6185_v44 = vld [vmem:[%s6361_s9 + $0x20] sm:$0x1] }
  0xd9   : > { %v7609_v54 = vsel %vm6691_vm7, %v5351_v56, %v2892_v30  ;;  %v2894_v58 = vrot.slane %v2892_v30, 4  ;;  %v7628_v30 = vsel %vm6691_vm7, %v5353_v62, %v2906_v36  ;;  %v2913_v60 = vrot.slane %v9144_v55, 5 }
  0xda   : > { %v5355_v63 = vrot.slane %v5339_v57, 9  ;;  %v7644_v55 = vsel %vm6691_vm7, %v2908_v38, %v2909_v20  ;;  %v2920_v57 = vrot.slane %v7363_v22, 5  ;;  %v2816_v22 = vsel %vm6691_vm7, %v5340_v37, %v2815_v46  ;;  %v6170_v38 = vld [vmem:[%s6361_s9 + $0x30] sm:$0xff]  }
  0xdb   : > { %5923 = vmatmul.mubr.msk.bf16.gmra.mxu0 %vm701_vm3, %v7451_v42  ;;  %v7624_v56 = vsel %vm6691_vm7, %v2894_v58, %v2895_v53  ;;  %v7637_v42 = vsel %vm6691_vm7, %v2901_v6, %v2902_v51  ;;  %v2916_v53 = vrot.slane %v7354_v4, 5  ;;  %v2915_v58 = vrot.slane %v2913_v60, 4 }
  0xdc   : > { %5926 = vmatprep.mubr.msk.bf16.mxu0 %vm701_vm3, %v7457_v15  ;;  %v7648_v15 = vsel %vm6691_vm7, %v5354_v26, %v2913_v60  ;;  %v2923_v51 = vrot.slane %v7375_v45, 5  ;;  %v5325_v45 = vld [vmem:[%s6361_s9 + $0x18] sm:$0xe]  ;;  %v7688_v9 = vsel %vm6691_vm7, %v5355_v63, %v2920_v57  ;;  %v2922_v46 = vrot.slane %v2920_v57, 4  ;;  %v6169_v26 = vld [vmem:[%s6361_s9 + $0x24] sm:$0xff]  }
  0xdd   : > { %v7676_v32 = vsel %vm6691_vm7, %v2915_v58, %v2916_v53  ;;  %v5341_v37 = vrot.slane %v5325_v45, 9  ;;  %v5357_v34 = vcombine.low %v2816_v22, %v2819_v39  ;;  %v9145_v60 = vld [vmem:[#allocation12_spill] sm:$0xff] }
  0xde   : > { %5889 = vmatmul.mubr.msk.bf16.gmra.mxu1 %vm701_vm3, %v6165_v19  ;;  %v5307_v19 = vcombine.low %v2444_v16, %v2454_v21  ;;  %v7693_v47 = vsel %vm6691_vm7, %v2922_v46, %v2923_v51  ;;  %v2825_v21 = vrot.slane %v6185_v44, 5  ;;  %v4579_v53 = vsel %vm750_vm0, %v9145_v60, 0  ;;  %v5454_v63 = vld [vmem:[%s6361_s9 + $0x18] sm:$0xf]  ;;  %v5455_v57 = vld [vmem:[%s6361_s9 + $0x1c] sm:$0xf] }
  0xdf   : > { %5892 = vmatprep.mubr.msk.bf16.mxu1 %vm701_vm3, %v6166_v27  ;;  %v6184_v27 = vld [vmem:[%s6361_s9 + $0x1c] sm:$0xf]  ;;  %v5457_v51 = vld [vmem:[%s6361_s9 + $0x24] sm:$0xf]  ;;  %v3627_v45 = vshrl.u32 %v5454_v63, 16  ;;  %v3636_v39 = vshll.u32 %v5455_v57, 16 }
  0xe0   : > { %v2822_v36 = vrot.slane %v6184_v27, 5  ;;  %v3630_v27 = vshll.u32 %v5454_v63, 16  ;;  %v3651_v46 = vshrl.u32 %v5457_v51, 16  ;;  %v6172_v44 = vld [vmem:[%s6361_s9 + $0x48] sm:$0xff]   ;;  %v5535_v60 = vld [vmem:[%s6361_s9 + $0x18] sm:$0xe] }
  0xe1   : > { %v7734_v63 = vld [vmem:[%s6361_s9 + $0x2c] sm:$0x1] }
  0xe2   : > { %v2824_v16 = vrot.slane %v2822_v36, 4  ;;  %v2823_v17 = vsel %vm6691_vm7, %v5341_v37, %v2822_v36  ;;  %v7718_v36 = vld [vmem:[%s6361_s9 + $0x28] sm:$0xf]  ;;  %v6171_v37 = vld [vmem:[%s6361_s9 + $0x3c] sm:$0xff]   ;;  %v3653_v18 = vrot.slane %v3651_v46, 4 }
  0xe3   : > { %5927 = vmatmul.mubr.msk.bf16.gmra.mxu0 %vm701_vm3, %v5307_v19  ;;  %v9146_v19 = vld [vmem:[#allocation14_spill] sm:$0xff] }
  0xe4   : > { %5966 = vmatprep.mubr.msk.bf16.mxu0 %vm701_vm3, %v6168_v49  ;;  %v2826_v20 = vsel %vm6691_vm7, %v2824_v16, %v2825_v21  ;;  %v4109_v22 = vsel %vm750_vm0, %v9146_v19, 0  ;;  %v3640_v49 = vshrl.u32 %v5455_v57, 16  ;;  %v3664_v16 = vshrl.u32 %v7718_v36, 16  ;;  %v5456_v21 = vld [vmem:[%s6361_s9 + $0x20] sm:$0x1] }
  0xe5   : > { %v5358_v58 = vcombine.low %v2823_v17, %v2826_v20  ;;  %v3629_v17 = vrot.slane %v3627_v45, 4  ;;  %v3632_v20 = vrot.slane %v3630_v27, 5  ;;  %v5460_v19 = vld [vmem:[%s6361_s9 + $0x30] sm:$0xf]  ;;  %v3646_v45 = vshll.u32 %v5456_v21, 16 }
  0xe6   : > { %5893 = vmatmul.mubr.msk.bf16.gmra.mxu1 %vm701_vm3, %v6167_v52  ;;  %v3654_v52 = vshll.u32 %v5457_v51, 16  ;;  %v3666_v51 = vrot.slane %v3664_v16, 4  ;;  %v5551_v27 = vrot.slane %v5535_v60, 9  ;;  %v4373_v46 = vrot.slane %v5456_v21, 5  ;;  %v5536_v16 = vld [vmem:[%s6361_s9 + $0x24] sm:$0xe] }
  0xe7   : > { %5932 = vmatprep.mubr.msk.bf16.mxu1 %vm701_vm3, %v5357_v34  ;;  %v3660_v34 = vshll.u32 %v7718_v36, 16  ;;  %v6173_v21 = vld [vmem:[%s6361_s9 + $0x54] sm:$0xff]   ;;  %v3678_v10 = vshll.u32 %v5460_v19, 16  ;;  %v6174_v60 = vld [vmem:[%s6361_s9 + $0x60] sm:$0xff]  }
  0xe8   : > { %v3656_v11 = vrot.slane %v3654_v52, 5  ;;  %v3670_v52 = vshll.u32 %v7734_v63, 16 }
  0xeb   : > { %5967 = vmatmul.mubr.msk.bf16.vlgmr.msra.gmra.mxu0 %vm701_vm3, %v6169_v26  ;;  %v7730_v26 = vrot.slane %v3636_v39, 5 }
  0xec   : > { %6033 = vmatpush3.bf16.msra.mxu0 %v4579_v53  ;;  %5970 = vmatprep.mubr.msk.bf16.mxu0 %vm701_vm3, %v6170_v38  ;;  %v3642_v38 = vrot.slane %v3640_v49, 4  ;;  %v4370_v53 = vrot.slane %v5455_v57, 5  ;;  %v7744_v57 = vld [vmem:[%s6361_s9 + $0x34] sm:$0xf] }
  0xee   : > { %5933 = vmatmul.mubr.msk.bf16.vlgmr.msra.gmra.mxu1 %vm701_vm3, %v5358_v58  ;;  %v7739_v58 = vrot.slane %v3660_v34, 5  ;;  %v3643_v39 = vor.u32 %v3642_v38, %v7730_v26  ;;  %v4372_v49 = vrot.slane %v4370_v53, 4  ;;  %v3657_v34 = vor.u32 %v3656_v11, %v3653_v18 }
  0xef   : > { %5999 = vmatpush3.bf16.msra.mxu1 %v4109_v22  ;;  %5936 = vmatprep.mubr.msk.bf16.mxu1 %vm701_vm3, %v5359_v5  ;;  %v7737_v5 = vpop.f32.mrf.mxu0  ;;  %v3633_v22 = vor.u32 %v3632_v20, %v3629_v17  ;;  %v3675_v17 = vshrl.u32 %v5460_v19, 16  ;;  %v3688_v38 = vshrl.u32 %v7744_v57, 16  ;;  %v7769_v61 = vsel %vm6691_vm7, %v5551_v27, %v4370_v53  ;;  %v5463_v19 = vld [vmem:[%s6361_s9 + $0x3c] sm:$0xf] }
  0xf0   : > { %v3667_v41 = vor.u32 %v3666_v51, %v7739_v58  ;;  %v3644_v8 = vrot.slane %v3643_v39, 4  ;;  %v3672_v11 = vrot.slane %v3670_v52, 5  ;;  %v5552_v51 = vrot.slane %v5536_v16, 9  ;;  %v7783_v39 = vld [vmem:[%s6361_s9 + $0x38] sm:$0x1] }
  0xf1   : > { %v7761_v20 = vpop.f32.mrf.mxu0  ;;  %v3634_v18 = vrot.slane %v3633_v22, 4  ;;  %v3658_v12 = vrot.slane %v3657_v34, 4  ;;  %v4380_v22 = vrot.slane %v7734_v63, 5  ;;  %v3690_v52 = vrot.slane %v3688_v38, 4 }
  0xf2   : > { %v3668_v27 = vrot.slane %v3667_v41, 4  ;;  %v3699_v34 = vshrl.u32 %v5463_v19, 16  ;;  %v3702_v16 = vshll.u32 %v5463_v19, 16  ;;  %v7796_v41 = vld [vmem:[%s6361_s9 + $0x40] sm:$0xf] }
  0xf3   : > { %5971 = vmatmul.mubr.msk.bf16.gmra.mxu0 %vm701_vm3, %v6171_v37  ;;  %v7780_v53 = vpop.f32.mrf.mxu0  ;;  %v3639_v63 = vsel %vm6405_vm4, %v3634_v18, %v7730_v26  ;;  %v3663_v26 = vsel %vm6405_vm4, %v3658_v12, %v7739_v58  ;;  %v5537_v18 = vld [vmem:[%s6361_s9 + $0x30] sm:$0xe]  ;;  %v3708_v24 = vshll.u32 %v7796_v41, 16  ;;  %v3712_v33 = vshrl.u32 %v7796_v41, 16 }
  0xf4   : > { %5974 = vmatprep.mubr.msk.bf16.mxu0 %vm701_vm3, %v6172_v44  ;;  %v7752_v37 = vpop.f32.mrf.mxu1  ;;  %v4377_v44 = vrot.slane %v7718_v36, 5  ;;  %v3648_v36 = vrot.slane %v3646_v45, 5  ;;  %v3677_v45 = vrot.slane %v3675_v17, 4  ;;  %v3673_v58 = vsel %vm6405_vm4, %v3668_v27, %v3672_v11 }
  0xf5   : > { %9147 = vst [vmem:[#allocation7_spill] sm:$0xff] %v7752_v37  ;;  %v7825_v12 = vpop.f32.mrf.mxu0  ;;  %v3704_v19 = vrot.slane %v3702_v16, 5  ;;  %v3736_v11 = vshrl.u32 %v7818_v7, 16 }
  0xf6   : > { %5937 = vmatmul.mubr.msk.bf16.gmra.mxu1 %vm701_vm3, %v5360_v48  ;;  %v3684_v48 = vshll.u32 %v7744_v57, 16  ;;  %v7776_v6 = vpop.f32.mrf.mxu1  ;;  %v4379_v4 = vrot.slane %v4377_v44, 4  ;;  %v3649_v17 = vsel %vm6405_vm4, %v3644_v8, %v3648_v36  ;;  %v4384_v36 = vrot.slane %v7744_v57, 5  ;;  %v6176_v8 = vld [vmem:[%s6361_s9 + $0x78] sm:$0xff]  }
  0xf7   : > { %5940 = vmatprep.mubr.msk.bf16.mxu1 %vm701_vm3, %v5361_v40  ;;  %v7773_v40 = vsel %vm6691_vm7, %v4372_v49, %v4373_v46  ;;  %9148 = vst [vmem:[#allocation6_spill] sm:$0xff] %v7776_v6  ;;  %v3680_v49 = vrot.slane %v3678_v10, 5  ;;  %v7839_v27 = vcombine.low %v3639_v63, %v3649_v17  ;;  %v7841_v57 = vcombine.low %v3663_v26, %v3673_v58  ;;  %v7855_v17 = vld [vmem:[%s6361_s9 + $0x58] sm:$0xf]  ;;  %v7861_v58 = vld [vmem:[%s6361_s9 + $0x44] sm:$0x1] }
  0xf8   : > { %v7785_v46 = vrot.slane %v3684_v48, 5  ;;  %v7802_v10 = vpop.f32.mrf.mxu1  ;;  %v7809_v48 = vsel %vm6691_vm7, %v5552_v51, %v4377_v44  ;;  %v7813_v38 = vsel %vm6691_vm7, %v4379_v4, %v4380_v22  ;;  %v3701_v51 = vrot.slane %v3699_v34, 4  ;;  %v5469_v34 = vld [vmem:[%s6361_s9 + $0x54] sm:$0xf] }
  0xf9   : > { %9149 = vst [vmem:[#allocation9_spill] sm:$0xff] %v7802_v10  ;;  %v3681_v44 = vor.u32 %v3680_v49, %v3677_v45  ;;  %v3726_v22 = vshll.u32 %v5466_v3, 16  ;;  %v4386_v13 = vrot.slane %v4384_v36, 4  ;;  %v4387_v63 = vrot.slane %v7783_v39, 5  ;;  %v5538_v49 = vld [vmem:[%s6361_s9 + $0x3c] sm:$0xe] }
  0xfa   : > { %v3691_v4 = vor.u32 %v3690_v52, %v7785_v46  ;;  %v7837_v45 = vpop.f32.mrf.mxu1  ;;  %v5553_v52 = vrot.slane %v5537_v18, 9  ;;  %v3705_v18 = vor.u32 %v3704_v19, %v3701_v51  ;;  %v9152_v6 = vcombine.low %v7550_v28, %v7566_v1 }
  0xfb   : > { %5975 = vmatmul.mubr.msk.bf16.gmra.mxu0 %vm701_vm3, %v6173_v21  ;;  %v3732_v21 = vshll.u32 %v7818_v7, 16  ;;  %9150 = vst [vmem:[#allocation8_spill] sm:$0xff] %v7837_v45  ;;  %v3728_v45 = vrot.slane %v3726_v22, 5  ;;  %v3747_v51 = vshrl.u32 %v5469_v34, 16  ;;  %v3750_v19 = vshll.u32 %v5469_v34, 16 }
  0xfc   : > { %5978 = vmatprep.mubr.msk.bf16.mxu0 %vm701_vm3, %v6174_v60  ;;  %v3694_v60 = vshll.u32 %v7783_v39, 16  ;;  %v7858_v26 = vrot.slane %v3691_v4, 4  ;;  %v3738_v39 = vrot.slane %v3736_v11, 4  ;;  %v7896_v22 = vsel %vm6691_vm7, %v4386_v13, %v4387_v63 }
  0xfd   : > { %v7866_v10 = vrot.slane %v3732_v21, 5  ;;  %v9154_v21 = vcombine.low %v7559_v25, %v7578_v14  ;;  %v4391_v25 = vrot.slane %v7796_v41, 5  ;;  %v6178_v14 = vld [vmem:[%s6361_s9 + $0x90] sm:$0xff]   ;;  %v5554_v1 = vrot.slane %v5538_v49, 9  ;;  %v5472_v41 = vld [vmem:[%s6361_s9 + $0x60] sm:$0xf] }
  0xfe   : > { %5941 = vmatmul.mubr.msk.bf16.gmra.mxu1 %vm701_vm3, %v5362_v35  ;;  %v6175_v35 = vld [vmem:[%s6361_s9 + $0x6c] sm:$0xff]   ;;  %v7851_v62 = vrot.slane %v3694_v60, 5  ;;  %v3749_v37 = vrot.slane %v3747_v51, 4 }
  0xff   : > { %5944 = vmatprep.mubr.msk.bf16.mxu1 %vm701_vm3, %v5363_v23  ;;  %v3723_v23 = vshrl.u32 %v5466_v3, 16  ;;  %v7849_v3 = vrot.slane %v3681_v44, 4  ;;  %v3714_v44 = vrot.slane %v3712_v33, 4  ;;  %v3760_v33 = vshrl.u32 %v7855_v17, 16 }
 0x100   : > { %v7847_v16 = vpop.f32.mrf.mxu0  ;;  %v3739_v13 = vor.u32 %v3738_v39, %v7866_v10  ;;  %v4398_v39 = vrot.slane %v7818_v7, 5  ;;  %v9158_v7 = vcombine.low %v7570_v43, %v7587_v2  ;;  %v9160_v43 = vcombine.low %v7591_v59, %v7601_v50  ;;  %v6179_v2 = vld [vmem:[%s6361_s9 + $0x9c] sm:$0xff]  }
 0x101   : > { %9151 = vst [vmem:[#allocation11_spill] sm:$0xff] %v7847_v16  ;;  %v3725_v60 = vrot.slane %v3723_v23, 4  ;;  %v6177_v23 = vld [vmem:[%s6361_s9 + $0x84] sm:$0xff]   ;;  %v7923_v16 = vld [vmem:[%s6361_s9 + $0x5c] sm:$0x1]  ;;  %v4405_v59 = vrot.slane %v7855_v17, 5 }
 0x102   : > { %v7884_v28 = vpop.f32.mrf.mxu0 }
 0x103   : > { %5979 = vmatmul.mubr.msk.bf16.gmra.mxu0 %vm701_vm3, %v6175_v35  ;;  %v7863_v35 = vrot.slane %v3708_v24, 5  ;;  %v3756_v24 = vshll.u32 %v7855_v17, 16  ;;  %9155 = vst [vmem:[#allocation15_spill] sm:$0xff] %v7884_v28  ;;  %v3752_v28 = vrot.slane %v3750_v19, 5 }
 0x104   : > { %5982 = vmatprep.mubr.msk.bf16.mxu0 %vm701_vm3, %v6176_v8  ;;  %v7872_v4 = vpop.f32.mrf.mxu1  ;;  %v7875_v8 = vld [vmem:[%s6361_s9 + $0x50] sm:$0x1]  ;;  %v7916_v49 = vpop.f32.mrf.mxu0 }
 0x105   : > { %9153 = vst [vmem:[#allocation10_spill] sm:$0xff] %v7872_v4  ;;  %v3715_v34 = vor.u32 %v3714_v44, %v7863_v35  ;;  %v7906_v4 = vrot.slane %v3705_v18, 4  ;;  %v7913_v11 = vrot.slane %v3756_v24, 5  ;;  %v3762_v44 = vrot.slane %v3760_v33, 4  ;;  %9157 = vst [vmem:[#allocation5_spill] sm:$0xff] %v7916_v49 }
 0x106   : > { %5945 = vmatmul.mubr.msk.bf16.gmra.mxu1 %vm701_vm3, %v9152_v6  ;;  %v7892_v6 = vsel %vm6691_vm7, %v5553_v52, %v4384_v36  ;;  %v3729_v36 = vor.u32 %v3728_v45, %v3725_v60  ;;  %v3742_v52 = vshll.u32 %v7875_v8, 16  ;;  %v7911_v63 = vpop.f32.mrf.mxu1  ;;  %v4393_v18 = vrot.slane %v4391_v25, 4  ;;  %v5539_v24 = vld [vmem:[%s6361_s9 + $0x48] sm:$0xe] }
 0x107   : > { %5948 = vmatprep.mubr.msk.bf16.mxu1 %vm701_vm3, %v9154_v21  ;;  %v3718_v21 = vshll.u32 %v7861_v58, 16  ;;  %9156 = vst [vmem:[#allocation13_spill] sm:$0xff] %v7911_v63  ;;  %v4394_v60 = vrot.slane %v7861_v58, 5  ;;  %v3716_v51 = vrot.slane %v3715_v34, 4  ;;  %v3771_v33 = vshrl.u32 %v5472_v41, 16 }
 0x108   : > { %v7929_v63 = vsel %vm6691_vm7, %v5554_v1, %v4391_v25  ;;  %v3730_v45 = vrot.slane %v3729_v36, 4  ;;  %v3740_v49 = vrot.slane %v3739_v13, 4  ;;  %v3744_v58 = vrot.slane %v3742_v52, 5  ;;  %v7944_v36 = vld [vmem:[%s6361_s9 + $0x64] sm:$0xf]  ;;  %v7951_v13 = vpop.f32.mrf.mxu0 }
 0x109   : > { %v3720_v19 = vrot.slane %v3718_v21, 5  ;;  %v3711_v34 = vsel %vm6405_vm4, %v7906_v4, %v7863_v35  ;;  %v3753_v21 = vor.u32 %v3752_v28, %v3749_v37  ;;  %v3763_v1 = vor.u32 %v3762_v44, %v7913_v11  ;;  %9161 = vst [vmem:[#allocation17_spill] sm:$0xff] %v7951_v13  ;;  %v5540_v28 = vld [vmem:[%s6361_s9 + $0x54] sm:$0xe]  ;;  %v6183_v13 = vld [vmem:[%s6361_s9 + $0xcc] sm:$0xff]  }
 0x10a   : > { %v3766_v25 = vshll.u32 %v7923_v16, 16  ;;  %v7955_v52 = vsel %vm6691_vm7, %v4393_v18, %v4394_v60  ;;  %v5555_v35 = vrot.slane %v5539_v24, 9  ;;  %v4400_v37 = vrot.slane %v4398_v39, 4 }
 0x10b   : > { %5983 = vmatmul.mubr.msk.bf16.gmra.mxu0 %vm701_vm3, %v6177_v23  ;;  %v3774_v23 = vshll.u32 %v5472_v41, 16  ;;  %v4401_v4 = vrot.slane %v7875_v8, 5  ;;  %v6180_v41 = vld [vmem:[%s6361_s9 + $0xa8] sm:$0xff]   ;;  %v3721_v44 = vsel %vm6405_vm4, %v3716_v51, %v3720_v19  ;;  %v3773_v50 = vrot.slane %v3771_v33, 4 }
 0x10c   : > { %5986 = vmatprep.mubr.msk.bf16.mxu0 %vm701_vm3, %v6178_v14  ;;  %v7935_v14 = vpop.f32.mrf.mxu1  ;;  %v3745_v18 = vsel %vm6405_vm4, %v3740_v49, %v3744_v58  ;;  %v3780_v60 = vshll.u32 %v7944_v36, 16  ;;  %v3784_v8 = vshrl.u32 %v7944_v36, 16  ;;  %v3764_v51 = vrot.slane %v3763_v1, 4  ;;  %v7973_v33 = vld [vmem:[%s6361_s9 + $0x68] sm:$0x1] }
 0x10d   : > { %9159 = vst [vmem:[#allocation16_spill] sm:$0xff] %v7935_v14  ;;  %v3754_v14 = vrot.slane %v3753_v21, 4  ;;  %v3768_v17 = vrot.slane %v3766_v25, 5  ;;  %v5556_v19 = vrot.slane %v5540_v28, 9  ;;  %v9164_v49 = vsel %vm6405_vm4, %v7858_v26, %v7851_v62  ;;  %v5475_v25 = vld [vmem:[%s6361_s9 + $0x6c] sm:$0xf] }
 0x10e   : > { %5949 = vmatmul.mubr.msk.bf16.gmra.mxu1 %vm701_vm3, %v9158_v7  ;;  %v3776_v7 = vrot.slane %v3774_v23, 5  ;;  %v7970_v24 = vpop.f32.mrf.mxu1  ;;  %v7994_v21 = vsel %vm6691_vm7, %v5555_v35, %v4398_v39  ;;  %v7998_v1 = vsel %vm6691_vm7, %v4400_v37, %v4401_v4  ;;  %v8001_v62 = vcombine.low %v3711_v34, %v3721_v44  ;;  %v5541_v4 = vld [vmem:[%s6361_s9 + $0x60] sm:$0xe]  ;;  %v5481_v44 = vld [vmem:[%s6361_s9 + $0x84] sm:$0xf] }
 0x10f   : > { %5952 = vmatprep.mubr.msk.bf16.mxu1 %vm701_vm3, %v9160_v43  ;;  %v3735_v43 = vsel %vm6405_vm4, %v3730_v45, %v7866_v10  ;;  %9162 = vst [vmem:[#allocation18_spill] sm:$0xff] %v7970_v24  ;;  %v9165_v45 = vsel %vm6405_vm4, %v7849_v3, %v7785_v46  ;;  %v4407_v46 = vrot.slane %v4405_v59, 4  ;;  %v4408_v3 = vrot.slane %v7923_v16, 5 }
 0x110   : > { %v7988_v23 = vcombine.low %v9165_v45, %v9164_v49  ;;  %9166 = vst [vmem:[#allocation14_spill] sm:$0xff] %v8001_v62  ;;  %v3777_v26 = vor.u32 %v3776_v7, %v3773_v50  ;;  %v8008_v28 = vcombine.low %v3735_v43, %v3745_v18  ;;  %v8010_v39 = vrot.slane %v3780_v60, 5 }
 0x111   : > { %v7976_v10 = vpop.f32.mrf.mxu0  ;;  %v8012_v35 = vrot.slane %v3784_v8, 4  ;;  %v3790_v37 = vshll.u32 %v7973_v33, 16  ;;  %v9168_v34 = vcombine.low %v7609_v54, %v7624_v56  ;;  %v3759_v50 = vsel %vm6405_vm4, %v3754_v14, %v7913_v11  ;;  %v5478_v54 = vld [vmem:[%s6361_s9 + $0x78] sm:$0xf] }
 0x112   : > { %9163 = vst [vmem:[#allocation12_spill] sm:$0xff] %v7976_v10  ;;  %9167 = vst [vmem:[#allocation19_spill] sm:$0xff] %v8008_v28  ;;  %v3769_v7 = vsel %vm6405_vm4, %v3764_v51, %v3768_v17  ;;  %v8032_v43 = vsel %vm6691_vm7, %v5556_v19, %v4405_v59  ;;  %v9170_v56 = vcombine.low %v7616_v29, %v7637_v42  ;;  %v3795_v60 = vshrl.u32 %v5475_v25, 16  ;;  %v8044_v51 = vld [vmem:[%s6361_s9 + $0x7c] sm:$0xf]  ;;  %v6182_v59 = vld [vmem:[%s6361_s9 + $0xc0] sm:$0xff]  }
 0x113   : > { %5987 = vmatmul.mubr.msk.bf16.gmra.mxu0 %vm701_vm3, %v6179_v2  ;;  %v8006_v2 = vld [vmem:[%s6361_s9 + $0x70] sm:$0xf]  ;;  %v8039_v18 = vpop.f32.mrf.mxu0  ;;  %v3798_v8 = vshll.u32 %v5475_v25, 16  ;;  %v8049_v17 = vsel %vm6691_vm7, %v4407_v46, %v4408_v3  ;;  %v8051_v29 = vrot.slane %v3777_v26, 4  ;;  %v5557_v42 = vrot.slane %v5541_v4, 9 }
 0x114   : > { %5990 = vmatprep.mubr.msk.bf16.mxu0 %vm701_vm3, %v6180_v41  ;;  %v6181_v41 = vld [vmem:[%s6361_s9 + $0xb4] sm:$0xff]   ;;  %9171 = vst [vmem:[#allocation21_spill] sm:$0xff] %v8039_v18  ;;  %v3804_v11 = vshll.u32 %v8006_v2, 16  ;;  %v3808_v14 = vshrl.u32 %v8006_v2, 16  ;;  %v4412_v19 = vrot.slane %v7944_v36, 5  ;;  %v8054_v49 = vcombine.low %v3759_v50, %v3769_v7 }
 0x115   : > { %v3787_v45 = vor.u32 %v8012_v35, %v8010_v39  ;;  %v8058_v25 = vrot.slane %v3790_v37, 5  ;;  %v3819_v46 = vshrl.u32 %v5478_v54, 16  ;;  %v3822_v3 = vshll.u32 %v5478_v54, 16  ;;  %v8070_v4 = vld [vmem:[%s6361_s9 + $0x88] sm:$0xf]  ;;  %v8073_v35 = vpop.f32.mrf.mxu0 }
 0x116   : > { %5953 = vmatmul.mubr.msk.bf16.gmra.mxu1 %vm701_vm3, %v9168_v34  ;;  %v8020_v16 = vpop.f32.mrf.mxu1  ;;  %9172 = vst [vmem:[#allocation22_spill] sm:$0xff] %v8054_v49  ;;  %v4415_v34 = vrot.slane %v7973_v33, 5  ;;  %v3828_v36 = vshll.u32 %v8044_v51, 16  ;;  %v3832_v26 = vshrl.u32 %v8044_v51, 16  ;;  %9174 = vst [vmem:[#allocation24_spill] sm:$0xff] %v8073_v35  ;;  %v3797_v33 = vrot.slane %v3795_v60, 4 }
 0x117   : > { %9169 = vst [vmem:[#allocation20_spill] sm:$0xff] %v8020_v16  ;;  %5956 = vmatprep.mubr.msk.bf16.mxu1 %vm701_vm3, %v9170_v56  ;;  %v8062_v56 = vld [vmem:[%s6361_s9 + $0x74] sm:$0x1]  ;;  %v3800_v37 = vrot.slane %v3798_v8, 5  ;;  %v8075_v50 = vrot.slane %v3804_v11, 5  ;;  %v3810_v7 = vrot.slane %v3808_v14, 4  ;;  %v9175_v54 = vcombine.low %v7628_v30, %v7644_v55  ;;  %v8103_v49 = vpop.f32.mrf.mxu0 }
 0x118   : > { %v8065_v58 = vpop.f32.mrf.mxu1  ;;  %v4414_v16 = vrot.slane %v4412_v19, 4  ;;  %v8088_v60 = vld [vmem:[%s6361_s9 + $0x80] sm:$0x1]  ;;  %v8091_v8 = vld [vmem:[%s6361_s9 + $0x6c] sm:$0xe]  ;;  %v3843_v11 = vshrl.u32 %v5481_v44, 16 }
 0x119   : > { %9173 = vst [vmem:[#allocation23_spill] sm:$0xff] %v8065_v58  ;;  %v8084_v58 = vsel %vm6691_vm7, %v5557_v42, %v4412_v19  ;;  %v3846_v14 = vshll.u32 %v5481_v44, 16  ;;  %v3856_v24 = vshrl.u32 %v8070_v4, 16  ;;  %v3821_v19 = vrot.slane %v3819_v46, 4  ;;  %9177 = vst [vmem:[#allocation26_spill] sm:$0xff] %v8103_v49 }
 0x11a   : > { %v8099_v42 = vpop.f32.mrf.mxu1  ;;  %v3824_v35 = vrot.slane %v3822_v3, 5  ;;  %v8101_v18 = vrot.slane %v3828_v36, 5  ;;  %v3834_v10 = vrot.slane %v3832_v26, 4  ;;  %v9178_v44 = vcombine.low %v7648_v15, %v7676_v32  ;;  %v8122_v32 = vld [vmem:[%s6361_s9 + $0x8c] sm:$0x1] }
 0x11b   : > { %5991 = vmatmul.mubr.msk.bf16.gmra.mxu0 %vm701_vm3, %v6181_v41  ;;  %v3814_v41 = vshll.u32 %v8062_v56, 16  ;;  %9176 = vst [vmem:[#allocation25_spill] sm:$0xff] %v8099_v42  ;;  %v3801_v30 = vor.u32 %v3800_v37, %v3797_v33  ;;  %v3811_v55 = vor.u32 %v3810_v7, %v8075_v50  ;;  %v3838_v46 = vshll.u32 %v8088_v60, 16  ;;  %v5543_v33 = vld [vmem:[%s6361_s9 + $0x78] sm:$0xe] }
 0x11c   : > { %5994 = vmatprep.mubr.msk.bf16.mxu0 %vm701_vm3, %v6182_v59  ;;  %v3852_v59 = vshll.u32 %v8070_v4, 16  ;;  %v8113_v3 = vrot.slane %v3787_v45, 4  ;;  %v8117_v36 = vsel %vm6691_vm7, %v4414_v16, %v4415_v34  ;;  %v5558_v26 = vrot.slane %v8091_v8, 9  ;;  %v8127_v42 = vpop.f32.mrf.mxu1  ;;  %v5484_v8 = vld [vmem:[%s6361_s9 + $0x90] sm:$0xf] }
 0x11d   : > { %v4426_v15 = vrot.slane %v8044_v51, 5  ;;  %v3845_v37 = vrot.slane %v3843_v11, 4  ;;  %v3848_v7 = vrot.slane %v3846_v14, 5  ;;  %9179 = vst [vmem:[#allocation27_spill] sm:$0xff] %v8127_v42  ;;  %v3816_v45 = vrot.slane %v3814_v41, 5 }
 0x11e   : > { %5957 = vmatmul.mubr.msk.bf16.gmra.mxu1 %vm701_vm3, %v9175_v54  ;;  %v4419_v54 = vrot.slane %v8006_v2, 5  ;;  %v8125_v2 = vrot.slane %v3852_v59, 5  ;;  %v4422_v49 = vrot.slane %v8062_v56, 5  ;;  %v3825_v16 = vor.u32 %v3824_v35, %v3821_v19  ;;  %v8136_v59 = vld [vmem:[%s6361_s9 + $0x94] sm:$0xf] }
 0x11f   : > { %5960 = vmatprep.mubr.msk.bf16.mxu1 %vm701_vm3, %v9178_v44  ;;  %v3858_v44 = vrot.slane %v3856_v24, 4  ;;  %v3835_v34 = vor.u32 %v3834_v10, %v8101_v18  ;;  %v3802_v51 = vrot.slane %v3801_v30, 4  ;;  %v3812_v11 = vrot.slane %v3811_v55, 4 }
 0x120   : > { %v4421_v62 = vrot.slane %v4419_v54, 4  ;;  %v3840_v14 = vrot.slane %v3838_v46, 5  ;;  %v9180_v24 = vcombine.low %v7769_v61, %v7773_v40  ;;  %v5559_v56 = vrot.slane %v5543_v33, 9 }
 0x121   : > { %v4428_v35 = vrot.slane %v4426_v15, 4  ;;  %v4429_v10 = vrot.slane %v8088_v60, 5  ;;  %v3862_v41 = vshll.u32 %v8122_v32, 16  ;;  %v3859_v30 = vor.u32 %v3858_v44, %v8125_v2 }
 0x122   : > { %v3867_v55 = vshrl.u32 %v5484_v8, 16  ;;  %v3870_v46 = vshll.u32 %v5484_v8, 16  ;;  %v9182_v61 = vcombine.low %v7688_v9, %v7693_v47  ;;  %v3826_v40 = vrot.slane %v3825_v16, 4 }
 0x123   : > { %v8132_v28 = vpop.f32.mrf.mxu0  ;;  %5995 = vmatmul.mubr.msk.bf16.gmra.mxu0 %vm701_vm3, %v6183_v13  ;;  %v3849_v13 = vor.u32 %v3848_v7, %v3845_v37  ;;  %v3836_v33 = vrot.slane %v3835_v34, 4  ;;  %v3876_v60 = vshll.u32 %v8136_v59, 16  ;;  %v3793_v37 = vsel %vm6405_vm4, %v8113_v3, %v8058_v25 }
 0x124   : > { %6034 = vmatprep.mubr.msk.bf16.mxu0 %vm701_vm3, %v9180_v24  ;;  %v3880_v24 = vshrl.u32 %v8136_v59, 16  ;;  %v3807_v9 = vsel %vm6405_vm4, %v3802_v51, %v8075_v50  ;;  %v8168_v47 = vsel %vm6691_vm7, %v5558_v26, %v4419_v54  ;;  %v8172_v7 = vsel %vm6691_vm7, %v4421_v62, %v4422_v49  ;;  %v5544_v54 = vld [vmem:[%s6361_s9 + $0x84] sm:$0xe]  ;;  %v9221_v31 = vld [vmem:[#allocation27_spill] sm:$0xff] }
 0x125   : > { %v8144_v19 = vpop.f32.mrf.mxu0  ;;  %v8180_v25 = vsel %vm6691_vm7, %v5559_v56, %v4426_v15  ;;  %v8184_v50 = vsel %vm6691_vm7, %v4428_v35, %v4429_v10  ;;  %v3864_v3 = vrot.slane %v3862_v41, 5  ;;  %v3850_v62 = vrot.slane %v3849_v13, 4  ;;  %v8208_v13 = vld [vmem:[%s6361_s9 + $0x98] sm:$0x1] }
 0x126   : > { %9181 = vst [vmem:[#allocation28_spill] sm:$0xff] %v8144_v19  ;;  %v8147_v42 = vpop.f32.mrf.mxu1  ;;  %5961 = vmatmul.mubr.msk.bf16.gmra.mxu1 %vm701_vm3, %v9182_v61  ;;  %v3860_v49 = vrot.slane %v3859_v30, 4  ;;  %v3869_v16 = vrot.slane %v3867_v55, 4  ;;  %v3872_v34 = vrot.slane %v3870_v46, 5  ;;  %v3831_v15 = vsel %vm6405_vm4, %v3826_v40, %v8101_v18  ;;  %v5487_v30 = vld [vmem:[%s6361_s9 + $0x9c] sm:$0xf] }
 0x127   : > { %v8155_v19 = vpop.f32.mrf.mxu0  ;;  %6000 = vmatprep.mubr.msk.bf16.mxu1 %vm701_vm3, %v7839_v27  ;;  %v3817_v27 = vsel %vm6405_vm4, %v3812_v11, %v3816_v45  ;;  %v3841_v45 = vsel %vm6405_vm4, %v3836_v33, %v3840_v14  ;;  %v8196_v51 = vrot.slane %v3876_v60, 5  ;;  %v3882_v11 = vrot.slane %v3880_v24, 4  ;;  %v8239_v24 = vld [vmem:[%s6361_s9 + $0xa0] sm:$0xf] }
 0x128   : > { %v8174_v44 = vpop.f32.mrf.mxu1  ;;  %v9183_v35 = vcombine.low %v7809_v48, %v7813_v38  ;;  %v5573_v10 = vcombine.low %v8032_v43, %v8049_v17  ;;  %v5574_v41 = vcombine.low %v8084_v58, %v8117_v36  ;;  %v5560_v18 = vrot.slane %v5544_v54, 9 }
 0x129   : > { %v8187_v26 = vpop.f32.mrf.mxu0  ;;  %v4433_v14 = vrot.slane %v8070_v4, 5  ;;  %v9184_v48 = vcombine.low %v7892_v6, %v7896_v22  ;;  %v9185_v38 = vsel %vm6405_vm4, %v8051_v29, %v8010_v39  ;;  %v8224_v61 = vcombine.low %v3807_v9, %v3817_v27  ;;  %v5545_v29 = vld [vmem:[%s6361_s9 + $0x90] sm:$0xe]  ;;  %v9192_v4 = vld [vmem:[#allocation5_spill] sm:$0xff] }
 0x12a   : > { %v8189_v8 = vpop.f32.mrf.mxu1  ;;  %v8222_v46 = vcombine.low %v9185_v38, %v3793_v37  ;;  %v8230_v60 = vcombine.low %v3831_v15, %v3841_v45  ;;  %v3855_v6 = vsel %vm6405_vm4, %v3850_v62, %v8125_v2  ;;  %v3865_v22 = vsel %vm6405_vm4, %v3860_v49, %v3864_v3 }
 0x12b   : > { %v5832_v56 = vpop.f32.mrf.mxu0  ;;  %6035 = vmatmul.mubr.msk.bf16.vlgmr.msra.gmra.mxu0 %vm701_vm3, %v9183_v35  ;;  %v3873_v39 = vor.u32 %v3872_v34, %v3869_v16  ;;  %v3883_v9 = vor.u32 %v3882_v11, %v8196_v51  ;;  %v3886_v27 = vshll.u32 %v8208_v13, 16  ;;  %v3891_v54 = vshrl.u32 %v5487_v30, 16 }
 0x12c   : > { %v8211_v55 = vpop.f32.mrf.mxu1  ;;  %6038 = vmatprep.mubr.msk.bf16.mxu0 %vm701_vm3, %v9184_v48  ;;  %v3894_v15 = vshll.u32 %v5487_v30, 16  ;;  %v8250_v3 = vsel %vm6691_vm7, %v5560_v18, %v4433_v14  ;;  %v4435_v62 = vrot.slane %v4433_v14, 4  ;;  %v4436_v49 = vrot.slane %v8122_v32, 5 }
 0x12d   : > { %v1505_v33 = vpop.f32.mrf.mxu0  ;;  %v5561_v16 = vrot.slane %v5545_v29, 9  ;;  %v4440_v34 = vrot.slane %v8136_v59, 5  ;;  %v3900_v11 = vshll.u32 %v8239_v24, 16  ;;  %v3904_v35 = vshrl.u32 %v8239_v24, 16 }
 0x12e   : > { %v5798_v37 = vpop.f32.mrf.mxu1  ;;  %6001 = vmatmul.mubr.msk.bf16.vlgmr.msra.gmra.mxu1 %vm701_vm3, %v7841_v57  ;;  %v8259_v48 = vcombine.low %v3855_v6, %v3865_v22  ;;  %v8261_v18 = vrot.slane %v3873_v39, 4  ;;  %v3884_v32 = vrot.slane %v3883_v9, 4  ;;  %v3888_v38 = vrot.slane %v3886_v27, 5  ;;  %v5490_v22 = vld [vmem:[%s6361_s9 + $0xa8] sm:$0xf] }
 0x12f   : > { %v1089_v45 = vadd.f32 %v5798_v37, %v7737_v5  ;;  %v5833_v2 = vpop.f32.mrf.mxu0  ;;  %6004 = vmatprep.mubr.msk.bf16.mxu1 %vm701_vm3, %v7988_v23  ;;  %v3893_v29 = vrot.slane %v3891_v54, 4  ;;  %v3896_v59 = vrot.slane %v3894_v15, 5  ;;  %v4443_v6 = vrot.slane %v8208_v13, 5  ;;  %v8287_v27 = vld [vmem:[%s6361_s9 + $0xac] sm:$0xf] }
 0x130   : > { %v1080_v57 = vpop.f32.mrf.mxu1  ;;  %v3906_v9 = vrot.slane %v3904_v35, 4  ;;  %v9189_v35 = vld [vmem:[#allocation11_spill] sm:$0xff] }
 0x131   : > { %v8256_v5 = vadd.f32 %v5832_v56, %v1089_v45  ;;  %v1081_v23 = vadd.f32 %v1080_v57, %v7761_v20  ;;  %v1508_v30 = vpop.f32.mrf.mxu0  ;;  %v9186_v45 = vcombine.low %v7929_v63, %v7955_v52  ;;  %v8272_v20 = vsel %vm6691_vm7, %v4435_v62, %v4436_v49  ;;  %v5546_v62 = vld [vmem:[%s6361_s9 + $0x9c] sm:$0xe] }
 0x132   : > { %v5799_v14 = vpop.f32.mrf.mxu1  ;;  %v4442_v63 = vrot.slane %v4440_v34, 4  ;;  %v8284_v52 = vrot.slane %v3900_v11, 5  ;;  %v4447_v49 = vrot.slane %v8239_v24, 5  ;;  %v3924_v24 = vshll.u32 %v8287_v27, 16 }
 0x133   : > { %v8263_v37 = vadd.f32 %v1505_v33, %v1081_v23  ;;  %v1092_v40 = vadd.f32 %v5799_v14, %v7780_v53  ;;  %v5836_v56 = vpop.f32.mrf.mxu0  ;;  %6039 = vmatmul.mubr.msk.bf16.gmra.mxu0 %vm701_vm3, %v9186_v45  ;;  %v9187_v33 = vcombine.low %v7994_v21, %v7998_v1  ;;  %v8282_v53 = vsel %vm6691_vm7, %v5561_v16, %v4440_v34  ;;  %v5489_v1 = vld [vmem:[%s6361_s9 + $0xa4] sm:$0x1]  ;;  %v9188_v16 = vld [vmem:[#allocation14_spill] sm:$0xff] }
 0x134   : > { %v1083_v39 = vpop.f32.mrf.mxu1  ;;  %v3879_v21 = vsel %vm6405_vm4, %v8261_v18, %v8196_v51  ;;  %v3915_v34 = vshrl.u32 %v5490_v22, 16  ;;  %v9190_v51 = vld [vmem:[#allocation19_spill] sm:$0xff]  ;;  %v3928_v18 = vshrl.u32 %v8287_v27, 16 }
 0x135   : > { %6042 = vmatprep.mubr.msk.bf16.mxu0 %vm701_vm3, %v9187_v33  ;;  %v8289_v54 = vadd.f32 %v5833_v2, %v1092_v40  ;;  %v1084_v13 = vadd.f32 %v1083_v39, %v7825_v12  ;;  %v1521_v15 = vpop.f32.mrf.mxu0  ;;  %v3889_v40 = vsel %vm6405_vm4, %v3884_v32, %v3888_v38  ;;  %v3897_v2 = vor.u32 %v3896_v59, %v3893_v29  ;;  %v9191_v59 = vld [vmem:[#allocation15_spill] sm:$0xff] }
 0x136   : > { %v5802_v57 = vpop.f32.mrf.mxu1  ;;  %6005 = vmatmul.mubr.msk.bf16.gmra.mxu1 %vm701_vm3, %v9188_v16  ;;  %v3918_v12 = vshll.u32 %v5490_v22, 16  ;;  %v8312_v39 = vsel %vm6691_vm7, %v4442_v63, %v4443_v6  ;;  %v3907_v32 = vor.u32 %v3906_v9, %v8284_v52  ;;  %v3910_v38 = vshll.u32 %v5489_v1, 16 }
 0x137   : > { %v8303_v11 = vadd.f32 %v1508_v30, %v1084_v13  ;;  %v1105_v23 = vadd.f32 %v5802_v57, %v9189_v35  ;;  %v5837_v14 = vpop.f32.mrf.mxu0  ;;  %6008 = vmatprep.mubr.msk.bf16.mxu1 %vm701_vm3, %v9190_v51  ;;  %v5562_v30 = vrot.slane %v5546_v62, 9  ;;  %v4449_v13 = vrot.slane %v4447_v49, 4 }
 0x138   : > { %v1096_v45 = vpop.f32.mrf.mxu1  ;;  %v4450_v57 = vrot.slane %v5489_v1, 5  ;;  %v8320_v51 = vrot.slane %v3897_v2, 4  ;;  %v3917_v6 = vrot.slane %v3915_v34, 4  ;;  %v3920_v63 = vrot.slane %v3918_v12, 5  ;;  %v8330_v1 = vld [vmem:[%s6361_s9 + $0xb0] sm:$0x1] }
 0x139   : > { %v8315_v29 = vadd.f32 %v5836_v56, %v1105_v23  ;;  %v1097_v22 = vadd.f32 %v1096_v45, %v9191_v59  ;;  %v1524_v33 = vpop.f32.mrf.mxu0  ;;  %v8332_v23 = vrot.slane %v3924_v24, 5  ;;  %v3930_v2 = vrot.slane %v3928_v18, 4  ;;  %v9193_v12 = vld [vmem:[#allocation17_spill] sm:$0xff] }
 0x13a   : > { %v5803_v16 = vpop.f32.mrf.mxu1  ;;  %v8342_v43 = vrot.slane %v3907_v32, 4  ;;  %v8344_v17 = vrot.slane %v3910_v38, 5  ;;  %v8352_v58 = vsel %vm6691_vm7, %v5562_v30, %v4447_v49  ;;  %v8356_v36 = vsel %vm6691_vm7, %v4449_v13, %v4450_v57  ;;  %v8368_v30 = vld [vmem:[%s6361_s9 + $0xb8] sm:$0xf] }
 0x13b   : > { %v8322_v9 = vadd.f32 %v1521_v15, %v1097_v22  ;;  %v1108_v62 = vadd.f32 %v5803_v16, %v9192_v4  ;;  %v5840_v56 = vpop.f32.mrf.mxu0  ;;  %6043 = vmatmul.mubr.msk.bf16.gmra.mxu0 %vm701_vm3, %v5573_v10  ;;  %v8338_v15 = vcombine.low %v3879_v21, %v3889_v40  ;;  %v5547_v10 = vld [vmem:[%s6361_s9 + $0xa8] sm:$0xe]  ;;  %v3921_v32 = vor.u32 %v3920_v63, %v3917_v6  ;;  %v9195_v22 = vld [vmem:[#allocation12_spill] sm:$0xff] }
 0x13c   : > { %v1099_v45 = vpop.f32.mrf.mxu1  ;;  %6046 = vmatprep.mubr.msk.bf16.mxu0 %vm701_vm3, %v5574_v41  ;;  %v5493_v41 = vld [vmem:[%s6361_s9 + $0xb4] sm:$0xf]  ;;  %v9194_v40 = vld [vmem:[#allocation22_spill] sm:$0xff]  ;;  %v3934_v38 = vshll.u32 %v8330_v1, 16  ;;  %v4454_v49 = vrot.slane %v8287_v27, 5  ;;  %v3931_v16 = vor.u32 %v3930_v2, %v8332_v23  ;;  %v3913_v27 = vsel %vm6405_vm4, %v8342_v43, %v8344_v17 }
 0x13d   : > { %v8347_v34 = vadd.f32 %v5837_v14, %v1108_v62  ;;  %v1100_v24 = vadd.f32 %v1099_v45, %v9193_v12  ;;  %v1537_v18 = vpop.f32.mrf.mxu0  ;;  %v5563_v62 = vrot.slane %v5547_v10, 9  ;;  %v3939_v6 = vshrl.u32 %v5493_v41, 16 }
 0x13e   : > { %v5806_v21 = vpop.f32.mrf.mxu1  ;;  %6009 = vmatmul.mubr.msk.bf16.gmra.mxu1 %vm701_vm3, %v9194_v40  ;;  %v3942_v63 = vshll.u32 %v5493_v41, 16  ;;  %v3948_v2 = vshll.u32 %v8368_v30, 16  ;;  %v3952_v10 = vshrl.u32 %v8368_v30, 16  ;;  %v5496_v40 = vld [vmem:[%s6361_s9 + $0xc0] sm:$0xf]  ;;  %v3922_v4 = vrot.slane %v3921_v32, 4 }
 0x13f   : > { %v8370_v59 = vadd.f32 %v1524_v33, %v1100_v24  ;;  %v1121_v13 = vadd.f32 %v5806_v21, %v9195_v22  ;;  %v5841_v57 = vpop.f32.mrf.mxu0  ;;  %6012 = vmatprep.mubr.msk.bf16.mxu1 %vm701_vm3, %v8222_v46  ;;  %v9197_v24 = vld [vmem:[#allocation21_spill] sm:$0xff]  ;;  %v3936_v43 = vrot.slane %v3934_v38, 5  ;;  %v4456_v17 = vrot.slane %v4454_v49, 4 }
 0x140   : > { %v1112_v45 = vpop.f32.mrf.mxu1  ;;  %v4457_v33 = vrot.slane %v8330_v1, 5  ;;  %v8398_v14 = vsel %vm6691_vm7, %v5563_v62, %v4454_v49  ;;  %v8401_v32 = vld [vmem:[%s6361_s9 + $0xc4] sm:$0xf]  ;;  %v9201_v1 = vcombine.low %v8180_v25, %v8184_v50  ;;  %v8413_v62 = vrot.slane %v3948_v2, 5 }
 0x141   : > { %v8382_v12 = vadd.f32 %v5840_v56, %v1121_v13  ;;  %v1113_v21 = vadd.f32 %v1112_v45, %v9197_v24  ;;  %v1540_v46 = vpop.f32.mrf.mxu0  ;;  %v9199_v56 = vld [vmem:[#allocation24_spill] sm:$0xff]  ;;  %v9200_v45 = vcombine.low %v8168_v47, %v8172_v7  ;;  %v3932_v24 = vrot.slane %v3931_v16, 4  ;;  %v9202_v16 = vld [vmem:[#allocation26_spill] sm:$0xff] }
 0x142   : > { %v5807_v22 = vpop.f32.mrf.mxu1  ;;  %v3963_v47 = vshrl.u32 %v5496_v40, 16  ;;  %v3966_v7 = vshll.u32 %v5496_v40, 16  ;;  %v3927_v25 = vsel %vm6405_vm4, %v3922_v4, %v8332_v23  ;;  %v8422_v50 = vsel %vm6691_vm7, %v4456_v17, %v4457_v33  ;;  %v5548_v40 = vld [vmem:[%s6361_s9 + $0xb4] sm:$0xe] }
 0x143   : > { %9196 = vst [vmem:[#allocation14_spill] sm:$0xff] %v8382_v12  ;;  %v8389_v35 = vadd.f32 %v1537_v18, %v1113_v21  ;;  %v1124_v41 = vadd.f32 %v5807_v22, %v9199_v56  ;;  %v5844_v13 = vpop.f32.mrf.mxu0  ;;  %6047 = vmatmul.mubr.msk.bf16.gmra.mxu0 %vm701_vm3, %v9200_v45  ;;  %v8408_v18 = vld [vmem:[%s6361_s9 + $0xbc] sm:$0x1]  ;;  %v3941_v21 = vrot.slane %v3939_v6, 4  ;;  %v3944_v22 = vrot.slane %v3942_v63, 5 }
 0x144   : > { %v1115_v38 = vpop.f32.mrf.mxu1  ;;  %6050 = vmatprep.mubr.msk.bf16.mxu0 %vm701_vm3, %v9201_v1  ;;  %v3976_v6 = vshrl.u32 %v8401_v32, 16  ;;  %v3958_v23 = vshll.u32 %v8408_v18, 16  ;;  %v4461_v17 = vrot.slane %v8368_v30, 5  ;;  %v9203_v1 = vld [vmem:[#allocation28_spill] sm:$0xff] }
 0x145   : > { %9198 = vst [vmem:[#allocation11_spill] sm:$0xff] %v8389_v35  ;;  %v8410_v56 = vadd.f32 %v5841_v57, %v1124_v41  ;;  %v1116_v45 = vadd.f32 %v1115_v38, %v9202_v16  ;;  %v1553_v49 = vpop.f32.mrf.mxu0  ;;  %v3954_v35 = vrot.slane %v3952_v10, 4  ;;  %v3972_v57 = vshll.u32 %v8401_v32, 16 }
 0x146   : > { %v5810_v12 = vpop.f32.mrf.mxu1  ;;  %6013 = vmatmul.mubr.msk.bf16.gmra.mxu1 %vm701_vm3, %v8224_v61  ;;  %v3937_v61 = vsel %vm6405_vm4, %v3932_v24, %v3936_v43  ;;  %v3945_v33 = vor.u32 %v3944_v22, %v3941_v21  ;;  %v3965_v41 = vrot.slane %v3963_v47, 4  ;;  %v3968_v38 = vrot.slane %v3966_v7, 5 }
 0x147   : > { %v8426_v63 = vadd.f32 %v1540_v46, %v1116_v45  ;;  %v1137_v2 = vadd.f32 %v5810_v12, %v8132_v28  ;;  %v5845_v10 = vpop.f32.mrf.mxu0  ;;  %6016 = vmatprep.mubr.msk.bf16.mxu1 %vm701_vm3, %v8230_v60  ;;  %v9204_v60 = vsel %vm6405_vm4, %v8320_v51, %v8284_v52  ;;  %v3955_v24 = vor.u32 %v3954_v35, %v8413_v62 }
 0x148   : > { %v1128_v4 = vpop.f32.mrf.mxu1  ;;  %v8444_v43 = vcombine.low %v9204_v60, %v3913_v27  ;;  %v8447_v30 = vcombine.low %v3927_v25, %v3937_v61  ;;  %v8451_v22 = vrot.slane %v3972_v57, 5  ;;  %v3978_v47 = vrot.slane %v3976_v6, 4  ;;  %v5498_v27 = vld [vmem:[%s6361_s9 + $0xc8] sm:$0x1] }
 0x149   : > { %v8436_v46 = vadd.f32 %v5844_v13, %v1137_v2  ;;  %v1129_v28 = vadd.f32 %v1128_v4, %v9203_v1  ;;  %v1556_v12 = vpop.f32.mrf.mxu0  ;;  %v5580_v13 = vcombine.low %v8398_v14, %v8422_v50  ;;  %v9205_v52 = vcombine.low %v8250_v3, %v8272_v20  ;;  %v5499_v14 = vld [vmem:[%s6361_s9 + $0xcc] sm:$0xf]  ;;  %v8472_v20 = vld [vmem:[%s6361_s9 + $0xd0] sm:$0xf]  ;;  %v5549_v4 = vld [vmem:[%s6361_s9 + $0xc0] sm:$0xe] }
 0x14a   : > { %v5811_v21 = vpop.f32.mrf.mxu1  ;;  %v8460_v35 = vrot.slane %v3958_v23, 5  ;;  %v5564_v51 = vrot.slane %v5548_v40, 9  ;;  %v9206_v50 = vcombine.low %v8282_v53, %v8312_v39  ;;  %v4464_v57 = vrot.slane %v8408_v18, 5 }
 0x14b   : > { %v8453_v7 = vadd.f32 %v1553_v49, %v1129_v28  ;;  %v1140_v16 = vadd.f32 %v5811_v21, %v8155_v19  ;;  %v5848_v45 = vpop.f32.mrf.mxu0  ;;  %6051 = vmatmul.mubr.msk.bf16.gmra.mxu0 %vm701_vm3, %v9205_v52  ;;  %v8468_v49 = vrot.slane %v3945_v33, 4  ;;  %v4463_v19 = vrot.slane %v4461_v17, 4 }
 0x14c   : > { %v1131_v25 = vpop.f32.mrf.mxu1  ;;  %6054 = vmatprep.mubr.msk.bf16.mxu0 %vm701_vm3, %v9206_v50  ;;  %v3969_v3 = vor.u32 %v3968_v38, %v3965_v41  ;;  %v8477_v23 = vrot.slane %v3955_v24, 4  ;;  %v4468_v53 = vrot.slane %v8401_v32, 5  ;;  %v3979_v33 = vor.u32 %v3978_v47, %v8451_v22 }
 0x14d   : > { %v8474_v6 = vadd.f32 %v5845_v10, %v1140_v16  ;;  %v1132_v2 = vadd.f32 %v1131_v25, %v8187_v26  ;;  %v1569_v61 = vpop.f32.mrf.mxu0  ;;  %v3982_v18 = vshll.u32 %v5498_v27, 16  ;;  %v3987_v40 = vshrl.u32 %v5499_v14, 16  ;;  %v9209_v10 = vld [vmem:[#allocation7_spill] sm:$0xff]  ;;  %v9210_v16 = vld [vmem:[#allocation6_spill] sm:$0xff] }
 0x14e   : > { %v5814_v39 = vpop.f32.mrf.mxu1  ;;  %6017 = vmatmul.mubr.msk.bf16.gmra.mxu1 %vm701_vm3, %v8259_v48  ;;  %v3990_v41 = vshll.u32 %v5499_v14, 16  ;;  %v3996_v28 = vshll.u32 %v8472_v20, 16  ;;  %v4000_v32 = vshrl.u32 %v8472_v20, 16  ;;  %v4462_v48 = vsel %vm6691_vm7, %v5564_v51, %v4461_v17  ;;  %v9211_v17 = vld [vmem:[#allocation9_spill] sm:$0xff] }
 0x14f   : > { %9207 = vst [vmem:[#allocation19_spill] sm:$0xff] %v8474_v6  ;;  %v8484_v38 = vadd.f32 %v1556_v12, %v1132_v2  ;;  %v1153_v1 = vadd.f32 %v5814_v39, %v9209_v10  ;;  %v5849_v26 = vpop.f32.mrf.mxu0  ;;  %6020 = vmatprep.mubr.msk.bf16.mxu1 %vm701_vm3, %v8338_v15  ;;  %v4465_v24 = vsel %vm6691_vm7, %v4463_v19, %v4464_v57  ;;  %v3970_v21 = vrot.slane %v3969_v3, 4 }
 0x150   : > { %v1144_v60 = vpop.f32.mrf.mxu1  ;;  %v5565_v12 = vrot.slane %v5549_v4, 9  ;;  %v4470_v25 = vrot.slane %v4468_v53, 4  ;;  %v4471_v15 = vrot.slane %v5498_v27, 5  ;;  %v3980_v2 = vrot.slane %v3979_v33, 4  ;;  %v5501_v33 = vld [vmem:[%s6361_s9 + $0xd4] sm:$0x1] }
 0x151   : > { %9208 = vst [vmem:[#allocation15_spill] sm:$0xff] %v8484_v38  ;;  %v8495_v47 = vadd.f32 %v5848_v45, %v1153_v1  ;;  %v1145_v52 = vadd.f32 %v1144_v60, %v9210_v16  ;;  %v1572_v14 = vpop.f32.mrf.mxu0  ;;  %v3984_v39 = vrot.slane %v3982_v18, 5  ;;  %v3989_v10 = vrot.slane %v3987_v40, 4  ;;  %v9213_v18 = vld [vmem:[#allocation8_spill] sm:$0xff] }
 0x152   : > { %v5815_v50 = vpop.f32.mrf.mxu1  ;;  %v3992_v38 = vrot.slane %v3990_v41, 5  ;;  %v9212_v45 = vcombine.low %v8352_v58, %v8356_v36  ;;  %v8505_v57 = vrot.slane %v3996_v28, 5  ;;  %v4002_v27 = vrot.slane %v4000_v32, 4 }
 0x153   : > { %v8498_v6 = vadd.f32 %v1569_v61, %v1145_v52  ;;  %v1156_v51 = vadd.f32 %v5815_v50, %v9211_v17  ;;  %v5852_v19 = vpop.f32.mrf.mxu0  ;;  %v3951_v61 = vsel %vm6405_vm4, %v8468_v49, %v8413_v62  ;;  %v3961_v4 = vsel %vm6405_vm4, %v8477_v23, %v8460_v35  ;;  %v5550_v62 = vld [vmem:[%s6361_s9 + $0xcc] sm:$0xe]  ;;  %s8844_s9 = scalar_lea.vmem [#allocation2], %s5062_s8 }
 0x154   : > { %6055 = vmatmul.mubr.msk.bf16.gmra.mxu0 %vm701_vm3, %v9212_v45  ;;  %v1147_v3 = vpop.f32.mrf.mxu1  ;;  %v4475_v58 = vrot.slane %v8472_v20, 5  ;;  %v4472_v1 = vsel %vm6691_vm7, %v4470_v25, %v4471_v15  ;;  %v5581_v35 = vcombine.low %v4462_v48, %v4465_v24  ;;  %v3975_v20 = vsel %vm6405_vm4, %v3970_v21, %v8451_v22  ;;  %v9215_v25 = vld [vmem:[#allocation13_spill] sm:$0xff]  ;;  %s4956_s11 = sshll.u32 %s8844_s9, 4  ;;  %s8979_s11 = int_to_ptr.vmem [resolvable:$true] %s4956_s11 }
 0x155   : > { %6058 = vmatprep.mubr.msk.bf16.mxu0 %vm701_vm3, %v5580_v13  ;;  %v8518_v36 = vadd.f32 %v5849_v26, %v1156_v51  ;;  %v1148_v40 = vadd.f32 %v1147_v3, %v9213_v18  ;;  %v1585_v41 = vpop.f32.mrf.mxu0  ;;  %v4469_v13 = vsel %vm6691_vm7, %v5565_v12, %v4468_v53  ;;  %v3985_v23 = vsel %vm6405_vm4, %v3980_v2, %v3984_v39  ;;  %v9214_v53 = vld [vmem:[#allocation10_spill] sm:$0xff]  ;;  %s6186_s23 = scalar_lea.vmem %s8979_s11, 4096  ;;  %p6193_p1 = scmp.lt.s32.totalorder %s8979_s11, %s6191_s27 }
 0x156   : > { %v5818_v49 = vpop.f32.mrf.mxu1  ;;  %6021 = vmatmul.mubr.msk.bf16.gmra.mxu1 %vm701_vm3, %v8444_v43  ;;  %v3993_v26 = vor.u32 %v3992_v38, %v3989_v10  ;;  %v4003_v12 = vor.u32 %v4002_v27, %v8505_v57  ;;  %v4006_v43 = vshll.u32 %v5501_v33, 16  ;;  %v5582_v24 = vcombine.low %v4469_v13, %v4472_v1  ;;  %p6187_p12 = scmp.ne.s32.totalorder %s8979_s11, %s6186_s23  ;;  %p6194_p2 = scmp.lt.s32.totalorder %s6192_s28, %s6186_s23 }
 0x157   : > { %v8533_v28 = vadd.f32 %v1572_v14, %v1148_v40  ;;  %v1169_v32 = vadd.f32 %v5818_v49, %v9214_v53  ;;  %v5853_v60 = vpop.f32.mrf.mxu0  ;;  %6024 = vmatprep.mubr.msk.bf16.mxu1 %vm701_vm3, %v8447_v30  ;;  %v5566_v16 = vrot.slane %v5550_v62, 9  ;;  %v4477_v52 = vrot.slane %v4475_v58, 4  ;;  %v9216_v30 = vld [vmem:[#allocation16_spill] sm:$0xff] }
 0x158   : > { %v1160_v48 = vpop.f32.mrf.mxu1  ;;  %v4478_v22 = vrot.slane %v5501_v33, 5  ;;  %v5516_v50 = vcombine.low %v3951_v61, %v3961_v4  ;;  %v5517_v2 = vcombine.low %v3975_v20, %v3985_v23  ;;  %v3994_v39 = vrot.slane %v3993_v26, 4  ;;  %v9217_v33 = vld [vmem:[#allocation18_spill] sm:$0xff]  ;;  %v9218_v62 = vld [vmem:[#allocation20_spill] sm:$0xff]  ;;  %v9219_v26 = vld [vmem:[#allocation23_spill] sm:$0xff]  ;;  %p6188_p13 = pnand %p6187_p12, %p6327_p4  ;;  %p6195_p3 = por %p6194_p2, %p6193_p1 }
 0x159   : > { %v8539_v21 = vadd.f32 %v5852_v19, %v1169_v32  ;;  %v1161_v38 = vadd.f32 %v1160_v48, %v9215_v25  ;;  %v1588_v14 = vpop.f32.mrf.mxu0  ;;  %v4004_v45 = vrot.slane %v4003_v12, 4  ;;  %v4008_v27 = vrot.slane %v4006_v43, 5  ;;  %v9220_v43 = vld [vmem:[#allocation25_spill] sm:$0xff] }
 0x15a   : > { %v5819_v15 = vpop.f32.mrf.mxu1  ;;  %v4476_v19 = vsel %vm6691_vm7, %v5566_v16, %v4475_v58  ;;  %v4479_v61 = vsel %vm6691_vm7, %v4477_v52, %v4478_v22  ;;  %v3999_v13 = vsel %vm6405_vm4, %v3994_v39, %v8505_v57  ;;  %p6189_p0 = pneg %p6188_p13 }
 0x15b   : > { %v8542_v10 = vadd.f32 %v1585_v41, %v1161_v38  ;;  %v1172_v17 = vadd.f32 %v5819_v15, %v9216_v30  ;;  %v5856_v51 = vpop.f32.mrf.mxu0  ;;  %v4009_v0 = vsel %vm6405_vm4, %v4004_v45, %v4008_v27 }
 0x15c   : > { %6059 = vmatmul.mubr.msk.bf16.gmra.mxu0 %vm701_vm3, %v5581_v35  ;;  %v1163_v3 = vpop.f32.mrf.mxu1  ;;  %v5583_v35 = vcombine.low %v4476_v19, %v4479_v61  ;;  %v5518_v12 = vcombine.low %v3999_v13, %v4009_v0  ;;  %p6196_p5 = pnand %p6195_p3, %p6189_p0 }
 0x15d   : > { %6062 = vmatprep.mubr.msk.bf16.mxu0 %vm701_vm3, %v5582_v24  ;;  %v8551_v4 = vadd.f32 %v5853_v60, %v1172_v17  ;;  %v1164_v18 = vadd.f32 %v1163_v3, %v9217_v33  ;;  %v1601_v40 = vpop.f32.mrf.mxu0 }
 0x15e   : > { %v5822_v41 = vpop.f32.mrf.mxu1  ;;  %6025 = vmatmul.mubr.msk.bf16.gmra.mxu1 %vm701_vm3, %v5516_v50 }
 0x15f   : > { %v8558_v1 = vadd.f32 %v1588_v14, %v1164_v18  ;;  %v1185_v49 = vadd.f32 %v5822_v41, %v9218_v62  ;;  %v5857_v58 = vpop.f32.mrf.mxu0  ;;  %6028 = vmatprep.mubr.msk.bf16.mxu1 %vm701_vm3, %v5517_v2 }
 0x160   : > { %v1176_v20 = vpop.f32.mrf.mxu1 }
 0x161   : > { %v8564_v23 = vadd.f32 %v5856_v51, %v1185_v49  ;;  %v1177_v53 = vadd.f32 %v1176_v20, %v9219_v26  ;;  %v1604_v32 = vpop.f32.mrf.mxu0 }
 0x162   : > { %v5823_v60 = vpop.f32.mrf.mxu1 }
 0x163   : > { %v8567_v57 = vadd.f32 %v1601_v40, %v1177_v53  ;;  %v1188_v48 = vadd.f32 %v5823_v60, %v9220_v43  ;;  %v5860_v24 = vpop.f32.mrf.mxu0 }
 0x164   : > { %6063 = vmatmul.mubr.msk.bf16.gmra.mxu0 %vm701_vm3, %v5583_v35  ;;  %v1179_v16 = vpop.f32.mrf.mxu1 }
 0x165   : > { %v8571_v52 = vadd.f32 %v5857_v58, %v1188_v48  ;;  %v1180_v22 = vadd.f32 %v1179_v16, %v9221_v31  ;;  %v1617_v25 = vpop.f32.mrf.mxu0 }
 0x166   : > { %v5826_v38 = vpop.f32.mrf.mxu1  ;;  %6029 = vmatmul.mubr.msk.bf16.gmra.mxu1 %vm701_vm3, %v5518_v12 }
 0x167   : > { %v8575_v14 = vadd.f32 %v1604_v32, %v1180_v22  ;;  %v1201_v15 = vadd.f32 %v5826_v38, %v8147_v42  ;;  %v5861_v50 = vpop.f32.mrf.mxu0 }
 0x168   : > { %v1192_v2 = vpop.f32.mrf.mxu1 }
 0x169   : > { %v8578_v39 = vadd.f32 %v5860_v24, %v1201_v15  ;;  %v1193_v30 = vadd.f32 %v1192_v2, %v8174_v44  ;;  %v1620_v17 = vpop.f32.mrf.mxu0 }
 0x16a   : > { %v5827_v51 = vpop.f32.mrf.mxu1 }
 0x16b   : > { %v8581_v45 = vadd.f32 %v1617_v25, %v1193_v30  ;;  %v1204_v27 = vadd.f32 %v5827_v51, %v8189_v8  ;;  %v5900_v3 = vpop.f32.mrf.mxu0  ;;  %v9222_v30 = vld [vmem:[#allocation14_spill] sm:$0xff] }
 0x16c   : > { %v1195_v19 = vpop.f32.mrf.mxu1 }
 0x16d   : > { %v8584_v61 = vadd.f32 %v5861_v50, %v1204_v27  ;;  %v1196_v33 = vadd.f32 %v1195_v19, %v8211_v55  ;;  %v2590_v18 = vpop.f32.mrf.mxu0 }
 0x16e   : > { %v5866_v42 = vpop.f32.mrf.mxu1 }
 0x16f   : > { %v8587_v40 = vadd.f32 %v1620_v17, %v1196_v33  ;;  %v1993_v41 = vadd.f32 %v5866_v42, %v8256_v5  ;;  %v5901_v13 = vpop.f32.mrf.mxu0 }
 0x170   : > { %v1864_v44 = vpop.f32.mrf.mxu1 }
 0x171   : > { %v8590_v62 = vadd.f32 %v5900_v3, %v1993_v41  ;;  %v1991_v49 = vadd.f32 %v1864_v44, %v8263_v37  ;;  %v2593_v58 = vpop.f32.mrf.mxu0  ;;  %v9223_v3 = vld [vmem:[#allocation11_spill] sm:$0xff] }
 0x172   : > { %v5867_v8 = vpop.f32.mrf.mxu1 }
 0x173   : > { %v8593_v0 = vadd.f32 %v2590_v18, %v1991_v49  ;;  %v1994_v35 = vadd.f32 %v5867_v8, %v8289_v54  ;;  %v5904_v20 = vpop.f32.mrf.mxu0 }
 0x174   : > { %v1867_v55 = vpop.f32.mrf.mxu1 }
 0x175   : > { %v8596_v26 = vadd.f32 %v5901_v13, %v1994_v35  ;;  %v1992_v53 = vadd.f32 %v1867_v55, %v8303_v11  ;;  %v2606_v32 = vpop.f32.mrf.mxu0 }
 0x176   : > { %v5870_v5 = vpop.f32.mrf.mxu1 }
 0x177   : > { %v8599_v60 = vadd.f32 %v2593_v58, %v1992_v53  ;;  %v1997_v12 = vadd.f32 %v5870_v5, %v8315_v29  ;;  %v5905_v43 = vpop.f32.mrf.mxu0 }
 0x178   : > { %v1880_v37 = vpop.f32.mrf.mxu1 }
 0x179   : > { %v8602_v48 = vadd.f32 %v5904_v20, %v1997_v12  ;;  %v1995_v24 = vadd.f32 %v1880_v37, %v8322_v9  ;;  %v2609_v16 = vpop.f32.mrf.mxu0 }
 0x17a   : > { %v5871_v54 = vpop.f32.mrf.mxu1 }
 0x17b   : > { %v8605_v31 = vadd.f32 %v2606_v32, %v1995_v24  ;;  %v1998_v22 = vadd.f32 %v5871_v54, %v8347_v34  ;;  %v5908_v25 = vpop.f32.mrf.mxu0  ;;  %v9225_v54 = vld [vmem:[#allocation15_spill] sm:$0xff] }
 0x17c   : > { %v1883_v11 = vpop.f32.mrf.mxu1 }
 0x17d   : > { %v8608_v38 = vadd.f32 %v5905_v43, %v1998_v22  ;;  %v1996_v15 = vadd.f32 %v1883_v11, %v8370_v59  ;;  %v2622_v50 = vpop.f32.mrf.mxu0  ;;  %v9224_v43 = vld [vmem:[#allocation19_spill] sm:$0xff] }
 0x17e   : > { %v5874_v29 = vpop.f32.mrf.mxu1 }
 0x17f   : > { %v8611_v2 = vadd.f32 %v2609_v16, %v1996_v15  ;;  %v2001_v17 = vadd.f32 %v5874_v29, %v9222_v30  ;;  %v5909_v51 = vpop.f32.mrf.mxu0 }
 0x180   : > { %v1896_v9 = vpop.f32.mrf.mxu1 }
 0x181   : > { %v8614_v27 = vadd.f32 %v5908_v25, %v2001_v17  ;;  %v1999_v19 = vadd.f32 %v1896_v9, %v9223_v3  ;;  %v2625_v33 = vpop.f32.mrf.mxu0 }
 0x182   : > { %v5875_v34 = vpop.f32.mrf.mxu1 }
 0x183   : > { %v8617_v18 = vadd.f32 %v2622_v50, %v1999_v19  ;;  %v2002_v42 = vadd.f32 %v5875_v34, %v8410_v56  ;;  %v5912_v41 = vpop.f32.mrf.mxu0 }
 0x184   : > { %v1899_v59 = vpop.f32.mrf.mxu1 }
 0x185   : > { %v8620_v13 = vadd.f32 %v5909_v51, %v2002_v42  ;;  %v2000_v44 = vadd.f32 %v1899_v59, %v8426_v63  ;;  %v2638_v49 = vpop.f32.mrf.mxu0 }
 0x186   : > { %v5878_v58 = vpop.f32.mrf.mxu1 }
 0x187   : > { %v8623_v8 = vadd.f32 %v2625_v33, %v2000_v44  ;;  %v2005_v35 = vadd.f32 %v5878_v58, %v8436_v46  ;;  %v5913_v20 = vpop.f32.mrf.mxu0 }
 0x188   : > { %v1912_v55 = vpop.f32.mrf.mxu1 }
 0x189   : > { %v8626_v53 = vadd.f32 %v5912_v41, %v2005_v35  ;;  %v2003_v32 = vadd.f32 %v1912_v55, %v8453_v7  ;;  %v2641_v5 = vpop.f32.mrf.mxu0 }
 0x18a   : > { %v5879_v56 = vpop.f32.mrf.mxu1 }
 0x18b   : > { %v8629_v12 = vadd.f32 %v2638_v49, %v2003_v32  ;;  %v2006_v37 = vadd.f32 %v5879_v56, %v9224_v43  ;;  %v5916_v24 = vpop.f32.mrf.mxu0 }
 0x18c   : > { %v1915_v63 = vpop.f32.mrf.mxu1 }
 0x18d   : > { %v8632_v16 = vadd.f32 %v5913_v20, %v2006_v37  ;;  %v2004_v22 = vadd.f32 %v1915_v63, %v9225_v54  ;;  %v2654_v25 = vpop.f32.mrf.mxu0 }
 0x18e   : > { %v5882_v46 = vpop.f32.mrf.mxu1 }
 0x18f   : > { %v8635_v11 = vadd.f32 %v2641_v5, %v2004_v22  ;;  %v2009_v15 = vadd.f32 %v5882_v46, %v8495_v47  ;;  %v5917_v50 = vpop.f32.mrf.mxu0 }
 0x190   : > { %v1928_v7 = vpop.f32.mrf.mxu1 }
 0x191   : > { %v8638_v29 = vadd.f32 %v5916_v24, %v2009_v15  ;;  %v2007_v30 = vadd.f32 %v1928_v7, %v8498_v6  ;;  %v2657_v17 = vpop.f32.mrf.mxu0 }
 0x192   : > { %v5883_v51 = vpop.f32.mrf.mxu1 }
 0x193   : > { %v8641_v9 = vadd.f32 %v2654_v25, %v2007_v30  ;;  %v2010_v3 = vadd.f32 %v5883_v51, %v8518_v36  ;;  %v5920_v19 = vpop.f32.mrf.mxu0 }
 0x194   : > { %v1931_v33 = vpop.f32.mrf.mxu1 }
 0x195   : > { %v8644_v34 = vadd.f32 %v5917_v50, %v2010_v3  ;;  %v2008_v42 = vadd.f32 %v1931_v33, %v8533_v28  ;;  %v2670_v41 = vpop.f32.mrf.mxu0 }
 0x196   : > { %v5886_v47 = vpop.f32.mrf.mxu1 }
 0x197   : > { %9226 = vst [vmem:[#allocation5_spill] sm:$0xff] %v8644_v34  ;;  %v8647_v59 = vadd.f32 %v2657_v17, %v2008_v42  ;;  %v2013_v44 = vadd.f32 %v5886_v47, %v8539_v21  ;;  %v5921_v49 = vpop.f32.mrf.mxu0 }
 0x198   : > { %v1944_v6 = vpop.f32.mrf.mxu1 }
 0x199   : > { %9227 = vst [vmem:[#allocation17_spill] sm:$0xff] %v8647_v59  ;;  %v8650_v58 = vadd.f32 %v5920_v19, %v2013_v44  ;;  %v2011_v35 = vadd.f32 %v1944_v6, %v8542_v10  ;;  %v2673_v20 = vpop.f32.mrf.mxu0 }
 0x19a   : > { %v5887_v36 = vpop.f32.mrf.mxu1 }
 0x19b   : > { %9228 = vst [vmem:[#allocation22_spill] sm:$0xff] %v8650_v58  ;;  %v8653_v55 = vadd.f32 %v2670_v41, %v2011_v35  ;;  %v2014_v32 = vadd.f32 %v5887_v36, %v8551_v4  ;;  %v5924_v5 = vpop.f32.mrf.mxu0 }
 0x19c   : > { %v1947_v28 = vpop.f32.mrf.mxu1 }
 0x19d   : > { %9229 = vst [vmem:[#allocation12_spill] sm:$0xff] %v8653_v55  ;;  %v8656_v56 = vadd.f32 %v5921_v49, %v2014_v32  ;;  %v2012_v43 = vadd.f32 %v1947_v28, %v8558_v1  ;;  %v2686_v37 = vpop.f32.mrf.mxu0 }
 0x19e   : > { %v5890_v21 = vpop.f32.mrf.mxu1 }
 0x19f   : > { %9230 = vst [vmem:[#allocation21_spill] sm:$0xff] %v8656_v56  ;;  %v8659_v24 = vadd.f32 %v2673_v20, %v2012_v43  ;;  %v2017_v63 = vadd.f32 %v5890_v21, %v8564_v23  ;;  %v5925_v54 = vpop.f32.mrf.mxu0 }
 0x1a0   : > { %v1960_v10 = vpop.f32.mrf.mxu1 }
 0x1a1   : > { %9231 = vst [vmem:[#allocation24_spill] sm:$0xff] %v8659_v24  ;;  %v8662_v22 = vadd.f32 %v5924_v5, %v2017_v63  ;;  %v2015_v25 = vadd.f32 %v1960_v10, %v8567_v57  ;;  %v2689_v46 = vpop.f32.mrf.mxu0 }
 0x1a2   : > { %v5891_v4 = vpop.f32.mrf.mxu1 }
 0x1a3   : > { %9232 = vst [vmem:[#allocation26_spill] sm:$0xff] %v8662_v22  ;;  %v8665_v15 = vadd.f32 %v2686_v37, %v2015_v25  ;;  %v2018_v50 = vadd.f32 %v5891_v4, %v8571_v52  ;;  %v5928_v7 = vpop.f32.mrf.mxu0 }
 0x1a4   : > { %v1963_v1 = vpop.f32.mrf.mxu1 }
 0x1a5   : > { %9233 = vst [vmem:[#allocation28_spill] sm:$0xff] %v8665_v15  ;;  %v8668_v30 = vadd.f32 %v5925_v54, %v2018_v50  ;;  %v2016_v17 = vadd.f32 %v1963_v1, %v8575_v14  ;;  %v2702_v51 = vpop.f32.mrf.mxu0 }
 0x1a6   : > { %v5894_v23 = vpop.f32.mrf.mxu1 }
 0x1a7   : > { %9234 = vst [vmem:[#allocation7_spill] sm:$0xff] %v8668_v30  ;;  %v8671_v3 = vadd.f32 %v2689_v46, %v2016_v17  ;;  %v2021_v19 = vadd.f32 %v5894_v23, %v8578_v39  ;;  %v5929_v33 = vpop.f32.mrf.mxu0 }
 0x1a8   : > { %v1976_v57 = vpop.f32.mrf.mxu1 }
 0x1a9   : > { %9235 = vst [vmem:[#allocation6_spill] sm:$0xff] %v8671_v3  ;;  %v8674_v42 = vadd.f32 %v5928_v7, %v2021_v19  ;;  %v2019_v41 = vadd.f32 %v1976_v57, %v8581_v45  ;;  %v2705_v47 = vpop.f32.mrf.mxu0 }
 0x1aa   : > { %v5895_v52 = vpop.f32.mrf.mxu1 }
 0x1ab   : > { %9236 = vst [vmem:[#allocation9_spill] sm:$0xff] %v8674_v42  ;;  %v8677_v44 = vadd.f32 %v2702_v51, %v2019_v41  ;;  %v2022_v49 = vadd.f32 %v5895_v52, %v8584_v61  ;;  %v8680_v6 = vpop.f32.mrf.mxu0 }
 0x1ac   : > { %v1979_v14 = vpop.f32.mrf.mxu1 }
 0x1ad   : > { %9237 = vst [vmem:[#allocation8_spill] sm:$0xff] %v8677_v44  ;;  %v8682_v35 = vadd.f32 %v5929_v33, %v2022_v49  ;;  %v2020_v20 = vadd.f32 %v1979_v14, %v8587_v40  ;;  %v8685_v39 = vpop.f32.mrf.mxu0 }
 0x1ae   : > { %v5934_v36 = vpop.f32.mrf.mxu1 }
 0x1af   : > { %9238 = vst [vmem:[#allocation10_spill] sm:$0xff] %v8682_v35  ;;  %v8687_v32 = vadd.f32 %v2705_v47, %v2020_v20  ;;  %v8689_v5 = vpop.f32.mrf.mxu0 }
 0x1b0   : > { %v3060_v45 = vpop.f32.mrf.mxu1 }
 0x1b1   : > { %9239 = vst [vmem:[#allocation13_spill] sm:$0xff] %v8687_v32  ;;  %v8691_v28 = vpop.f32.mrf.mxu0 }
 0x1b2   : > { %v5935_v43 = vpop.f32.mrf.mxu1 }
 0x1b3   : > { %v8693_v37 = vpop.f32.mrf.mxu0 }
 0x1b4   : > { %v8695_v61 = vpop.f32.mrf.mxu1 }
 0x1b5   : > { %v8697_v21 = vpop.f32.mrf.mxu0 }
 0x1b6   : > { %v8699_v63 = vpop.f32.mrf.mxu1 }
 0x1b7   : > { %v8701_v40 = vpop.f32.mrf.mxu0 }
 0x1b8   : > { %v8703_v54 = vpop.f32.mrf.mxu1 }
 0x1b9   : > { %v8705_v10 = vpop.f32.mrf.mxu0 }
 0x1ba   : > { %v8707_v25 = vpop.f32.mrf.mxu1 }
 0x1bb   : > { %v8709_v46 = vpop.f32.mrf.mxu0 }
 0x1bc   : > { %v8711_v4 = vpop.f32.mrf.mxu1 }
 0x1bd   : > { %v8713_v50 = vpop.f32.mrf.mxu0 }
 0x1be   : > { %v8715_v7 = vpop.f32.mrf.mxu1 }
 0x1bf   : > { %v8717_v1 = vpop.f32.mrf.mxu0 }
 0x1c0   : > { %v8719_v17 = vpop.f32.mrf.mxu1 }
 0x1c1   : > { %v8721_v51 = vpop.f32.mrf.mxu0 }
 0x1c2   : > { %v8723_v23 = vpop.f32.mrf.mxu1 }
 0x1c3   : > { %v8725_v19 = vpop.f32.mrf.mxu0 }
 0x1c4   : > { %v8727_v33 = vpop.f32.mrf.mxu1 }
 0x1c5   : > { %v8729_v57 = vpop.f32.mrf.mxu0 }
 0x1c6   : > { %v8731_v41 = vpop.f32.mrf.mxu1 }
 0x1c7   : > { %v8733_v47 = vpop.f32.mrf.mxu0 }
 0x1c8   : > { %v8735_v52 = vpop.f32.mrf.mxu1 }
 0x1c9   : > { %v8737_v49 = vpop.f32.mrf.mxu0 }
 0x1ca   : > { %v8739_v14 = vpop.f32.mrf.mxu1 }
 0x1cb   : > { %v8741_v20 = vpop.f32.mrf.mxu0 }
 0x1cc   : > { %v8743_v32 = vpop.f32.mrf.mxu1 }
 0x1cd   : > { %v8745_v35 = vpop.f32.mrf.mxu0 }
 0x1ce   : > { %9240 = vst [vmem:[#allocation16_spill] sm:$0xff] %v8745_v35  ;;  %v8747_v44 = vpop.f32.mrf.mxu1 }
 0x1cf   : > { %v8749_v42 = vpop.f32.mrf.mxu0 }
 0x1d0   : > { %9241 = vst [vmem:[#allocation18_spill] sm:$0xff] %v8749_v42  ;;  %v8751_v3 = vpop.f32.mrf.mxu1 }
 0x1d1   : > { %9242 = vst [vmem:[#allocation20_spill] sm:$0xff] %v8751_v3  ;;  %v8753_v30 = vpop.f32.mrf.mxu0 }
 0x1d2   : > { %9243 = vst [vmem:[#allocation23_spill] sm:$0xff] %v8753_v30  ;;  %v8755_v15 = vpop.f32.mrf.mxu1 }
 0x1d3   : > { %9244 = vst [vmem:[#allocation25_spill] sm:$0xff] %v8755_v15  ;;  %v8757_v22 = vpop.f32.mrf.mxu0 }
 0x1d4   : > { %9245 = vst [vmem:[#allocation27_spill] sm:$0xff] %v8757_v22  ;;  %v8759_v24 = vpop.f32.mrf.mxu1 }
 0x1d5   : > { %9246 = vst [vmem:[#allocation14_spill] sm:$0xff] %v8759_v24  ;;  %v8761_v56 = vpop.f32.mrf.mxu0 }
 0x1d6   : > { %9247 = vst [vmem:[#allocation11_spill] sm:$0xff] %v8761_v56  ;;  %v8763_v55 = vpop.f32.mrf.mxu1 }
 0x1d7   : > { %9248 = vst [vmem:[#allocation19_spill] sm:$0xff] %v8763_v55  ;;  %v8765_v58 = vpop.f32.mrf.mxu0 }
 0x1d8   : > { %9249 = vst [vmem:[#allocation15_spill] sm:$0xff] %v8765_v58  ;;  %v8767_v35 = vpop.f32.mrf.mxu1 }
 0x1d9   : > { %9250 = vst [vmem:[#allocation29_spill] sm:$0xff] %v8767_v35  ;;  %v8769_v59 = vpop.f32.mrf.mxu0 }
 0x1da   : > { %9251 = vst [vmem:[#allocation30_spill] sm:$0xff] %v8769_v59  ;;  %v8771_v42 = vpop.f32.mrf.mxu1 }
 0x1db   : > { %9252 = vst [vmem:[#allocation31_spill] sm:$0xff] %v8771_v42  ;;  %v8773_v34 = vpop.f32.mrf.mxu0 }
 0x1dc   : > { %9253 = vst [vmem:[#allocation32_spill] sm:$0xff] %v8773_v34  ;;  %v8775_v30 = vpop.f32.mrf.mxu1 }
 0x1dd   : > { %9254 = vst [vmem:[#allocation33_spill] sm:$0xff] %v8775_v30  ;;  %v8777_v15 = vpop.f32.mrf.mxu0 }
 0x1de   : > { %9255 = vst [vmem:[#allocation34_spill] sm:$0xff] %v8777_v15  ;;  %v8779_v22 = vpop.f32.mrf.mxu1 }
 0x1df   : > { %9256 = vst [vmem:[#allocation35_spill] sm:$0xff] %v8779_v22  ;;  %v8781_v24 = vpop.f32.mrf.mxu0 }
 0x1e0   : > { %9257 = vst [vmem:[#allocation36_spill] sm:$0xff] %v8781_v24  ;;  %v8783_v56 = vpop.f32.mrf.mxu1  ;;  %v3189_v24 = vadd.f32 %v5934_v36, %v8590_v62  ;;  %v3188_v36 = vadd.f32 %v8695_v61, %v8599_v60  ;;  %v3194_v60 = vadd.f32 %v8707_v25, %v8608_v38 }
 0x1e1   : > { %9258 = vst [vmem:[#allocation37_spill] sm:$0xff] %v8783_v56  ;;  %v8785_v55 = vpop.f32.mrf.mxu0 }
 0x1e2   : > { %9259 = vst [vmem:[#allocation38_spill] sm:$0xff] %v8785_v55  ;;  %v8787_v58 = vpop.f32.mrf.mxu1  ;;  %v3553_v25 = vadd.f32 %v8701_v40, %v3194_v60  ;;  %v3198_v40 = vadd.f32 %v8723_v23, %v8620_v13 }
 0x1e3   : > { %9260 = vst [vmem:[#allocation39_spill] sm:$0xff] %v8787_v58  ;;  %v8789_v35 = vpop.f32.mrf.mxu0  ;;  %v3187_v58 = vadd.f32 %v3060_v45, %v8593_v0  ;;  %v3193_v0 = vadd.f32 %v8699_v63, %v8602_v48  ;;  %v3191_v45 = vadd.f32 %v8703_v54, %v8605_v31  ;;  %v3547_v63 = vadd.f32 %v8691_v28, %v3188_v36 }
 0x1e4   : > { %9261 = vst [vmem:[#allocation40_spill] sm:$0xff] %v8789_v35  ;;  %v8791_v59 = vpop.f32.mrf.mxu1 }
 0x1e5   : > { %9262 = vst [vmem:[#allocation41_spill] sm:$0xff] %v8791_v59  ;;  %v8793_v42 = vpop.f32.mrf.mxu0  ;;  %v3190_v59 = vadd.f32 %v5935_v43, %v8596_v26  ;;  %v8822_v26 = vld [vmem:[%s9032_s2] ss:$0 sm:$0xff]  ;;  %v3552_v54 = vadd.f32 %v8693_v37, %v3193_v0 }
 0x1e6   : > { %9263 = vst [vmem:[#allocation42_spill] sm:$0xff] %v8793_v42  ;;  %v8795_v34 = vpop.f32.mrf.mxu1  ;;  %v3548_v42 = vadd.f32 %v8680_v6, %v3189_v24 }
 0x1e7   : > { %9264 = vst [vmem:[#allocation43_spill] sm:$0xff] %v8795_v34  ;;  %v8797_v15 = vpop.f32.mrf.mxu0 }
 0x1e8   : > { %9265 = vst [vmem:[#allocation44_spill] sm:$0xff] %v8797_v15  ;;  %v8799_v22 = vpop.f32.mrf.mxu1 }
 0x1e9   : > { %9266 = vst [vmem:[#allocation45_spill] sm:$0xff] %v8799_v22  ;;  %v8802_v56 = vpop.f32.mrf.mxu0  ;;  %v3546_v22 = vadd.f32 %v8685_v39, %v3187_v58  ;;  %v3549_v58 = vadd.f32 %v8689_v5, %v3190_v59  ;;  %v3550_v59 = vadd.f32 %v8697_v21, %v3191_v45 }
 0x1ea   : > { %v8804_v55 = vpop.f32.mrf.mxu1 }
 0x1eb   : > { %v6036_v35 = vpop.f32.mrf.mxu0 }
 0x1ec   : > { %v8807_v30 = vpop.f32.mrf.mxu1 }
 0x1ed   : > { %v4615_v34 = vpop.f32.mrf.mxu0 }
 0x1ee   : > { %v6002_v15 = vpop.f32.mrf.mxu1 }
 0x1ef   : > { %v4274_v3 = vadd.f32 %v6002_v15, %v3548_v42  ;;  %v6037_v62 = vpop.f32.mrf.mxu0 }
 0x1f0   : > { %v4145_v24 = vpop.f32.mrf.mxu1 }
 0x1f1   : > { %v4744_v15 = vadd.f32 %v6036_v35, %v4274_v3  ;;  %v4272_v42 = vadd.f32 %v4145_v24, %v3546_v22  ;;  %v4618_v6 = vpop.f32.mrf.mxu0  ;;  %v3197_v24 = vadd.f32 %v8715_v7, %v8614_v27 }
 0x1f2   : > { %v6003_v48 = vpop.f32.mrf.mxu1 }
 0x1f3   : > { %v4783_v39 = vadd.f32 %v8822_v26, %v4744_v15  ;;  %v4742_v31 = vadd.f32 %v4615_v34, %v4272_v42  ;;  %v4275_v43 = vadd.f32 %v6003_v48, %v3549_v58  ;;  %v6040_v61 = vpop.f32.mrf.mxu0  ;;  %v3192_v34 = vadd.f32 %v8711_v4, %v8611_v2 }
 0x1f4   : > { %v4148_v3 = vpop.f32.mrf.mxu1 }
 0x1f5   : > { %vm4815_vm8 = vcmp.ge.f32.partialorder %v4783_v39, 0.0  ;;  %v4847_v22 = vmul.f32 0.25, %v4783_v39  ;;  %v4781_v35 = vadd.f32 %v8822_v26, %v4742_v31  ;;  %v4745_v38 = vadd.f32 %v6037_v62, %v4275_v43  ;;  %v4631_v5 = vpop.f32.mrf.mxu0 }
 0x1f6   : > { %v4273_v28 = vadd.f32 %v4148_v3, %v3547_v63  ;;  %v6006_v36 = vpop.f32.mrf.mxu1  ;;  %v3195_v62 = vadd.f32 %v8719_v17, %v8617_v18  ;;  %v3551_v60 = vadd.f32 %v8705_v10, %v3192_v34  ;;  %v3196_v18 = vadd.f32 %v8727_v33, %v8623_v8 }
 0x1f7   : > { %v4879_v37 = vsel %vm4815_vm8, %v4783_v39, %v4847_v22  ;;  %vm4813_vm9 = vcmp.ge.f32.partialorder %v4781_v35, 0.0  ;;  %v4845_v21 = vmul.f32 0.25, %v4781_v35  ;;  %v4784_v0 = vadd.f32 %v8822_v26, %v4745_v38  ;;  %v6041_v45 = vpop.f32.mrf.mxu0 }
 0x1f8   : > { %4911 = vst [vmem:[%s8844_s9 + $0x10] sm:$0xff] %v4879_v37  ;;  %v4743_v2 = vadd.f32 %v4618_v6, %v4273_v28  ;;  %v4278_v27 = vadd.f32 %v6006_v36, %v3552_v54  ;;  %v4161_v4 = vpop.f32.mrf.mxu1  ;;  %v3556_v6 = vadd.f32 %v8709_v46, %v3197_v24  ;;  %v3554_v63 = vadd.f32 %v8713_v50, %v3195_v62 }
 0x1f9   : > { %v4877_v7 = vsel %vm4813_vm9, %v4781_v35, %v4845_v21  ;;  %vm4816_vm10 = vcmp.ge.f32.partialorder %v4784_v0, 0.0  ;;  %v4848_v58 = vmul.f32 0.25, %v4784_v0  ;;  %v4276_v15 = vadd.f32 %v4161_v4, %v3550_v59  ;;  %v4634_v42 = vpop.f32.mrf.mxu0 }
 0x1fa   : > { %4909 = vst [vmem:[%s8844_s9] sm:$0xff] %v4877_v7  ;;  %v4782_v13 = vadd.f32 %v8822_v26, %v4743_v2  ;;  %v4748_v17 = vadd.f32 %v6040_v61, %v4278_v27  ;;  %v6007_v23 = vpop.f32.mrf.mxu1  ;;  %v3557_v33 = vadd.f32 %v8717_v1, %v3198_v40  ;;  %v3555_v22 = vadd.f32 %v8721_v51, %v3196_v18 }
 0x1fb   : > { %v4880_v48 = vsel %vm4816_vm10, %v4784_v0, %v4848_v58  ;;  %v4746_v39 = vadd.f32 %v4631_v5, %v4276_v15  ;;  %v4279_v31 = vadd.f32 %v6007_v23, %v3553_v25  ;;  %v6044_v43 = vpop.f32.mrf.mxu0  ;;  %v3201_v24 = vadd.f32 %v8731_v41, %v8626_v53 }
 0x1fc   : > { %4912 = vst [vmem:[%s8844_s9 + $0x18] sm:$0xff] %v4880_v48  ;;  %vm4814_vm11 = vcmp.ge.f32.partialorder %v4782_v13, 0.0  ;;  %v4846_v10 = vmul.f32 0.25, %v4782_v13  ;;  %v4787_v54 = vadd.f32 %v8822_v26, %v4748_v17  ;;  %v4164_v8 = vpop.f32.mrf.mxu1  ;;  %v3199_v28 = vadd.f32 %v8735_v52, %v8629_v12 }
 0x1fd   : > { %v4785_v61 = vadd.f32 %v8822_v26, %v4746_v39  ;;  %v4749_v59 = vadd.f32 %v6041_v45, %v4279_v31  ;;  %v4277_v3 = vadd.f32 %v4164_v8, %v3551_v60  ;;  %v4647_v46 = vpop.f32.mrf.mxu0  ;;  %v3202_v40 = vadd.f32 %v8739_v14, %v8632_v16 }
 0x1fe   : > { %v4878_v35 = vsel %vm4814_vm11, %v4782_v13, %v4846_v10  ;;  %vm4819_vm12 = vcmp.ge.f32.partialorder %v4787_v54, 0.0  ;;  %v4851_v50 = vmul.f32 0.25, %v4787_v54  ;;  %v6010_v38 = vpop.f32.mrf.mxu1  ;;  %v3200_v53 = vadd.f32 %v8743_v32, %v8635_v11 }
 0x1ff   : > { %4910 = vst [vmem:[%s8844_s9 + $0x8] sm:$0xff] %v4878_v35  ;;  %vm4817_vm13 = vcmp.ge.f32.partialorder %v4785_v61, 0.0  ;;  %v4849_v5 = vmul.f32 0.25, %v4785_v61  ;;  %v4788_v25 = vadd.f32 %v8822_v26, %v4749_v59  ;;  %v4747_v34 = vadd.f32 %v4634_v42, %v4277_v3  ;;  %v6045_v1 = vpop.f32.mrf.mxu0  ;;  %v9268_v59 = vld [vmem:[#allocation5_spill] sm:$0xff] }
 0x200   : > { %v4883_v51 = vsel %vm4819_vm12, %v4787_v54, %v4851_v50  ;;  %v4282_v36 = vadd.f32 %v6010_v38, %v3556_v6  ;;  %v4177_v37 = vpop.f32.mrf.mxu1  ;;  %v3560_v58 = vadd.f32 %v8725_v19, %v3201_v24  ;;  %v3205_v15 = vadd.f32 %v8747_v44, %v8638_v29  ;;  %v9269_v3 = vld [vmem:[#allocation25_spill] sm:$0xff] }
 0x201   : > { %4915 = vst [vmem:[%s8844_s9 + $0x30] sm:$0xff] %v4883_v51  ;;  %v4881_v21 = vsel %vm4817_vm13, %v4785_v61, %v4849_v5  ;;  %vm4820_vm14 = vcmp.ge.f32.partialorder %v4788_v25, 0.0  ;;  %v4852_v0 = vmul.f32 0.25, %v4788_v25  ;;  %v4786_v45 = vadd.f32 %v8822_v26, %v4747_v34  ;;  %v4650_v62 = vpop.f32.mrf.mxu0  ;;  %v9270_v34 = vld [vmem:[#allocation17_spill] sm:$0xff]  ;;  %v9273_v51 = vld [vmem:[#allocation19_spill] sm:$0xff] }
 0x202   : > { %4913 = vst [vmem:[%s8844_s9 + $0x20] sm:$0xff] %v4881_v21  ;;  %v4752_v41 = vadd.f32 %v6044_v43, %v4282_v36  ;;  %v4280_v12 = vadd.f32 %v4177_v37, %v3554_v63  ;;  %v6011_v52 = vpop.f32.mrf.mxu1  ;;  %v3558_v32 = vadd.f32 %v8729_v57, %v3199_v28  ;;  %v3561_v17 = vadd.f32 %v8733_v47, %v3202_v40  ;;  %v9272_v28 = vld [vmem:[#allocation22_spill] sm:$0xff] }
 0x203   : > { %v4884_v2 = vsel %vm4820_vm14, %v4788_v25, %v4852_v0  ;;  %vm4818_vm15 = vcmp.ge.f32.partialorder %v4786_v45, 0.0  ;;  %v4850_v27 = vmul.f32 0.25, %v4786_v45  ;;  %v4283_v4 = vadd.f32 %v6011_v52, %v3557_v33  ;;  %v6048_v7 = vpop.f32.mrf.mxu0  ;;  %v9267_v33 = vld [vmem:[#allocation20_spill] sm:$0xff] }
 0x204   : > { %4916 = vst [vmem:[%s8844_s9 + $0x38] sm:$0xff] %v4884_v2  ;;  %v4791_v16 = vadd.f32 %v8822_v26, %v4752_v41  ;;  %v4750_v14 = vadd.f32 %v4647_v46, %v4280_v12  ;;  %v4180_v11 = vpop.f32.mrf.mxu1  ;;  %v3559_v44 = vadd.f32 %v8737_v49, %v3200_v53  ;;  %v3564_v31 = vadd.f32 %v8741_v20, %v3205_v15  ;;  %v9274_v53 = vld [vmem:[#allocation16_spill] sm:$0xff] }
 0x205   : > { %v4882_v42 = vsel %vm4818_vm15, %v4786_v45, %v4850_v27  ;;  %v4753_v60 = vadd.f32 %v6045_v1, %v4283_v4  ;;  %v4281_v18 = vadd.f32 %v4180_v11, %v3555_v22  ;;  %v4663_v13 = vpop.f32.mrf.mxu0  ;;  %v3203_v61 = vadd.f32 %v9267_v33, %v8641_v9  ;;  %v9271_v1 = vld [vmem:[#allocation14_spill] sm:$0xff]  ;;  %v9282_v33 = vld [vmem:[#allocation24_spill] sm:$0xff] }
 0x206   : > { %4914 = vst [vmem:[%s8844_s9 + $0x28] sm:$0xff] %v4882_v42  ;;  %vm4823_vm0 = vcmp.ge.f32.partialorder %v4791_v16, 0.0  ;;  %v4855_v19 = vmul.f32 0.25, %v4791_v16  ;;  %v4789_v23 = vadd.f32 %v8822_v26, %v4750_v14  ;;  %v6014_v29 = vpop.f32.mrf.mxu1  ;;  %v3206_v46 = vadd.f32 %v9269_v3, %v9268_v59  ;;  %v9275_v27 = vld [vmem:[#allocation18_spill] sm:$0xff]  ;;  %v9276_v14 = vld [vmem:[#allocation23_spill] sm:$0xff] }
 0x207   : > { %v4792_v6 = vadd.f32 %v8822_v26, %v4753_v60  ;;  %v4751_v48 = vadd.f32 %v4650_v62, %v4281_v18  ;;  %v4286_v39 = vadd.f32 %v6014_v29, %v3560_v58  ;;  %v6049_v57 = vpop.f32.mrf.mxu0  ;;  %v3204_v24 = vadd.f32 %v9271_v1, %v9270_v34  ;;  %v9277_v18 = vld [vmem:[#allocation27_spill] sm:$0xff]  ;;  %v9285_v34 = vld [vmem:[#allocation26_spill] sm:$0xff] }
 0x208   : > { %v4887_v43 = vsel %vm4823_vm0, %v4791_v16, %v4855_v19  ;;  %vm4821_vm1 = vcmp.ge.f32.partialorder %v4789_v23, 0.0  ;;  %v4853_v47 = vmul.f32 0.25, %v4789_v23  ;;  %v4193_v63 = vpop.f32.mrf.mxu1  ;;  %v3209_v9 = vadd.f32 %v9273_v51, %v9272_v28  ;;  %v9286_v1 = vld [vmem:[#allocation35_spill] sm:$0xff] }
 0x209   : > { %4919 = vst [vmem:[%s8844_s9 + $0x50] sm:$0xff] %v4887_v43  ;;  %vm4824_vm2 = vcmp.ge.f32.partialorder %v4792_v6, 0.0  ;;  %v4856_v10 = vmul.f32 0.25, %v4792_v6  ;;  %v4790_v54 = vadd.f32 %v8822_v26, %v4751_v48  ;;  %v4756_v8 = vadd.f32 %v6048_v7, %v4286_v39  ;;  %v4666_v49 = vpop.f32.mrf.mxu0 }
 0x20a   : > { %v4885_v20 = vsel %vm4821_vm1, %v4789_v23, %v4853_v47  ;;  %v4284_v22 = vadd.f32 %v4193_v63, %v3558_v32  ;;  %v6015_v35 = vpop.f32.mrf.mxu1  ;;  %v3562_v41 = vadd.f32 %v9274_v53, %v3203_v61  ;;  %v3565_v4 = vadd.f32 %v9275_v27, %v3206_v46  ;;  %v9283_v61 = vld [vmem:[#allocation33_spill] sm:$0xff] }
 0x20b   : > { %4917 = vst [vmem:[%s8844_s9 + $0x40] sm:$0xff] %v4885_v20  ;;  %v4888_v50 = vsel %vm4824_vm2, %v4792_v6, %v4856_v10  ;;  %vm4822_vm3 = vcmp.ge.f32.partialorder %v4790_v54, 0.0  ;;  %v4854_v38 = vmul.f32 0.25, %v4790_v54  ;;  %v4795_v5 = vadd.f32 %v8822_v26, %v4756_v8  ;;  %v6052_v25 = vpop.f32.mrf.mxu0  ;;  %v9279_v6 = vld [vmem:[#allocation29_spill] sm:$0xff]  ;;  %v9281_v8 = vld [vmem:[#allocation31_spill] sm:$0xff] }
 0x20c   : > { %4920 = vst [vmem:[%s8844_s9 + $0x58] sm:$0xff] %v4888_v50  ;;  %v4754_v36 = vadd.f32 %v4663_v13, %v4284_v22  ;;  %v4287_v37 = vadd.f32 %v6015_v35, %v3561_v17  ;;  %v4196_v21 = vpop.f32.mrf.mxu1  ;;  %v3563_v11 = vadd.f32 %v9276_v14, %v3204_v24  ;;  %v3568_v13 = vadd.f32 %v9277_v18, %v3209_v9 }
 0x20d   : > { %v4886_v0 = vsel %vm4822_vm3, %v4790_v54, %v4854_v38  ;;  %vm4827_vm4 = vcmp.ge.f32.partialorder %v4795_v5, 0.0  ;;  %v4859_v45 = vmul.f32 0.25, %v4795_v5  ;;  %v4285_v62 = vadd.f32 %v4196_v21, %v3559_v44  ;;  %v4679_v40 = vpop.f32.mrf.mxu0  ;;  %v9278_v44 = vld [vmem:[#allocation12_spill] sm:$0xff]  ;;  %v9280_v54 = vld [vmem:[#allocation21_spill] sm:$0xff] }
 0x20e   : > { %4918 = vst [vmem:[%s8844_s9 + $0x48] sm:$0xff] %v4886_v0  ;;  %v4793_v12 = vadd.f32 %v8822_v26, %v4754_v36  ;;  %v4757_v52 = vadd.f32 %v6049_v57, %v4287_v37  ;;  %v6018_v2 = vpop.f32.mrf.mxu1  ;;  %v3207_v48 = vadd.f32 %v9279_v6, %v9278_v44  ;;  %v3208_v59 = vadd.f32 %v9283_v61, %v9282_v33 }
 0x20f   : > { %v4891_v7 = vsel %vm4827_vm4, %v4795_v5, %v4859_v45  ;;  %v4755_v58 = vadd.f32 %v4666_v49, %v4285_v62  ;;  %v4290_v15 = vadd.f32 %v6018_v2, %v3564_v31  ;;  %v6053_v16 = vpop.f32.mrf.mxu0  ;;  %v3210_v49 = vadd.f32 %v9281_v8, %v9280_v54  ;;  %v9284_v5 = vld [vmem:[#allocation11_spill] sm:$0xff]  ;;  %v9295_v54 = vld [vmem:[#allocation6_spill] sm:$0xff]  ;;  %v9296_v8 = vld [vmem:[#allocation41_spill] sm:$0xff] }
 0x210   : > { %4923 = vst [vmem:[%s8844_s9 + $0x70] sm:$0xff] %v4891_v7  ;;  %vm4825_vm5 = vcmp.ge.f32.partialorder %v4793_v12, 0.0  ;;  %v4857_v32 = vmul.f32 0.25, %v4793_v12  ;;  %v4796_v42 = vadd.f32 %v8822_v26, %v4757_v52  ;;  %v4209_v60 = vpop.f32.mrf.mxu1  ;;  %v3213_v24 = vadd.f32 %v9286_v1, %v9285_v34  ;;  %v9287_v45 = vld [vmem:[#allocation15_spill] sm:$0xff] }
 0x211   : > { %v4794_v17 = vadd.f32 %v8822_v26, %v4755_v58  ;;  %v4760_v19 = vadd.f32 %v6052_v25, %v4290_v15  ;;  %v4288_v23 = vadd.f32 %v4209_v60, %v3562_v41  ;;  %v4682_v29 = vpop.f32.mrf.mxu0  ;;  %v3566_v25 = vadd.f32 %v9284_v5, %v3207_v48  ;;  %v9289_v58 = vld [vmem:[#allocation28_spill] sm:$0xff]  ;;  %v9290_v15 = vld [vmem:[#allocation37_spill] sm:$0xff]  ;;  %v9299_v5 = vld [vmem:[#allocation43_spill] sm:$0xff] }
 0x212   : > { %v4889_v39 = vsel %vm4825_vm5, %v4793_v12, %v4857_v32  ;;  %vm4828_vm6 = vcmp.ge.f32.partialorder %v4796_v42, 0.0  ;;  %v4860_v57 = vmul.f32 0.25, %v4796_v42  ;;  %v6019_v31 = vpop.f32.mrf.mxu1  ;;  %v3569_v62 = vadd.f32 %v9287_v45, %v3210_v49  ;;  %v9288_v12 = vld [vmem:[#allocation30_spill] sm:$0xff] }
 0x213   : > { %4921 = vst [vmem:[%s8844_s9 + $0x60] sm:$0xff] %v4889_v39  ;;  %vm4826_vm7 = vcmp.ge.f32.partialorder %v4794_v17, 0.0  ;;  %v4858_v43 = vmul.f32 0.25, %v4794_v17  ;;  %v4799_v47 = vadd.f32 %v8822_v26, %v4760_v19  ;;  %v4758_v63 = vadd.f32 %v4679_v40, %v4288_v23  ;;  %v9292_v23 = vld [vmem:[#allocation7_spill] sm:$0xff] }
 0x214   : > { %v6056_v10 = vpop.f32.mrf.mxu0  ;;  %v4892_v3 = vsel %vm4828_vm6, %v4796_v42, %v4860_v57  ;;  %v4291_v46 = vadd.f32 %v6019_v31, %v3565_v4  ;;  %v4212_v20 = vpop.f32.mrf.mxu1  ;;  %v3567_v52 = vadd.f32 %v9288_v12, %v3208_v59  ;;  %v9291_v42 = vld [vmem:[#allocation32_spill] sm:$0xff]  ;;  %v3212_v49 = vadd.f32 %v9296_v8, %v9295_v54 }
 0x215   : > { %4924 = vst [vmem:[%s8844_s9 + $0x78] sm:$0xff] %v4892_v3  ;;  %v4890_v22 = vsel %vm4826_vm7, %v4794_v17, %v4858_v43  ;;  %vm4831_vm8 = vcmp.ge.f32.partialorder %v4799_v47, 0.0  ;;  %v4863_v35 = vmul.f32 0.25, %v4799_v47  ;;  %v4797_v50 = vadd.f32 %v8822_v26, %v4758_v63  ;;  %v9294_v63 = vld [vmem:[#allocation34_spill] sm:$0xff] }
 0x216   : > { %v4695_v38 = vpop.f32.mrf.mxu0  ;;  %4922 = vst [vmem:[%s8844_s9 + $0x68] sm:$0xff] %v4890_v22  ;;  %v4761_v28 = vadd.f32 %v6053_v16, %v4291_v46  ;;  %v4289_v51 = vadd.f32 %v4212_v20, %v3563_v11  ;;  %v6022_v9 = vpop.f32.mrf.mxu1  ;;  %v3211_v16 = vadd.f32 %v9290_v15, %v9289_v58  ;;  %v3572_v60 = vadd.f32 %v9291_v42, %v3213_v24 }
 0x217   : > { %v4895_v36 = vsel %vm4831_vm8, %v4799_v47, %v4863_v35  ;;  %vm4829_vm9 = vcmp.ge.f32.partialorder %v4797_v50, 0.0  ;;  %v4861_v37 = vmul.f32 0.25, %v4797_v50  ;;  %v4294_v21 = vadd.f32 %v6022_v9, %v3568_v13  ;;  %v9297_v35 = vld [vmem:[#allocation36_spill] sm:$0xff] }
 0x218   : > { %v6057_v0 = vpop.f32.mrf.mxu0  ;;  %4927 = vst [vmem:[%s8844_s9 + $0x90] sm:$0xff] %v4895_v36  ;;  %v4800_v40 = vadd.f32 %v8822_v26, %v4761_v28  ;;  %v4759_v53 = vadd.f32 %v4682_v29, %v4289_v51  ;;  %v4225_v41 = vpop.f32.mrf.mxu1  ;;  %v9293_v29 = vld [vmem:[#allocation39_spill] sm:$0xff] }
 0x219   : > { %v4893_v2 = vsel %vm4829_vm9, %v4797_v50, %v4861_v37  ;;  %v4764_v27 = vadd.f32 %v6056_v10, %v4294_v21  ;;  %v4292_v4 = vadd.f32 %v4225_v41, %v3566_v25  ;;  %v3214_v44 = vadd.f32 %v9293_v29, %v9292_v23  ;;  %v9300_v37 = vld [vmem:[#allocation38_spill] sm:$0xff] }
 0x21a   : > { %v4698_v7 = vpop.f32.mrf.mxu0  ;;  %4925 = vst [vmem:[%s8844_s9 + $0x80] sm:$0xff] %v4893_v2  ;;  %vm4832_vm10 = vcmp.ge.f32.partialorder %v4800_v40, 0.0  ;;  %v4864_v14 = vmul.f32 0.25, %v4800_v40  ;;  %v4798_v11 = vadd.f32 %v8822_v26, %v4759_v53  ;;  %v6023_v32 = vpop.f32.mrf.mxu1  ;;  %v3570_v10 = vadd.f32 %v9294_v63, %v3211_v16  ;;  %v9302_v53 = vld [vmem:[#allocation45_spill] sm:$0xff] }
 0x21b   : > { %v4803_v18 = vadd.f32 %v8822_v26, %v4764_v27  ;;  %v4762_v13 = vadd.f32 %v4695_v38, %v4292_v4  ;;  %v4295_v17 = vadd.f32 %v6023_v32, %v3569_v62  ;;  %v3573_v50 = vadd.f32 %v9297_v35, %v3214_v44  ;;  %v9298_v38 = vld [vmem:[#allocation9_spill] sm:$0xff]  ;;  %v9303_v4 = vld [vmem:[#allocation10_spill] sm:$0xff] }
 0x21c   : > { %v6060_v19 = vpop.f32.mrf.mxu0  ;;  %v4896_v6 = vsel %vm4832_vm10, %v4800_v40, %v4864_v14  ;;  %vm4830_vm11 = vcmp.ge.f32.partialorder %v4798_v11, 0.0  ;;  %v4862_v48 = vmul.f32 0.25, %v4798_v11  ;;  %v4228_v39 = vpop.f32.mrf.mxu1  ;;  %v3217_v25 = vadd.f32 %v9299_v5, %v9298_v38  ;;  %v9301_v40 = vld [vmem:[#allocation8_spill] sm:$0xff] }
 0x21d   : > { %4928 = vst [vmem:[%s8844_s9 + $0x98] sm:$0xff] %v4896_v6  ;;  %vm4835_vm12 = vcmp.ge.f32.partialorder %v4803_v18, 0.0  ;;  %v4867_v57 = vmul.f32 0.25, %v4803_v18  ;;  %v4801_v31 = vadd.f32 %v8822_v26, %v4762_v13  ;;  %v4765_v43 = vadd.f32 %v6057_v0, %v4295_v17  ;;  %v9304_v14 = vld [vmem:[#allocation40_spill] sm:$0xff] }
 0x21e   : > { %v4711_v47 = vpop.f32.mrf.mxu0  ;;  %v4894_v33 = vsel %vm4830_vm11, %v4798_v11, %v4862_v48  ;;  %v4293_v61 = vadd.f32 %v4228_v39, %v3567_v52  ;;  %v6026_v59 = vpop.f32.mrf.mxu1  ;;  %v3571_v21 = vadd.f32 %v9300_v37, %v3212_v49  ;;  %v3215_v41 = vadd.f32 %v9302_v53, %v9301_v40  ;;  %v9306_v48 = vld [vmem:[#allocation42_spill] sm:$0xff] }
 0x21f   : > { %4926 = vst [vmem:[%s8844_s9 + $0x88] sm:$0xff] %v4894_v33  ;;  %v4899_v3 = vsel %vm4835_vm12, %v4803_v18, %v4867_v57  ;;  %vm4833_vm13 = vcmp.ge.f32.partialorder %v4801_v31, 0.0  ;;  %v4865_v46 = vmul.f32 0.25, %v4801_v31  ;;  %v4804_v20 = vadd.f32 %v8822_v26, %v4765_v43  ;;  %v9305_v18 = vld [vmem:[#allocation13_spill] sm:$0xff]  ;;  %v9307_v57 = vld [vmem:[#allocation44_spill] sm:$0xff] }
 0x220   : > { %v6061_v22 = vpop.f32.mrf.mxu0  ;;  %4931 = vst [vmem:[%s8844_s9 + $0xb0] sm:$0xff] %v4899_v3  ;;  %v4763_v34 = vadd.f32 %v4698_v7, %v4293_v61  ;;  %v4298_v1 = vadd.f32 %v6026_v59, %v3572_v60  ;;  %v4241_v24 = vpop.f32.mrf.mxu1  ;;  %v3218_v7 = vadd.f32 %v8804_v55, %v9303_v4  ;;  %v3576_v11 = vadd.f32 %v9304_v14, %v3217_v25 }
 0x221   : > { %v4897_v28 = vsel %vm4833_vm13, %v4801_v31, %v4865_v46  ;;  %vm4836_vm14 = vcmp.ge.f32.partialorder %v4804_v20, 0.0  ;;  %v4868_v51 = vmul.f32 0.25, %v4804_v20  ;;  %v4296_v9 = vadd.f32 %v4241_v24, %v3570_v10 }
 0x222   : > { %v4714_v36 = vpop.f32.mrf.mxu0  ;;  %4929 = vst [vmem:[%s8844_s9 + $0xa0] sm:$0xff] %v4897_v28  ;;  %v4802_v0 = vadd.f32 %v8822_v26, %v4763_v34  ;;  %v4768_v45 = vadd.f32 %v6060_v19, %v4298_v1  ;;  %v6027_v62 = vpop.f32.mrf.mxu1  ;;  %v3216_v13 = vadd.f32 %v8807_v30, %v9305_v18  ;;  %v3574_v39 = vadd.f32 %v9306_v48, %v3215_v41 }
 0x223   : > { %v4900_v12 = vsel %vm4836_vm14, %v4804_v20, %v4868_v51  ;;  %v4766_v52 = vadd.f32 %v4711_v47, %v4296_v9  ;;  %v4299_v2 = vadd.f32 %v6027_v62, %v3573_v50  ;;  %v3577_v31 = vadd.f32 %v9307_v57, %v3218_v7 }
 0x224   : > { %v6064_v27 = vpop.f32.mrf.mxu0  ;;  %4932 = vst [vmem:[%s8844_s9 + $0xb8] sm:$0xff] %v4900_v12  ;;  %vm4834_vm15 = vcmp.ge.f32.partialorder %v4802_v0, 0.0  ;;  %v4866_v58 = vmul.f32 0.25, %v4802_v0  ;;  %v4807_v15 = vadd.f32 %v8822_v26, %v4768_v45  ;;  %v4244_v16 = vpop.f32.mrf.mxu1  ;;  %v3575_v8 = vadd.f32 %v8802_v56, %v3216_v13 }
 0x225   : > { %v4805_v32 = vadd.f32 %v8822_v26, %v4766_v52  ;;  %v4769_v42 = vadd.f32 %v6061_v22, %v4299_v2  ;;  %v4297_v60 = vadd.f32 %v4244_v16, %v3571_v21 }
 0x226   : > { %v4898_v17 = vsel %vm4834_vm15, %v4802_v0, %v4866_v58  ;;  %vm4839_vm0 = vcmp.ge.f32.partialorder %v4807_v15, 0.0  ;;  %v4871_v55 = vmul.f32 0.25, %v4807_v15  ;;  %v6030_v19 = vpop.f32.mrf.mxu1  ;;  %v4727_v23 = vpop.f32.mrf.mxu0 }
 0x227   : > { %4930 = vst [vmem:[%s8844_s9 + $0xa8] sm:$0xff] %v4898_v17  ;;  %vm4837_vm1 = vcmp.ge.f32.partialorder %v4805_v32, 0.0  ;;  %v4869_v29 = vmul.f32 0.25, %v4805_v32  ;;  %v4808_v44 = vadd.f32 %v8822_v26, %v4769_v42  ;;  %v4767_v6 = vadd.f32 %v4714_v36, %v4297_v60 }
 0x228   : > { %v4903_v43 = vsel %vm4839_vm0, %v4807_v15, %v4871_v55  ;;  %v4302_v47 = vadd.f32 %v6030_v19, %v3576_v11  ;;  %v4257_v30 = vpop.f32.mrf.mxu1  ;;  %v6065_v59 = vpop.f32.mrf.mxu0 }
 0x229   : > { %4935 = vst [vmem:[%s8844_s9 + $0xd0] sm:$0xff] %v4903_v43  ;;  %v4901_v63 = vsel %vm4837_vm1, %v4805_v32, %v4869_v29  ;;  %vm4840_vm2 = vcmp.ge.f32.partialorder %v4808_v44, 0.0  ;;  %v4872_v10 = vmul.f32 0.25, %v4808_v44  ;;  %v4806_v54 = vadd.f32 %v8822_v26, %v4767_v6 }
 0x22a   : > { %4933 = vst [vmem:[%s8844_s9 + $0xc0] sm:$0xff] %v4901_v63  ;;  %v4772_v49 = vadd.f32 %v6064_v27, %v4302_v47  ;;  %v4300_v33 = vadd.f32 %v4257_v30, %v3574_v39  ;;  %v6031_v61 = vpop.f32.mrf.mxu1  ;;  %v4730_v1 = vpop.f32.mrf.mxu0 }
 0x22b   : > { %v4904_v3 = vsel %vm4840_vm2, %v4808_v44, %v4872_v10  ;;  %vm4838_vm3 = vcmp.ge.f32.partialorder %v4806_v54, 0.0  ;;  %v4870_v46 = vmul.f32 0.25, %v4806_v54  ;;  %v4303_v20 = vadd.f32 %v6031_v61, %v3577_v31 }
 0x22c   : > { %4936 = vst [vmem:[%s8844_s9 + $0xd8] sm:$0xff] %v4904_v3  ;;  %v4811_v22 = vadd.f32 %v8822_v26, %v4772_v49  ;;  %v4770_v35 = vadd.f32 %v4727_v23, %v4300_v33  ;;  %v4260_v50 = vpop.f32.mrf.mxu1 }
 0x22d   : > { %v4902_v38 = vsel %vm4838_vm3, %v4806_v54, %v4870_v46  ;;  %v4773_v56 = vadd.f32 %v6065_v59, %v4303_v20  ;;  %v4301_v5 = vadd.f32 %v4260_v50, %v3575_v8 }
 0x22e   : > { %4934 = vst [vmem:[%s8844_s9 + $0xc8] sm:$0xff] %v4902_v38  ;;  %vm4843_vm4 = vcmp.ge.f32.partialorder %v4811_v22, 0.0  ;;  %v4875_v25 = vmul.f32 0.25, %v4811_v22  ;;  %v4809_v34 = vadd.f32 %v8822_v26, %v4770_v35 }
 0x22f   : > { %v4812_v24 = vadd.f32 %v8822_v26, %v4773_v56  ;;  %v4771_v28 = vadd.f32 %v4730_v1, %v4301_v5 }
 0x230   : > { %v4907_v51 = vsel %vm4843_vm4, %v4811_v22, %v4875_v25  ;;  %vm4841_vm5 = vcmp.ge.f32.partialorder %v4809_v34, 0.0  ;;  %v4873_v9 = vmul.f32 0.25, %v4809_v34 }
 0x231   : > { %4939 = vst [vmem:[%s8844_s9 + $0xf0] sm:$0xff] %v4907_v51  ;;  %vm4844_vm6 = vcmp.ge.f32.partialorder %v4812_v24, 0.0  ;;  %v4876_v36 = vmul.f32 0.25, %v4812_v24  ;;  %v4810_v37 = vadd.f32 %v8822_v26, %v4771_v28 }
 0x232   : > { %v4905_v21 = vsel %vm4841_vm5, %v4809_v34, %v4873_v9 }
 0x233   : > { %4937 = vst [vmem:[%s8844_s9 + $0xe0] sm:$0xff] %v4905_v21  ;;  %v4908_v0 = vsel %vm4844_vm6, %v4812_v24, %v4876_v36  ;;  %vm4842_vm7 = vcmp.ge.f32.partialorder %v4810_v37, 0.0  ;;  %v4874_v45 = vmul.f32 0.25, %v4810_v37 }
 0x234   : > { %4940 = vst [vmem:[%s8844_s9 + $0xf8] sm:$0xff] %v4908_v0 }
 0x235   : > { %v4906_v62 = vsel %vm4842_vm7, %v4810_v37, %v4874_v45 }
 0x236   : > { %4938 = vst [vmem:[%s8844_s9 + $0xe8] sm:$0xff] %v4906_v62 }
 0x237   : > { %6199 = shalt.err (!%p6196_p5)
}
 0x238   : > { %s6200_s29 = scalar_lea.hbm %s8977_s21, 4096  ;;  %s6204_s5 = scalar_lea.hbm %s9033_s3, 8192 }
 0x239   : > { %p6201_p6 = scmp.ne.s32.totalorder %s8977_s21, %s6200_s29  ;;  %p6205_p10 = scmp.lt.s32.totalorder %s8977_s21, %s9033_s3 }
 0x23a   : > { %p6206_p11 = scmp.lt.s32.totalorder %s6204_s5, %s6200_s29 }
 0x23b   : > { %p6202_p7 = pnand %p6201_p6, %p6327_p4 }
 0x23c   : > { %p6207_p12 = por %p6206_p11, %p6205_p10 }
 0x23d   : > { %p6203_p9 = pneg %p6202_p7 }
 0x23f   : > { %p6208_p13 = pnand %p6207_p12, %p6203_p9 }
 0x241   : > { %6211 = shalt.err (!%p6208_p13)
}
 0x242   : > { %s6265_s8 = smov 128   ;;  %s6266_s9 = smov 8  }
 0x243   : > { %6079 = dma.vmem_to_hbm [thread:$0]  (%p6327_p4), %s8979_s11, 4096, %s8977_s21, %s8985_s15, %s6265_s8, %s6265_s8, %s6266_s9  }
 0x244 PF: > { %p6085_p0 = scmp.ge.s32.totalorder %s6262_s17, 2  ;;  %s4971_s10 = sand.u32 1, %s6242_s12  }
 0x245   : > { %s4972_s18 = scalar_lea.sflag [#allocation3], %s4971_s10 }
 0x246   : > { %p6082_p1 = pnand %p6085_p0, %p6334_p8 }
 0x248   : > { %p6083_p2 = pneg %p6082_p1 }
 0x24a   : > { %6237 = dma.done.wait (%p6083_p2), %s4972_s18, 4096  }
 0x24b   : > { %6239 = vsyncadd (%p6083_p2), %s4972_s18, 4294963200  ;;  %s16_s17 = sadd.s32 1, %s6262_s17   ;;  %s9308_s12 = smov %s6246_s13 }
 0x24c   : > { %p13_p3 = scmp.ge.s32.totalorder %s16_s17, 4   ;;  %s9309_s13 = smov %s6250_s14 }
 0x24d   : > { %s9310_s14 = smov %s6340_s25  ;;  %s9311_s15 = smov %s6258_s16 }
 0x24e   : > { %s9312_s16 = smov %s9314_s20  ;;  %15 = sbr.rel (!%p13_p3) target bundleno = 4 (0x4), region = 83 }
 0x253   :  { %4977 = vsyncpa [#allocation3], 1 }
 0x254   :  { %4979 = vsyncpa [#allocation3 + $0x1], 1 }

</bundles_post_ra>
